<compile_context>
chip_gen: v5e
topology: v5e:2x2
jax: 0.10.0
libtpu: 0.0.40
codegen_flags: <defaults>
</compile_context>

<pallas_src>
import functools
import math

import jax
import jax.numpy as jnp
import numpy as np
from jax import lax
from jax.experimental import pallas as pl
from jax.experimental.pallas import tpu as pltpu

LANE = 128


def _round_up(n, m):
    return ((n + m - 1) // m) * m


def _pad_axis_to(x, size, axis):
    pad = size - x.shape[axis]
    if pad <= 0:
        return x
    widths = [(0, 0)] * x.ndim
    widths[axis] = (0, pad)
    return jnp.pad(x, widths)


def _vmem_limit(*block_bytes):
    # double-buffered blocks + ~50% headroom, clamped to a safe range.
    need = 2 * sum(int(b) for b in block_bytes)
    return int(min(64 << 20, max(32 << 20, int(need * 1.5))))


def _choose_group(B, per_image_bytes, budget=4 << 20, max_g=8):
    """Images packed per grid step: amortize ~0.35us step overhead, keep weights hot."""
    g = max(1, min(max_g, budget // max(per_image_bytes, 1)))
    g = min(g, B)
    if B >= 2:                       # keep >=2 parallel grid steps for v7x's 2 TCs
        g = min(g, -(-B // 2))
    return max(1, g)


# ------------------- 3x3 'same' conv + bias + ReLU (per group) ----------------
def _conv3x3_kernel(x_ref, w_ref, b_ref, o_ref, *, ws, m, w_real,
                    off_in, off_out, out_padded):
    """One group of G images per grid step.

    x_ref: (G, npad_in, Cp)  flattened zero-padded slabs (bf16); pixel (y,x) of
                             image g lives at row y*ws + x + off_in, everything
                             else is zero.
    w_ref: (9, Cp, Cop)      taps ordered dy*3+dx (bf16)
    b_ref: (1, Cop)          f32
    o_ref: out_padded -> (G, npad_out, Cop): next conv's slab (offset off_out,
                             wrap rows masked to zero, borders zeroed here).
           else        -> (G, m, Cop): raw flat rows j = y*ws + x (wrap rows
                             j%ws >= W contain garbage; consumer ignores them).
    """
    g_count = x_ref.shape[0]
    cop = o_ref.shape[-1]
    base = off_in - ws - 1                 # tap (dy,dx) -> slab row j + base + dy*ws + dx
    # Bias folded into the accumulator init (single hoisted broadcast).
    bias = jnp.broadcast_to(b_ref[...], (m, cop)).astype(jnp.float32)
    if out_padded:
        col = lax.broadcasted_iota(jnp.int32, (m, 1), 0) % ws
        keep = col < w_real                # wrap rows land on the next layer's padding
        npad_o = o_ref.shape[1]
        tail = npad_o - off_out - m

    for g in range(g_count):
        acc = bias
        for tap in range(9):
            dy, dx = tap // 3, tap % 3
            start = base + dy * ws + dx    # static contiguous row-slice of the slab
            slab = x_ref[g, start:start + m, :]
            acc = acc + jnp.dot(slab, w_ref[tap],
                                preferred_element_type=jnp.float32)
        y = jnp.maximum(acc, 0.0)
        if out_padded:
            y = jnp.where(keep, y, 0.0).astype(o_ref.dtype)
            o_ref[g, 0:off_out, :] = jnp.zeros((off_out, cop), o_ref.dtype)
            o_ref[g, off_out:off_out + m, :] = y
            o_ref[g, off_out + m:off_out + m + tail, :] = jnp.zeros((tail, cop),
                                                                    o_ref.dtype)
        else:
            o_ref[g, :, :] = y.astype(o_ref.dtype)


def _conv3x3(act, w9, b2, *, H, W, ws, off_in, G, out_padded):
    """act: (Bp, npad_in, Cp) bf16 slab; returns (out, off_out)."""
    Bp, npad_in, cpi = act.shape
    cpo = w9.shape[-1]
    m = H * ws
    if out_padded:
        off_out = _round_up(ws + 1, 8)                      # aligned store offset
        out_rows = _round_up(m + ws + off_out + 1, 8)       # next conv's read bound
    else:
        off_out = 0
        out_rows = m
    steps = Bp // G

    kern = functools.partial(_conv3x3_kernel, ws=ws, m=m, w_real=W,
                             off_in=off_in, off_out=off_out, out_padded=out_padded)

    in_block = G * npad_in * cpi * 2
    out_block = G * out_rows * cpo * 2
    w_bytes = 9 * cpi * cpo * 2
    b_bytes = cpo * 4
    cost = pl.CostEstimate(
        flops=2 * Bp * m * 9 * cpi * cpo,
        transcendentals=0,
        bytes_accessed=Bp * (npad_in * cpi + out_rows * cpo) * 2
        + steps * (w_bytes + b_bytes),
    )
    out = pl.pallas_call(
        kern,
        out_shape=jax.ShapeDtypeStruct((Bp, out_rows, cpo), act.dtype),
        grid=(steps,),
        in_specs=[
            pl.BlockSpec((G, npad_in, cpi), lambda s: (s, 0, 0)),
            # TODO(synk): pipeline_mode=pl.Buffered(1) on these two grid-invariant
            # specs would halve their VMEM; left at the default for portability.
            pl.BlockSpec((9, cpi, cpo), lambda s: (0, 0, 0)),
            pl.BlockSpec((1, cpo), lambda s: (0, 0)),
        ],
        out_specs=pl.BlockSpec((G, out_rows, cpo), lambda s: (s, 0, 0)),
        compiler_params=pltpu.CompilerParams(
            dimension_semantics=("parallel",),
            vmem_limit_bytes=_vmem_limit(in_block, out_block, w_bytes, b_bytes)),
        cost_estimate=cost,
    )(act, w9, b2)
    return out, off_out


# ----------- 2D max-pool: flat conv output -> next block's padded slab --------
def _maxpool_slab_kernel(x_ref, o_ref, *, p, c, wq, hq):
    """x_ref: (G, hq, p, wsq, p*c)  (last column group holds wrap/pad garbage)
       o_ref: (G, hq+3, ws_next, c) next conv's padded slab (borders zeroed here).
    """
    g_count = x_ref.shape[0]
    rows_o, ws2 = o_ref.shape[1], o_ref.shape[2]
    for g in range(g_count):
        x = x_ref[g]                                   # (hq, p, wsq, p*c)
        acc = None
        for i in range(p):
            for j in range(p):
                v = x[:, i, :, j * c:(j + 1) * c]      # lane-aligned C slice
                acc = v if acc is None else jnp.maximum(acc, v)
        o_ref[g] = jnp.zeros((rows_o, ws2, c), o_ref.dtype)
        o_ref[g, 1:1 + hq, 1:1 + wq, :] = acc[:, :wq, :].astype(o_ref.dtype)


def _maxpool_to_slab(act_flat, *, H, W, ws, p, ws_next, G):
    """act_flat: (Bp, H*ws, C). Returns ((Bp, (H//p+3)*ws_next, C), off)."""
    Bp, m, c = act_flat.shape
    hq, wq = H // p, W // p
    wsq = ws // p
    if H % p:                                           # torch floors the pool
        act_flat = act_flat[:, :hq * p * ws, :]
    xr = act_flat.reshape(Bp, hq, p, wsq, p * c)        # free dim-split reshape
    rows_o = hq + 3
    steps = Bp // G
    kern = functools.partial(_maxpool_slab_kernel, p=p, c=c, wq=wq, hq=hq)
    in_block = G * hq * p * wsq * p * c * 2
    out_block = G * rows_o * ws_next * c * 2
    out = pl.pallas_call(
        kern,
        out_shape=jax.ShapeDtypeStruct((Bp, rows_o, ws_next, c), act_flat.dtype),
        grid=(steps,),
        in_specs=[pl.BlockSpec((G, hq, p, wsq, p * c),
                               lambda s: (s, 0, 0, 0, 0))],
        out_specs=pl.BlockSpec((G, rows_o, ws_next, c), lambda s: (s, 0, 0, 0)),
        compiler_params=pltpu.CompilerParams(
            dimension_semantics=("parallel",),
            vmem_limit_bytes=_vmem_limit(in_block, out_block)),
    )(xr)
    return out.reshape(Bp, rows_o * ws_next, c), ws_next + 1


# ------------------------------ CNN2d wrapper -------------------------------
def make_params(key, in_channel, out_channel, hidden_channel,
                n_conv_per_block, n_block, pool):
    """Deterministic params matching nn.Conv2d default (uniform +/- 1/sqrt(fan_in))."""
    assert n_block >= 2
    blocks = []
    dim = in_channel
    for bi in range(n_block):
        last = bi == n_block - 1
        block_out = out_channel if last else hidden_channel
        convs = []
        for ci in range(n_conv_per_block):
            cin = dim if ci == 0 else hidden_channel
            cout = block_out if ci == n_conv_per_block - 1 else hidden_channel
            key, kw, kb = jax.random.split(key, 3)
            bound = 1.0 / math.sqrt(cin * 9)
            w = jax.random.uniform(kw, (cout, cin, 3, 3), jnp.float32, -bound, bound)
            b = jax.random.uniform(kb, (cout,), jnp.float32, -bound, bound)
            convs.append((w, b))                  # torch layout (Cout, Cin, 3, 3)
        dim = block_out
        blocks.append((convs, 1 if last else pool))
    return blocks


def cnn2d_forward(x, params, flatten=True):
    """x: (*N, C, H, W) NCHW, like the PyTorch module."""
    lead = x.shape[:-3]
    C, H, W = (int(d) for d in x.shape[-3:])
    x = x.reshape((-1, C, H, W))
    B = int(x.shape[0])

    # Per-block geometry: slab width ws >= W+2, divisible by the block's pool.
    plan = []
    hh, ww = H, W
    for convs, p in params:
        ws = ww + 2 if p == 1 else _round_up(ww + 2, p)
        plan.append((convs, p, hh, ww, ws))
        if p != 1:
            hh, ww = hh // p, ww // p
    final_h, final_w = hh, ww
    n_blocks = len(plan)
    c_final = int(plan[-1][0][-1][0].shape[0])

    if B == 0:  # matches MaxPool2d's empty-batch branch
        out = jnp.zeros((0, c_final, final_h, final_w), jnp.float32)
        if flatten:
            out = out.reshape(0, -1)
        return out.reshape(lead + out.shape[1:])

    # NCHW -> NHWC, lane-pad channels, build block-0's padded slab, pack batch.
    cp = _round_up(C, LANE)
    ws0 = plan[0][4]
    per_img = (H + 3) * ws0 * cp * 2
    G = _choose_group(B, per_img)
    steps = -(-B // G)
    Bp = steps * G

    x = jnp.transpose(x, (0, 2, 3, 1)).astype(jnp.bfloat16)
    x = jnp.pad(x, ((0, Bp - B), (1, 2), (1, ws0 - 1 - W), (0, cp - C)))
    act = x.reshape(Bp, (H + 3) * ws0, cp)
    off = ws0 + 1
    c_real = C
    ended_with_pool = False

    for bi, (convs, p, bh, bw, ws) in enumerate(plan):
        for ci, (w, b) in enumerate(convs):
            cout, cin = int(w.shape[0]), int(w.shape[1])
            cpi = act.shape[-1]
            cpo = _round_up(cout, LANE)
            w9 = jnp.transpose(w, (2, 3, 1, 0)).reshape(9, cin, cout)
            w9 = _pad_axis_to(_pad_axis_to(w9, cpi, 1), cpo, 2).astype(jnp.bfloat16)
            b2 = _pad_axis_to(b, cpo, 0).reshape(1, cpo).astype(jnp.float32)
            # Output layout: padded slab if another conv consumes it, flat otherwise.
            feeds_conv = (ci < len(convs) - 1) or (p == 1 and bi < n_blocks - 1)
            act, off = _conv3x3(act, w9, b2, H=bh, W=bw, ws=ws, off_in=off,
                                G=G, out_padded=feeds_conv)
            c_real = cout
        ended_with_pool = False
        if p != 1:
            ws_next = plan[bi + 1][4] if bi + 1 < n_blocks else (bw // p + 2)
            act, off = _maxpool_to_slab(act, H=bh, W=bw, ws=ws, p=p,
                                        ws_next=ws_next, G=G)
            ended_with_pool = True

    cp_last = act.shape[-1]
    if ended_with_pool:
        nhwc = act.reshape(Bp, final_h + 3, final_w + 2, cp_last)[
            :B, 1:1 + final_h, 1:1 + final_w, :c_real]
    else:
        ws_f = plan[-1][4]
        nhwc = act.reshape(Bp, final_h, ws_f, cp_last)[:B, :, :final_w, :c_real]
    out = jnp.transpose(nhwc, (0, 3, 1, 2)).astype(jnp.float32)   # back to NCHW
    if flatten:
        out = out.reshape(B, -1)
    return out.reshape(lead + out.shape[1:])


# ------------------------------ pure-JAX check ------------------------------
def cnn2d_reference(x, params, flatten=True):
    lead = x.shape[:-3]
    C, H, W = x.shape[-3:]
    x = x.reshape((-1, C, H, W))
    for convs, pool in params:
        for w, b in convs:
            x = lax.conv_general_dilated(
                x, w, window_strides=(1, 1), padding=((1, 1), (1, 1)),
                dimension_numbers=("NCHW", "OIHW", "NCHW"))
            x = jnp.maximum(x + b[None, :, None, None], 0.0)
        if pool != 1:
            x = lax.reduce_window(x, -jnp.inf, lax.max,
                                  (1, 1, pool, pool), (1, 1, pool, pool), "VALID")
    if flatten:
        x = x.reshape(x.shape[0], -1)
    return x.reshape(lead + x.shape[1:])


if __name__ == "__main__":
    key = jax.random.PRNGKey(0)
    kx, kp = jax.random.split(key)

    in_channel, out_channel, hidden_channel = 4, 8, 8
    n_conv_per_block, n_block, pool = 2, 2, 2

    x = jax.random.normal(kx, (2, in_channel, 16, 16), jnp.float32)
    params = make_params(kp, in_channel, out_channel, hidden_channel,
                         n_conv_per_block, n_block, pool)

    out = jax.block_until_ready(cnn2d_forward(x, params, flatten=True))
    ref = cnn2d_reference(x, params, flatten=True)

    assert out.shape == ref.shape == (2, out_channel * 8 * 8), (out.shape, ref.shape)
    # bf16 activations/weights with f32 accumulation -> bf16-level tolerance.
    np.testing.assert_allclose(np.asarray(out), np.asarray(ref), rtol=5e-2, atol=5e-2)

    print("KERNEL_OK")
</pallas_src>

<mosaic_0001>
module attributes {stable_mosaic.version = 11 : i64} {
  func.func @_conv3x3_kernel(%arg0: i32, %arg1: memref<1x342x128xbf16, #tpu.memory_space<vmem>>, %arg2: memref<9x128x128xbf16, #tpu.memory_space<vmem>>, %arg3: memref<1x128xf32, #tpu.memory_space<vmem>>, %arg4: memref<1x336x128xbf16, #tpu.memory_space<vmem>>) attributes {dimension_semantics = [#tpu.dimension_semantics<parallel>], iteration_bounds = array<i64: 2>, scalar_prefetch = 0 : i64, scratch_operands = 0 : i64, tpu.core_type = #tpu.core_type<tc>, window_params = [{transform_indices = @transform_0, window_bounds = array<i64: 1, 342, 128>}, {pipeline_mode = #tpu.pipeline_mode<synchronous>, transform_indices = @transform_1, window_bounds = array<i64: 9, 128, 128>}, {pipeline_mode = #tpu.pipeline_mode<synchronous>, transform_indices = @transform_2, window_bounds = array<i64: 1, 128>}, {transform_indices = @transform_3, window_bounds = array<i64: 1, 336, 128>}]} {
    %c0 = arith.constant 0 : index
    %c0_0 = arith.constant 0 : index
    %0 = vector.load %arg3[%c0, %c0_0] : memref<1x128xf32, #tpu.memory_space<vmem>>, vector<1x128xf32>
    %1 = vector.shape_cast %0 : vector<1x128xf32> to vector<1x128xf32>
    %2 = vector.broadcast %1 : vector<1x128xf32> to vector<288x128xf32>
    %3 = tpu.iota {dimensions = array<i32: 0>} : vector<288x1xi32>
    %c18_i32 = arith.constant 18 : i32
    %c0_i32 = arith.constant 0 : i32
    %4 = arith.cmpi eq, %c18_i32, %c0_i32 : i32
    %c1_i32 = arith.constant 1 : i32
    %5 = arith.select %4, %c1_i32, %c18_i32 : i32
    %6 = vector.broadcast %5 : i32 to vector<288x1xi32>
    %7 = arith.remsi %3, %6 : vector<288x1xi32>
    %c0_i32_1 = arith.constant 0 : i32
    %8 = vector.broadcast %c0_i32_1 : i32 to vector<288x1xi32>
    %9 = arith.cmpi ne, %7, %8 : vector<288x1xi32>
    %c0_i32_2 = arith.constant 0 : i32
    %10 = vector.broadcast %c0_i32_2 : i32 to vector<288x1xi32>
    %11 = arith.cmpi slt, %7, %10 : vector<288x1xi32>
    %c0_i32_3 = arith.constant 0 : i32
    %12 = arith.cmpi slt, %5, %c0_i32_3 : i32
    %13 = vector.broadcast %12 : i1 to vector<288x1xi1>
    %14 = vector.broadcast %13 : vector<288x1xi1> to vector<288x1xi1>
    %15 = arith.xori %11, %14 : vector<288x1xi1>
    %16 = arith.andi %15, %9 : vector<288x1xi1>
    %17 = vector.broadcast %5 : i32 to vector<288x1xi32>
    %18 = arith.addi %7, %17 : vector<288x1xi32>
    %19 = arith.select %16, %18, %7 : vector<288x1xi1>, vector<288x1xi32>
    %c16_i32 = arith.constant 16 : i32
    %20 = vector.broadcast %c16_i32 : i32 to vector<288x1xi32>
    %21 = arith.cmpi slt, %19, %20 : vector<288x1xi32>
    %c0_4 = arith.constant 0 : index
    %c0_5 = arith.constant 0 : index
    %c0_6 = arith.constant 0 : index
    %22 = vector.load %arg1[%c0_4, %c0_5, %c0_6] : memref<1x342x128xbf16, #tpu.memory_space<vmem>>, vector<1x288x128xbf16>
    %23 = vector.shape_cast %22 : vector<1x288x128xbf16> to vector<288x128xbf16>
    %c0_7 = arith.constant 0 : index
    %c0_8 = arith.constant 0 : index
    %c0_9 = arith.constant 0 : index
    %24 = vector.load %arg2[%c0_7, %c0_8, %c0_9] : memref<9x128x128xbf16, #tpu.memory_space<vmem>>, vector<1x128x128xbf16>
    %25 = vector.shape_cast %24 : vector<1x128x128xbf16> to vector<128x128xbf16>
    %cst = arith.constant dense<0.000000e+00> : vector<288x128xf32>
    %26 = tpu.matmul %23, %25, %cst {dimension_numbers = #tpu.dot_dimension_numbers<[1], [0], [0], [1], [0, 0, 1, 1], [], []>} : vector<288x128xbf16>, vector<128x128xbf16>, vector<288x128xf32> -> vector<288x128xf32>
    %27 = arith.addf %2, %26 : vector<288x128xf32>
    %c0_10 = arith.constant 0 : index
    %c1 = arith.constant 1 : index
    %c0_11 = arith.constant 0 : index
    %28 = vector.load %arg1[%c0_10, %c1, %c0_11] : memref<1x342x128xbf16, #tpu.memory_space<vmem>>, vector<1x288x128xbf16>
    %29 = vector.shape_cast %28 : vector<1x288x128xbf16> to vector<288x128xbf16>
    %c1_12 = arith.constant 1 : index
    %c0_13 = arith.constant 0 : index
    %c0_14 = arith.constant 0 : index
    %30 = vector.load %arg2[%c1_12, %c0_13, %c0_14] : memref<9x128x128xbf16, #tpu.memory_space<vmem>>, vector<1x128x128xbf16>
    %31 = vector.shape_cast %30 : vector<1x128x128xbf16> to vector<128x128xbf16>
    %cst_15 = arith.constant dense<0.000000e+00> : vector<288x128xf32>
    %32 = tpu.matmul %29, %31, %cst_15 {dimension_numbers = #tpu.dot_dimension_numbers<[1], [0], [0], [1], [0, 0, 1, 1], [], []>} : vector<288x128xbf16>, vector<128x128xbf16>, vector<288x128xf32> -> vector<288x128xf32>
    %33 = arith.addf %27, %32 : vector<288x128xf32>
    %c0_16 = arith.constant 0 : index
    %c2 = arith.constant 2 : index
    %c0_17 = arith.constant 0 : index
    %34 = vector.load %arg1[%c0_16, %c2, %c0_17] : memref<1x342x128xbf16, #tpu.memory_space<vmem>>, vector<1x288x128xbf16>
    %35 = vector.shape_cast %34 : vector<1x288x128xbf16> to vector<288x128xbf16>
    %c2_18 = arith.constant 2 : index
    %c0_19 = arith.constant 0 : index
    %c0_20 = arith.constant 0 : index
    %36 = vector.load %arg2[%c2_18, %c0_19, %c0_20] : memref<9x128x128xbf16, #tpu.memory_space<vmem>>, vector<1x128x128xbf16>
    %37 = vector.shape_cast %36 : vector<1x128x128xbf16> to vector<128x128xbf16>
    %cst_21 = arith.constant dense<0.000000e+00> : vector<288x128xf32>
    %38 = tpu.matmul %35, %37, %cst_21 {dimension_numbers = #tpu.dot_dimension_numbers<[1], [0], [0], [1], [0, 0, 1, 1], [], []>} : vector<288x128xbf16>, vector<128x128xbf16>, vector<288x128xf32> -> vector<288x128xf32>
    %39 = arith.addf %33, %38 : vector<288x128xf32>
    %c0_22 = arith.constant 0 : index
    %c18 = arith.constant 18 : index
    %c0_23 = arith.constant 0 : index
    %40 = vector.load %arg1[%c0_22, %c18, %c0_23] : memref<1x342x128xbf16, #tpu.memory_space<vmem>>, vector<1x288x128xbf16>
    %41 = vector.shape_cast %40 : vector<1x288x128xbf16> to vector<288x128xbf16>
    %c3 = arith.constant 3 : index
    %c0_24 = arith.constant 0 : index
    %c0_25 = arith.constant 0 : index
    %42 = vector.load %arg2[%c3, %c0_24, %c0_25] : memref<9x128x128xbf16, #tpu.memory_space<vmem>>, vector<1x128x128xbf16>
    %43 = vector.shape_cast %42 : vector<1x128x128xbf16> to vector<128x128xbf16>
    %cst_26 = arith.constant dense<0.000000e+00> : vector<288x128xf32>
    %44 = tpu.matmul %41, %43, %cst_26 {dimension_numbers = #tpu.dot_dimension_numbers<[1], [0], [0], [1], [0, 0, 1, 1], [], []>} : vector<288x128xbf16>, vector<128x128xbf16>, vector<288x128xf32> -> vector<288x128xf32>
    %45 = arith.addf %39, %44 : vector<288x128xf32>
    %c0_27 = arith.constant 0 : index
    %c19 = arith.constant 19 : index
    %c0_28 = arith.constant 0 : index
    %46 = vector.load %arg1[%c0_27, %c19, %c0_28] : memref<1x342x128xbf16, #tpu.memory_space<vmem>>, vector<1x288x128xbf16>
    %47 = vector.shape_cast %46 : vector<1x288x128xbf16> to vector<288x128xbf16>
    %c4 = arith.constant 4 : index
    %c0_29 = arith.constant 0 : index
    %c0_30 = arith.constant 0 : index
    %48 = vector.load %arg2[%c4, %c0_29, %c0_30] : memref<9x128x128xbf16, #tpu.memory_space<vmem>>, vector<1x128x128xbf16>
    %49 = vector.shape_cast %48 : vector<1x128x128xbf16> to vector<128x128xbf16>
    %cst_31 = arith.constant dense<0.000000e+00> : vector<288x128xf32>
    %50 = tpu.matmul %47, %49, %cst_31 {dimension_numbers = #tpu.dot_dimension_numbers<[1], [0], [0], [1], [0, 0, 1, 1], [], []>} : vector<288x128xbf16>, vector<128x128xbf16>, vector<288x128xf32> -> vector<288x128xf32>
    %51 = arith.addf %45, %50 : vector<288x128xf32>
    %c0_32 = arith.constant 0 : index
    %c20 = arith.constant 20 : index
    %c0_33 = arith.constant 0 : index
    %52 = vector.load %arg1[%c0_32, %c20, %c0_33] : memref<1x342x128xbf16, #tpu.memory_space<vmem>>, vector<1x288x128xbf16>
    %53 = vector.shape_cast %52 : vector<1x288x128xbf16> to vector<288x128xbf16>
    %c5 = arith.constant 5 : index
    %c0_34 = arith.constant 0 : index
    %c0_35 = arith.constant 0 : index
    %54 = vector.load %arg2[%c5, %c0_34, %c0_35] : memref<9x128x128xbf16, #tpu.memory_space<vmem>>, vector<1x128x128xbf16>
    %55 = vector.shape_cast %54 : vector<1x128x128xbf16> to vector<128x128xbf16>
    %cst_36 = arith.constant dense<0.000000e+00> : vector<288x128xf32>
    %56 = tpu.matmul %53, %55, %cst_36 {dimension_numbers = #tpu.dot_dimension_numbers<[1], [0], [0], [1], [0, 0, 1, 1], [], []>} : vector<288x128xbf16>, vector<128x128xbf16>, vector<288x128xf32> -> vector<288x128xf32>
    %57 = arith.addf %51, %56 : vector<288x128xf32>
    %c0_37 = arith.constant 0 : index
    %c36 = arith.constant 36 : index
    %c0_38 = arith.constant 0 : index
    %58 = vector.load %arg1[%c0_37, %c36, %c0_38] : memref<1x342x128xbf16, #tpu.memory_space<vmem>>, vector<1x288x128xbf16>
    %59 = vector.shape_cast %58 : vector<1x288x128xbf16> to vector<288x128xbf16>
    %c6 = arith.constant 6 : index
    %c0_39 = arith.constant 0 : index
    %c0_40 = arith.constant 0 : index
    %60 = vector.load %arg2[%c6, %c0_39, %c0_40] : memref<9x128x128xbf16, #tpu.memory_space<vmem>>, vector<1x128x128xbf16>
    %61 = vector.shape_cast %60 : vector<1x128x128xbf16> to vector<128x128xbf16>
    %cst_41 = arith.constant dense<0.000000e+00> : vector<288x128xf32>
    %62 = tpu.matmul %59, %61, %cst_41 {dimension_numbers = #tpu.dot_dimension_numbers<[1], [0], [0], [1], [0, 0, 1, 1], [], []>} : vector<288x128xbf16>, vector<128x128xbf16>, vector<288x128xf32> -> vector<288x128xf32>
    %63 = arith.addf %57, %62 : vector<288x128xf32>
    %c0_42 = arith.constant 0 : index
    %c37 = arith.constant 37 : index
    %c0_43 = arith.constant 0 : index
    %64 = vector.load %arg1[%c0_42, %c37, %c0_43] : memref<1x342x128xbf16, #tpu.memory_space<vmem>>, vector<1x288x128xbf16>
    %65 = vector.shape_cast %64 : vector<1x288x128xbf16> to vector<288x128xbf16>
    %c7 = arith.constant 7 : index
    %c0_44 = arith.constant 0 : index
    %c0_45 = arith.constant 0 : index
    %66 = vector.load %arg2[%c7, %c0_44, %c0_45] : memref<9x128x128xbf16, #tpu.memory_space<vmem>>, vector<1x128x128xbf16>
    %67 = vector.shape_cast %66 : vector<1x128x128xbf16> to vector<128x128xbf16>
    %cst_46 = arith.constant dense<0.000000e+00> : vector<288x128xf32>
    %68 = tpu.matmul %65, %67, %cst_46 {dimension_numbers = #tpu.dot_dimension_numbers<[1], [0], [0], [1], [0, 0, 1, 1], [], []>} : vector<288x128xbf16>, vector<128x128xbf16>, vector<288x128xf32> -> vector<288x128xf32>
    %69 = arith.addf %63, %68 : vector<288x128xf32>
    %c0_47 = arith.constant 0 : index
    %c38 = arith.constant 38 : index
    %c0_48 = arith.constant 0 : index
    %70 = vector.load %arg1[%c0_47, %c38, %c0_48] : memref<1x342x128xbf16, #tpu.memory_space<vmem>>, vector<1x288x128xbf16>
    %71 = vector.shape_cast %70 : vector<1x288x128xbf16> to vector<288x128xbf16>
    %c8 = arith.constant 8 : index
    %c0_49 = arith.constant 0 : index
    %c0_50 = arith.constant 0 : index
    %72 = vector.load %arg2[%c8, %c0_49, %c0_50] : memref<9x128x128xbf16, #tpu.memory_space<vmem>>, vector<1x128x128xbf16>
    %73 = vector.shape_cast %72 : vector<1x128x128xbf16> to vector<128x128xbf16>
    %cst_51 = arith.constant dense<0.000000e+00> : vector<288x128xf32>
    %74 = tpu.matmul %71, %73, %cst_51 {dimension_numbers = #tpu.dot_dimension_numbers<[1], [0], [0], [1], [0, 0, 1, 1], [], []>} : vector<288x128xbf16>, vector<128x128xbf16>, vector<288x128xf32> -> vector<288x128xf32>
    %75 = arith.addf %69, %74 : vector<288x128xf32>
    %cst_52 = arith.constant 0.000000e+00 : f32
    %76 = vector.broadcast %cst_52 : f32 to vector<288x128xf32>
    %77 = arith.maximumf %75, %76 : vector<288x128xf32>
    %cst_53 = arith.constant 0.000000e+00 : f32
    %78 = vector.shape_cast %21 : vector<288x1xi1> to vector<288x1xi1>
    %79 = vector.broadcast %78 : vector<288x1xi1> to vector<288x128xi1>
    %80 = vector.broadcast %cst_53 : f32 to vector<288x128xf32>
    %81 = arith.select %79, %77, %80 : vector<288x128xi1>, vector<288x128xf32>
    %82 = arith.truncf %81 : vector<288x128xf32> to vector<288x128xbf16>
    %cst_54 = arith.constant 0.000000e+00 : bf16
    %83 = vector.broadcast %cst_54 : bf16 to vector<24x128xbf16>
    %c0_55 = arith.constant 0 : index
    %c0_56 = arith.constant 0 : index
    %c0_57 = arith.constant 0 : index
    %84 = vector.load %arg4[%c0_55, %c0_56, %c0_57] : memref<1x336x128xbf16, #tpu.memory_space<vmem>>, vector<1x24x128xbf16>
    %85 = vector.shape_cast %84 : vector<1x24x128xbf16> to vector<24x128xbf16>
    %86 = vector.shape_cast %83 : vector<24x128xbf16> to vector<1x24x128xbf16>
    tpu.vector_store %arg4[%c0_55, %c0_56, %c0_57], %86 {strides = array<i32>} : memref<1x336x128xbf16, #tpu.memory_space<vmem>>, vector<1x24x128xbf16>,
    %c0_58 = arith.constant 0 : index
    %c24 = arith.constant 24 : index
    %c0_59 = arith.constant 0 : index
    %87 = vector.load %arg4[%c0_58, %c24, %c0_59] : memref<1x336x128xbf16, #tpu.memory_space<vmem>>, vector<1x288x128xbf16>
    %88 = vector.shape_cast %87 : vector<1x288x128xbf16> to vector<288x128xbf16>
    %89 = vector.shape_cast %82 : vector<288x128xbf16> to vector<1x288x128xbf16>
    tpu.vector_store %arg4[%c0_58, %c24, %c0_59], %89 {strides = array<i32>} : memref<1x336x128xbf16, #tpu.memory_space<vmem>>, vector<1x288x128xbf16>,
    %cst_60 = arith.constant 0.000000e+00 : bf16
    %90 = vector.broadcast %cst_60 : bf16 to vector<24x128xbf16>
    %c0_61 = arith.constant 0 : index
    %c312 = arith.constant 312 : index
    %c0_62 = arith.constant 0 : index
    %91 = vector.load %arg4[%c0_61, %c312, %c0_62] : memref<1x336x128xbf16, #tpu.memory_space<vmem>>, vector<1x24x128xbf16>
    %92 = vector.shape_cast %91 : vector<1x24x128xbf16> to vector<24x128xbf16>
    %93 = vector.shape_cast %90 : vector<24x128xbf16> to vector<1x24x128xbf16>
    tpu.vector_store %arg4[%c0_61, %c312, %c0_62], %93 {strides = array<i32>} : memref<1x336x128xbf16, #tpu.memory_space<vmem>>, vector<1x24x128xbf16>,
    return
  }
  func.func @transform_0(%arg0: i32) -> (i32, i32, i32) {
    %c0_i32 = arith.constant 0 : i32
    %c0_i32_0 = arith.constant 0 : i32
    %c0_i32_1 = arith.constant 0 : i32
    return %arg0, %c0_i32, %c0_i32_0 : i32, i32, i32
  }
  func.func @transform_1(%arg0: i32) -> (i32, i32, i32) {
    %c0_i32 = arith.constant 0 : i32
    %c0_i32_0 = arith.constant 0 : i32
    %c0_i32_1 = arith.constant 0 : i32
    %c0_i32_2 = arith.constant 0 : i32
    return %c0_i32, %c0_i32_0, %c0_i32_1 : i32, i32, i32
  }
  func.func @transform_2(%arg0: i32) -> (i32, i32) {
    %c0_i32 = arith.constant 0 : i32
    %c0_i32_0 = arith.constant 0 : i32
    %c0_i32_1 = arith.constant 0 : i32
    return %c0_i32, %c0_i32_0 : i32, i32
  }
  func.func @transform_3(%arg0: i32) -> (i32, i32, i32) {
    %c0_i32 = arith.constant 0 : i32
    %c0_i32_0 = arith.constant 0 : i32
    %c0_i32_1 = arith.constant 0 : i32
    return %arg0, %c0_i32, %c0_i32_0 : i32, i32, i32
  }
}

</mosaic_0001>

<bundles_post_ra>
// kernel: tpu_custom_call.1
= control target key start
LH: loop header
LB: loop body
LE: loop exit
PB: predicated region body
PF: predicated region fallthrough
CT: control target
= control target key end

     0   :  { %8 = vsyncpa [#allocation3], 0  ;;  %s8259_s0 = inlined_call_operand.vmem [shape: bf16[2,342,128], index: 0, kind: input, shape index: {}]   ;;  %s8260_s1 = inlined_call_operand.vmem [shape: bf16[9,128,128], index: 1, kind: input, shape index: {}]   ;;  %s8261_s2 = inlined_call_operand.vmem [shape: f32[1,128], index: 2, kind: input, shape index: {}]   ;;  %s8262_s3 = inlined_call_operand.hbm [shape: bf16[2,336,128], index: 3, kind: output, shape index: {}]  }
   0x1   :  { %10 = vsyncpa [#allocation3 + $0x1], 0  ;;  %s6072_s12 = smov 0   ;;  %s6074_s13 = smov 0  }
   0x2   :  { %s6076_s14 = smov 0   ;;  %s6078_s15 = smov 0  }
   0x3 LB: > { %s6093_s16 = sadd.s32 4294967295, %s6047_s15   ;;  %s4947_s17 = sadd.s32 4294967294, %s6047_s15   ;;  %s6047_s15 = sphi %s6078_s15, %s8421_s15   ;;  %s6043_s14 = sphi %s6076_s14, %s8420_s14   ;;  %s6039_s13 = sphi %s6074_s13, %s8419_s13   ;;  %s6035_s12 = sphi %s6072_s12, %s8418_s12  }
   0x4   : > { %s6097_s18 = sadd.s32 1, %s6047_s15   ;;  %s91_s19 = sadd.s32 1, %s6043_s14 }
   0x5   : > { %s88_s20 = ssub.s32 %s6047_s15, %s6097_s18  ;;  %p101_p0 = scmp.ne.s32.totalorder %s6043_s14, %s6039_s13 }
   0x6   : > { %p89_p1 = scmp.eq.s32.totalorder %s88_s20, 0  ;;  %p102_p2 = scmp.eq.s32.totalorder %s6093_s16, 1 }
   0x7   : > { %p107_p3 = scmp.ne.s32.totalorder %s6039_s13, %s6035_s12  ;;  %p108_p4 = scmp.eq.s32.totalorder %s4947_s17, 1 }
   0x8   : > { %s6108_s21 = scalar_select %p89_p1, %s6043_s14, %s91_s19  }
   0x9   : > { %p6110_p5 = por %p102_p2, %p101_p0  ;;  %p6114_p6 = por %p108_p4, %p107_p3 }
   0xa   : > { %p4950_p7 = scmp.ge.s32.totalorder %s6047_s15, 1  ;;  %p140_p8 = scmp.lt.s32.totalorder %s6047_s15, 3 }
   0xc   : > { %p141_p9 = pnand %p4950_p7, %p140_p8 }
   0xe   : > { %144 = sbr.rel (%p141_p9) target bundleno = 871 (0x367), region = 32 }
  0x13   : > { %v5672_v0 = vld [vmem:[%s8260_s1 + $0x38] sm:$0xff]  ;;  %v5671_v1 = vld [vmem:[%s8260_s1 + $0x30] sm:$0xff]  ;;  %v5670_v2 = vld [vmem:[%s8260_s1 + $0x28] sm:$0xff]  ;;  %p164_p10 = scmp.lt.s32.totalorder %s6093_s16, 1  ;;  %vm2332_vm0 = vcmask 1046528   ;;  %vm3370_vm4 = vcmask 1045504  }
  0x14   : > { %5897 = vmatpush.bf16.msra.mxu1 %v5672_v0  ;;  %5898 = vmatpush.bf16.msra.mxu2 %v5672_v0  ;;  %v5669_v3 = vld [vmem:[%s8260_s1 + $0x20] sm:$0xff]  ;;  %v5668_v4 = vld [vmem:[%s8260_s1 + $0x18] sm:$0xff]  ;;  %v5667_v5 = vld [vmem:[%s8260_s1 + $0x10] sm:$0xff]  ;;  %vm1961_vm1 = vsmask.f32 7424  ;;  %vm4408_vm5 = vcmask 1044480  }
  0x15   : > { %1679 = vmatpush.bf16.msra.mxu0 %v5672_v0  ;;  %5899 = vmatpush.bf16.msra.mxu3 %v5672_v0  ;;  %s165_s9 = scalar_select %p164_p10, %s6093_s16, 1  ;;  %v5666_v6 = vld [vmem:[%s8260_s1 + $0x8] sm:$0xff]  ;;  %v5665_v7 = vld [vmem:[%s8260_s1] sm:$0xff]  ;;  %v5705_v8 = vld [vmem:[%s8260_s1 + $0xb8] sm:$0xff]  ;;  %vm2977_vm2 = vsmask.f32 6400 }
  0x16   : > { %v5697_v9 = vld [vmem:[%s8260_s1 + $0x78] sm:$0xff]  ;;  %v5704_v14 = vld [vmem:[%s8260_s1 + $0xb0] sm:$0xff]  ;;  %v5703_v19 = vld [vmem:[%s8260_s1 + $0xa8] sm:$0xff]  ;;  %vm4015_vm3 = vsmask.f32 5376  ;;  %s161_s19 = sand.u32 1, %s6039_s13  }
  0x17   : > { %s5922_s17 = smul.u32 172, %s165_s9  ;;  %v5738_v10 = vld [vmem:[%s8260_s1 + $0x138] sm:$0xff]  ;;  %v5696_v15 = vld [vmem:[%s8260_s1 + $0x70] sm:$0xff]  ;;  %v5695_v20 = vld [vmem:[%s8260_s1 + $0x68] sm:$0xff]  ;;  %s4870_s30 = scalar_lea.sflag [#allocation3], %s161_s19 }
  0x18   : > { %5900 = vmatpush.bf16.msra.mxu1 %v5671_v1  ;;  %5901 = vmatpush.bf16.msra.mxu2 %v5671_v1  ;;  %v5737_v16 = vld [vmem:[%s8260_s1 + $0x130] sm:$0xff]  ;;  %v5730_v18 = vld [vmem:[%s8260_s1 + $0xf8] sm:$0xff]  ;;  %v5736_v21 = vld [vmem:[%s8260_s1 + $0x128] sm:$0xff]  ;;  %s5921_s20 = smul.u32 168, %s161_s19  ;;  %s6005_s8 = scalar_lea.hbm %s8262_s3, 336 }
  0x19   : > { %1680 = vmatpush.bf16.msra.mxu0 %v5671_v1  ;;  %5902 = vmatpush.bf16.msra.mxu3 %v5671_v1  ;;  %s6149_s26 = scalar_lea.vmem %s8259_s0, %s5922_s17  ;;  %v5729_v22 = vld [vmem:[%s8260_s1 + $0xf0] sm:$0xff]  ;;  %v5702_v23 = vld [vmem:[%s8260_s1 + $0xa0] sm:$0xff]  ;;  %v5728_v26 = vld [vmem:[%s8260_s1 + $0xe8] sm:$0xff] }
  0x1a   : > { %v5652_v11 = vld [vmem:[%s6149_s26 + $0x28] sm:$0xff]  ;;  %v5657_v12 = vld [vmem:[%s6149_s26 + $0x50] sm:$0xff]  ;;  %v5647_v13 = vld [vmem:[%s6149_s26] sm:$0xff]  ;;  %s7029_s24 = scalar_lea.vmem [#allocation2], %s5921_s20 }
  0x1b   : > { %v5662_v17 = vld [vmem:[%s6149_s26 + $0x78] sm:$0xff]  ;;  %v5694_v24 = vld [vmem:[%s8260_s1 + $0x60] sm:$0xff]  ;;  %v5653_v29 = vld [vmem:[%s6149_s26 + $0x30] sm:$0xff] }
  0x1c   : > { %5903 = vmatpush.bf16.msra.mxu1 %v5670_v2  ;;  %5904 = vmatpush.bf16.msra.mxu2 %v5670_v2  ;;  %v5735_v25 = vld [vmem:[%s8260_s1 + $0x120] sm:$0xff]  ;;  %v5701_v27 = vld [vmem:[%s8260_s1 + $0x98] sm:$0xff]  ;;  %v5648_v31 = vld [vmem:[%s6149_s26 + $0x8] sm:$0xff] }
  0x1d   : > { %1681 = vmatpush.bf16.msra.mxu0 %v5670_v2  ;;  %5905 = vmatpush.bf16.msra.mxu3 %v5670_v2  ;;  %v5693_v28 = vld [vmem:[%s8260_s1 + $0x58] sm:$0xff]  ;;  %v5663_v32 = vld [vmem:[%s6149_s26 + $0x80] sm:$0xff]  ;;  %v5700_v33 = vld [vmem:[%s8260_s1 + $0x90] sm:$0xff] }
  0x1e   : > { %v5658_v30 = vld [vmem:[%s6149_s26 + $0x58] sm:$0xff]  ;;  %v5727_v35 = vld [vmem:[%s8260_s1 + $0xe0] sm:$0xff]  ;;  %v5692_v36 = vld [vmem:[%s8260_s1 + $0x50] sm:$0xff] }
  0x1f   : > { %v5734_v34 = vld [vmem:[%s8260_s1 + $0x118] sm:$0xff]  ;;  %v5699_v37 = vld [vmem:[%s8260_s1 + $0x88] sm:$0xff]  ;;  %v5733_v38 = vld [vmem:[%s8260_s1 + $0x110] sm:$0xff] }
  0x20   : > { %5906 = vmatpush.bf16.msra.mxu1 %v5669_v3  ;;  %5907 = vmatpush.bf16.msra.mxu2 %v5669_v3  ;;  %v5726_v39 = vld [vmem:[%s8260_s1 + $0xd8] sm:$0xff]  ;;  %v5725_v40 = vld [vmem:[%s8260_s1 + $0xd0] sm:$0xff]  ;;  %v5659_v42 = vld [vmem:[%s6149_s26 + $0x60] sm:$0xff] }
  0x21   : > { %1682 = vmatpush.bf16.msra.mxu0 %v5669_v3  ;;  %5908 = vmatpush.bf16.msra.mxu3 %v5669_v3  ;;  %v5654_v41 = vld [vmem:[%s6149_s26 + $0x38] sm:$0xff]  ;;  %v5649_v43 = vld [vmem:[%s6149_s26 + $0x10] sm:$0xff]  ;;  %v5664_v44 = vld [vmem:[%s6149_s26 + $0x88] sm:$0xff] }
  0x22   : > { %v5691_v45 = vld [vmem:[%s8260_s1 + $0x48] sm:$0xff]  ;;  %v5698_v47 = vld [vmem:[%s8260_s1 + $0x80] sm:$0xff]  ;;  %v5706_v56 = vld [vmem:[%s6149_s26 + $0x10] sm:$0xff] }
  0x23   : > { %v5724_v46 = vld [vmem:[%s8260_s1 + $0xc8] sm:$0xff]  ;;  %v5690_v49 = vld [vmem:[%s8260_s1 + $0x40] sm:$0xff]  ;;  %v5650_v60 = vld [vmem:[%s6149_s26 + $0x18] sm:$0xff]  ;;  %v2719_v62 = vrot.slane %v5706_v56, 1 }
  0x24   : > { %5909 = vmatpush.bf16.msra.mxu1 %v5668_v4  ;;  %5910 = vmatpush.bf16.msra.mxu2 %v5668_v4  ;;  %v5732_v48 = vld [vmem:[%s8260_s1 + $0x108] sm:$0xff]  ;;  %v5723_v51 = vld [vmem:[%s8260_s1 + $0xc0] sm:$0xff]  ;;  %v5771_v63 = vld [vmem:[%s8260_s1 + $0x1b8] sm:$0xff] }
  0x25   : > { %1683 = vmatpush.bf16.msra.mxu0 %v5668_v4  ;;  %5911 = vmatpush.bf16.msra.mxu3 %v5668_v4  ;;  %v2571_v50 = vld [vmem:[%s6149_s26 + $0x8] sm:$0xe]  ;;  %v6258_v52 = vld [vmem:[%s6149_s26 + $0xc] sm:$0xf]  ;;  %v5731_v53 = vld [vmem:[%s8260_s1 + $0x100] sm:$0xff] }
  0x26   : > { %v2662_v54 = vunpack.c.l.b16 %v2571_v50  ;;  %v8263_v55 = vunpack.c.l.b16 %v6258_v52  ;;  %v5655_v58 = vld [vmem:[%s6149_s26 + $0x40] sm:$0xff]  ;;  %v5660_v59 = vld [vmem:[%s6149_s26 + $0x68] sm:$0xff]  ;;  %v5779_v1 = vld [vmem:[%s8260_s1 + $0x1f8] sm:$0xff] }
  0x27   : > { %v5746_v2 = vld [vmem:[%s8260_s1 + $0x178] sm:$0xff] }
  0x28   : > { %5912 = vmatpush.bf16.msra.mxu1 %v5667_v5  ;;  %5913 = vmatpush.bf16.msra.mxu2 %v5667_v5  ;;  %v2699_v57 = vpack.c.b16 %v8263_v55, %v2662_v54  ;;  %v5787_v3 = vld [vmem:[%s8260_s1 + $0x238] sm:$0xff] }
  0x29   : > { %1684 = vmatpush.bf16.msra.mxu0 %v5667_v5  ;;  %5914 = vmatpush.bf16.msra.mxu3 %v5667_v5  ;;  %v5707_v4 = vld [vmem:[%s6149_s26 + $0x18] sm:$0xff]  ;;  %v5656_v5 = vld [vmem:[%s6149_s26 + $0x48] sm:$0xff] }
  0x2a   : > { %v2718_v61 = vrot.slane %v2699_v57, 1 }
  0x2c   : > { %5915 = vmatpush.bf16.msra.mxu1 %v5666_v6  ;;  %5916 = vmatpush.bf16.msra.mxu2 %v5666_v6  ;;  %v2720_v0 = vsel %vm2332_vm0, %v2718_v61, %v2719_v62  ;;  %v5675_v61 = vld [vmem:[%s6149_s26 + $0x18] sm:$0xff] }
  0x2d   : > { %1685 = vmatpush.bf16.msra.mxu0 %v5666_v6  ;;  %5917 = vmatpush.bf16.msra.mxu3 %v5666_v6  ;;  %v5661_v6 = vld [vmem:[%s6149_s26 + $0x70] sm:$0xff] }
  0x30   : > { %5918 = vmatpush.bf16.msra.mxu1 %v5665_v7  ;;  %5919 = vmatpush.bf16.msra.mxu2 %v5665_v7 }
  0x31   : > { %1686 = vmatpush.bf16.msra.mxu0 %v5665_v7  ;;  %5920 = vmatpush.bf16.msra.mxu3 %v5665_v7  ;;  %v5651_v7 = vld [vmem:[%s6149_s26 + $0x20] sm:$0xff] }
  0x33   : > { %1712 = vmatmul.bf16.vlgmr.msra.gmra.mxu1 %v5652_v11  ;;  %1737 = vmatmul.bf16.vlgmr.msra.gmra.mxu2 %v5657_v12  ;;  %v5877_v12 = vld [vmem:[%s6149_s26] sm:$0xf0] }
  0x34   : > { %2436 = vmatpush.bf16.msrb.mxu2 %v5705_v8  ;;  %2176 = vmatpush.bf16.msrb.mxu1 %v5697_v9  ;;  %v2721_v8 = vrot.slane %v5707_v4, 1  ;;  %v5789_v9 = vld [vmem:[%s6149_s26] sm:$0xff]  }
  0x35   : > { %3214 = vmatpush.bf16.msrb.mxu0 %v5738_v10  ;;  %1762 = vmatmul.bf16.vlgmr.msra.gmra.mxu3 %v5662_v17  ;;  %v5673_v10 = vld [vmem:[%s6149_s26 + $0x8] sm:$0xff]  ;;  %v1965_v11 = vshll.u32 %v5789_v9, 16  ;;  %v2987_v17 = vshrl.u32 %v5706_v56, 16 }
  0x36   : > { %1687 = vmatmul.bf16.vlgmr.msra.gmra.mxu0 %v5647_v13  ;;  %2821 = vmatpush.bf16.msrb.mxu3 %v5730_v18  ;;  %v2722_v13 = vsel %vm2332_vm0, %v2719_v62, %v2721_v8  ;;  %v2990_v18 = vshll.u32 %v5706_v56, 16 }
  0x38   : > { %2437 = vmatpush.bf16.msrb.mxu2 %v5704_v14  ;;  %2177 = vmatpush.bf16.msrb.mxu1 %v5696_v15  ;;  %v5878_v14 = vld [vmem:[%s6149_s26] sm:$0xe]  ;;  %v2979_v15 = vshrl.u32 %v2699_v57, 16 }
  0x39   : > { %3215 = vmatpush.bf16.msrb.mxu0 %v5737_v16  ;;  %v2982_v16 = vshll.u32 %v2699_v57, 16 }
  0x3a   : > { %2822 = vmatpush.bf16.msrb.mxu3 %v5729_v22  ;;  %v5879_v22 = vor.u32 %v5878_v14, %v5877_v12  ;;  %v5676_v14 = vld [vmem:[%s6149_s26 + $0x20] sm:$0xff] }
  0x3c   : > { %2438 = vmatpush.bf16.msrb.mxu2 %v5703_v19  ;;  %2178 = vmatpush.bf16.msrb.mxu1 %v5695_v20  ;;  %v1963_v19 = vshrl.u32 %v5789_v9, 16  ;;  %v1967_v20 = vrot.slane %v1965_v11, 1 }
  0x3d   : > { %3216 = vmatpush.bf16.msrb.mxu0 %v5736_v21  ;;  %v1970_v21 = vshll.u32 %v5673_v10, 16 }
  0x3e   : > { %2823 = vmatpush.bf16.msrb.mxu3 %v5728_v26  ;;  %v2992_v26 = vrot.slane %v2990_v18, 2  ;;  %v1990_v18 = vshrl.u32 %v5675_v61, 16 }
  0x40   : > { %2439 = vmatpush.bf16.msrb.mxu2 %v5702_v23  ;;  %2179 = vmatpush.bf16.msrb.mxu1 %v5694_v24  ;;  %v2981_v23 = vrot.slane %v2979_v15, 1  ;;  %v2984_v24 = vrot.slane %v2982_v16, 2 }
  0x41   : > { %3217 = vmatpush.bf16.msrb.mxu0 %v5735_v25  ;;  %v2989_v25 = vrot.slane %v2987_v17, 1 }
  0x42   : > { %2824 = vmatpush.bf16.msrb.mxu3 %v5727_v35 }
  0x43   : > { %1717 = vmatmul.bf16.gmra.mxu1 %v5653_v29  ;;  %1742 = vmatmul.bf16.gmra.mxu2 %v5658_v30  ;;  %v2333_v29 = vrot.slane %v5879_v22, 1  ;;  %v2334_v30 = vrot.slane %v5673_v10, 1  ;;  %v5769_v22 = vld [vmem:[%s8260_s1 + $0x1a8] sm:$0xff] }
  0x44   : > { %2440 = vmatpush.bf16.msrb.mxu2 %v5701_v27  ;;  %2180 = vmatpush.bf16.msrb.mxu1 %v5693_v28  ;;  %v1968_v27 = vor.u32 %v1967_v20, %v1963_v19  ;;  %v1972_v28 = vrot.slane %v1970_v21, 1  ;;  %v1994_v19 = vshll.u32 %v5676_v14, 16 }
  0x45   : > { %3218 = vmatpush.bf16.msrb.mxu0 %v5734_v34  ;;  %1767 = vmatmul.bf16.gmra.mxu3 %v5663_v32  ;;  %v2985_v32 = vor.u32 %v2984_v24, %v2981_v23  ;;  %v2335_v35 = vsel %vm2332_vm0, %v2333_v29, %v2334_v30  ;;  %v5777_v23 = vld [vmem:[%s8260_s1 + $0x1e8] sm:$0xff] }
  0x46   : > { %1692 = vmatmul.bf16.gmra.mxu0 %v5648_v31  ;;  %2825 = vmatpush.bf16.msrb.mxu3 %v5726_v39  ;;  %v5708_v31 = vld [vmem:[%s6149_s26 + $0x20] sm:$0xff]  ;;  %v1973_v34 = vsel %vm1961_vm1, %v1968_v27, %v1972_v28  ;;  %v5711_v27 = vld [vmem:[%s6149_s26 + $0x38] sm:$0xff]  ;;  %v5744_v29 = vld [vmem:[%s8260_s1 + $0x168] sm:$0xff] }
  0x48   : > { %2441 = vmatpush.bf16.msrb.mxu2 %v5700_v33  ;;  %2181 = vmatpush.bf16.msrb.mxu1 %v5692_v36  ;;  %v2993_v33 = vor.u32 %v2992_v26, %v2989_v25  ;;  %v2723_v36 = vrot.slane %v5708_v31, 1  ;;  %v1996_v25 = vrot.slane %v1994_v19, 1  ;;  %v2340_v26 = vrot.slane %v5676_v14, 1 }
  0x49   : > { %3219 = vmatpush.bf16.msrb.mxu0 %v5733_v38  ;;  %v5674_v38 = vld [vmem:[%s6149_s26 + $0x10] sm:$0xff] }
  0x4a   : > { %2826 = vmatpush.bf16.msrb.mxu3 %v5725_v40  ;;  %v2724_v39 = vsel %vm2332_vm0, %v2721_v8, %v2723_v36  ;;  %v5770_v40 = vld [vmem:[%s8260_s1 + $0x1b0] sm:$0xff] }
  0x4b   : > { %v5710_v8 = vld [vmem:[%s6149_s26 + $0x30] sm:$0xff] }
  0x4c   : > { %2442 = vmatpush.bf16.msrb.mxu2 %v5699_v37  ;;  %2182 = vmatpush.bf16.msrb.mxu1 %v5691_v45  ;;  %v2994_v37 = vsel %vm2977_vm2, %v2985_v32, %v2993_v33  ;;  %v1974_v45 = vshrl.u32 %v5673_v10, 16  ;;  %v2727_v12 = vrot.slane %v5710_v8, 1 }
  0x4d   : > { %3220 = vmatpush.bf16.msrb.mxu0 %v5732_v48 }
  0x4e   : > { %2827 = vmatpush.bf16.msrb.mxu3 %v5724_v46  ;;  %v1978_v46 = vshll.u32 %v5674_v38, 16 }
  0x50   : > { %2443 = vmatpush.bf16.msrb.mxu2 %v5698_v47  ;;  %2183 = vmatpush.bf16.msrb.mxu1 %v5690_v49  ;;  %v1976_v49 = vor.u32 %v1974_v45, %v1972_v28  ;;  %v1980_v50 = vrot.slane %v1978_v46, 1 }
  0x51   : > { %3221 = vmatpush.bf16.msrb.mxu0 %v5731_v53  ;;  %v5709_v53 = vld [vmem:[%s6149_s26 + $0x28] sm:$0xff] }
  0x52   : > { %2828 = vmatpush.bf16.msrb.mxu3 %v5723_v51  ;;  %v2336_v51 = vrot.slane %v5674_v38, 1  ;;  %v1981_v56 = vsel %vm1961_vm1, %v1976_v49, %v1980_v50  ;;  %v3014_v16 = vshrl.u32 %v5709_v53, 16  ;;  %v3017_v17 = vshll.u32 %v5709_v53, 16 }
  0x53   : > { %1722 = vmatmul.bf16.gmra.mxu1 %v5654_v41  ;;  %1747 = vmatmul.bf16.gmra.mxu2 %v5659_v42  ;;  %v5778_v41 = vld [vmem:[%s8260_s1 + $0x1f0] sm:$0xff] }
  0x54   : > { %3859 = vmatpush.bf16.msra.mxu2 %v5771_v63  ;;  %3474 = vmatpush.bf16.msra.mxu1 %v5746_v2  ;;  %v5745_v42 = vld [vmem:[%s8260_s1 + $0x170] sm:$0xff]  ;;  %v2337_v57 = vsel %vm2332_vm0, %v2334_v30, %v2336_v51  ;;  %v3005_v63 = vshrl.u32 %v5708_v31, 16  ;;  %v1986_v2 = vshll.u32 %v5675_v61, 16  ;;  %v3016_v20 = vrot.slane %v3014_v16, 1 }
  0x55   : > { %1772 = vmatmul.bf16.gmra.mxu3 %v5664_v44  ;;  %4512 = vmatpush.bf16.msra.mxu0 %v5787_v3  ;;  %v2999_v44 = vshll.u32 %v5707_v4, 16  ;;  %v3019_v21 = vrot.slane %v3017_v17, 2 }
  0x56   : > { %1697 = vmatmul.bf16.gmra.mxu0 %v5649_v43  ;;  %4252 = vmatpush.bf16.msra.mxu3 %v5779_v1  ;;  %v2996_v43 = vshrl.u32 %v5707_v4, 16  ;;  %v1982_v1 = vshrl.u32 %v5674_v38, 16  ;;  %v3007_v3 = vrot.slane %v3005_v63, 1  ;;  %v5785_v38 = vld [vmem:[%s8260_s1 + $0x228] sm:$0xff] }
  0x57   : > { %v3001_v48 = vrot.slane %v2999_v44, 2  ;;  %v3020_v28 = vor.u32 %v3019_v21, %v3016_v20 }
  0x58   : > { %3860 = vmatpush.bf16.msra.mxu2 %v5770_v40  ;;  %3475 = vmatpush.bf16.msra.mxu1 %v5745_v42  ;;  %v2998_v47 = vrot.slane %v2996_v43, 1  ;;  %v3026_v40 = vshll.u32 %v5710_v8, 16  ;;  %v1998_v43 = vshrl.u32 %v5676_v14, 16 }
  0x5a   : > { %4253 = vmatpush.bf16.msra.mxu3 %v5778_v41  ;;  %v3002_v54 = vor.u32 %v3001_v48, %v2998_v47  ;;  %v3028_v47 = vrot.slane %v3026_v40, 2  ;;  %v2000_v49 = vor.u32 %v1998_v43, %v1996_v25  ;;  %v5784_v43 = vld [vmem:[%s8260_s1 + $0x220] sm:$0xff] }
  0x5c   : > { %3861 = vmatpush.bf16.msra.mxu2 %v5769_v22  ;;  %3476 = vmatpush.bf16.msra.mxu1 %v5744_v29 }
  0x5e   : > { %4254 = vmatpush.bf16.msra.mxu3 %v5777_v23 }
  0x63   : > { %1727 = vmatmul.bf16.gmra.mxu1 %v5655_v58  ;;  %1752 = vmatmul.bf16.gmra.mxu2 %v5660_v59  ;;  %v2725_v58 = vrot.slane %v5709_v53, 1  ;;  %v3003_v59 = vsel %vm2977_vm2, %v2993_v33, %v3002_v54  ;;  %v2729_v33 = vrot.slane %v5711_v27, 1  ;;  %v5712_v53 = vld [vmem:[%s6149_s26 + $0x40] sm:$0xff] }
  0x65   : > { %2829 = vmatmul.bf16.vlgmr.msrb.gmra.mxu3 %v2720_v0  ;;  %v2726_v62 = vsel %vm2332_vm0, %v2723_v36, %v2725_v58  ;;  %v3008_v0 = vshll.u32 %v5708_v31, 16  ;;  %v2728_v15 = vsel %vm2332_vm0, %v2725_v58, %v2727_v12  ;;  %v5677_v36 = vld [vmem:[%s6149_s26 + $0x28] sm:$0xff] }
  0x66   : > { %1702 = vmatmul.bf16.gmra.mxu0 %v5650_v60  ;;  %v5786_v60 = vld [vmem:[%s8260_s1 + $0x230] sm:$0xff]  ;;  %v2002_v44 = vshll.u32 %v5677_v36, 16 }
  0x67   : > { %4513 = vmatpush.bf16.msra.mxu0 %v5786_v60  ;;  %v3010_v4 = vrot.slane %v3008_v0, 2  ;;  %v2731_v60 = vrot.slane %v5712_v53, 1  ;;  %v5678_v0 = vld [vmem:[%s6149_s26 + $0x30] sm:$0xff] }
  0x68   : > { %v2344_v14 = vrot.slane %v5678_v0, 1 }
  0x69   : > { %v3011_v9 = vor.u32 %v3010_v4, %v3007_v3  ;;  %v3035_v3 = vshll.u32 %v5711_v27, 16 }
  0x6b   : > { %4514 = vmatpush.bf16.msra.mxu0 %v5785_v38 }
  0x6f   : > { %4515 = vmatpush.bf16.msra.mxu0 %v5784_v43  ;;  %v6449_v43 = vld [vmem:[%s6149_s26 + $0x48] sm:$0xff] }
  0x73   : > { %1732 = vmatmul.bf16.gmra.mxu1 %v5656_v5  ;;  %1757 = vmatmul.bf16.gmra.mxu2 %v5661_v6  ;;  %v1984_v5 = vor.u32 %v1982_v1, %v1980_v50  ;;  %v1988_v6 = vrot.slane %v1986_v2, 1  ;;  %v2004_v50 = vrot.slane %v2002_v44, 1  ;;  %v2732_v1 = vsel %vm2332_vm0, %v2729_v33, %v2731_v60 }
  0x74   : > { %v3032_v2 = vshrl.u32 %v5711_v27, 16  ;;  %v5743_v27 = vld [vmem:[%s8260_s1 + $0x160] sm:$0xff] }
  0x75   : > { %2834 = vmatmul.bf16.gmra.mxu3 %v2722_v13  ;;  %v1989_v10 = vsel %vm1961_vm1, %v1984_v5, %v1988_v6  ;;  %v3012_v13 = vsel %vm2977_vm2, %v3002_v54, %v3011_v9  ;;  %v1992_v24 = vor.u32 %v1990_v18, %v1988_v6  ;;  %v2005_v58 = vsel %vm1961_vm1, %v2000_v49, %v2004_v50  ;;  %v5768_v18 = vld [vmem:[%s8260_s1 + $0x1a0] sm:$0xff] }
  0x76   : > { %1707 = vmatmul.bf16.gmra.mxu0 %v5651_v7  ;;  %v2338_v7 = vrot.slane %v5675_v61, 1  ;;  %v2006_v6 = vshrl.u32 %v5677_v36, 16  ;;  %3862 = vmatpush.bf16.msra.mxu2 %v5768_v18 }
  0x77   : > { %v1997_v31 = vsel %vm1961_vm1, %v1992_v24, %v1996_v25  ;;  %v5776_v25 = vld [vmem:[%s8260_s1 + $0x1e0] sm:$0xff]  ;;  %3477 = vmatpush.bf16.msra.mxu1 %v5743_v27 }
  0x78   : > { %v2339_v11 = vsel %vm2332_vm0, %v2336_v51, %v2338_v7  ;;  %v2341_v32 = vsel %vm2332_vm0, %v2338_v7, %v2340_v26  ;;  %v2342_v51 = vrot.slane %v5677_v36, 1  ;;  %v2010_v7 = vshll.u32 %v5678_v0, 16  ;;  %4255 = vmatpush.bf16.msra.mxu3 %v5776_v25 }
  0x79   : > { %v2014_v36 = vshrl.u32 %v5678_v0, 16 }
  0x7a   : > { %v2345_v21 = vsel %vm2332_vm0, %v2342_v51, %v2344_v14 }
  0x83   : > { %2184 = vmatmul.bf16.vlgmr.msrb.gmra.mxu1 %v1973_v34  ;;  %2444 = vmatmul.bf16.vlgmr.msrb.gmra.mxu2 %v2335_v35  ;;  %v3021_v35 = vsel %vm2977_vm2, %v3011_v9, %v3020_v28  ;;  %v3034_v9 = vrot.slane %v3032_v2, 1  ;;  %v5680_v2 = vld [vmem:[%s6149_s26 + $0x40] sm:$0xff] }
  0x84   : > { %v2348_v25 = vrot.slane %v5680_v2, 1 }
  0x85   : > { %2839 = vmatmul.bf16.gmra.mxu3 %v2724_v39  ;;  %v3023_v39 = vshrl.u32 %v5710_v8, 16 }
  0x86   : > { %3222 = vmatmul.bf16.vlgmr.msrb.gmra.mxu0 %v2994_v37  ;;  %v2730_v37 = vsel %vm2332_vm0, %v2727_v12, %v2729_v33  ;;  %v2008_v12 = vor.u32 %v2006_v6, %v2004_v50  ;;  %v5714_v50 = vld [vmem:[%s6149_s26 + $0x50] sm:$0xff] }
  0x87   : > { %v3025_v46 = vrot.slane %v3023_v39, 1 }
  0x89   : > { %v3029_v54 = vor.u32 %v3028_v47, %v3025_v46 }
  0x93   : > { %2189 = vmatmul.bf16.gmra.mxu1 %v1981_v56  ;;  %2449 = vmatmul.bf16.gmra.mxu2 %v2337_v57 }
  0x95   : > { %2844 = vmatmul.bf16.gmra.mxu3 %v2726_v62  ;;  %v3030_v62 = vsel %vm2977_vm2, %v3020_v28, %v3029_v54  ;;  %v5679_v28 = vld [vmem:[%s6149_s26 + $0x38] sm:$0xff] }
  0x96   : > { %3227 = vmatmul.bf16.gmra.mxu0 %v3003_v59  ;;  %v2343_v59 = vsel %vm2332_vm0, %v2340_v26, %v2342_v51  ;;  %v2346_v49 = vrot.slane %v5679_v28, 1 }
  0xa3   : > { %2194 = vmatmul.bf16.gmra.mxu1 %v1989_v10  ;;  %2454 = vmatmul.bf16.gmra.mxu2 %v2339_v11  ;;  %v3037_v10 = vrot.slane %v3035_v3, 2 }
  0xa5   : > { %2849 = vmatmul.bf16.gmra.mxu3 %v2728_v15  ;;  %v5713_v15 = vld [vmem:[%s6149_s26 + $0x48] sm:$0xff]  ;;  %v3038_v16 = vor.u32 %v3037_v10, %v3034_v9 }
  0xa6   : > { %3232 = vmatmul.bf16.gmra.mxu0 %v3012_v13  ;;  %v2012_v13 = vrot.slane %v2010_v7, 1  ;;  %v2733_v22 = vrot.slane %v5713_v15, 1  ;;  %v3050_v6 = vshrl.u32 %v5713_v15, 16  ;;  %v3053_v7 = vshll.u32 %v5713_v15, 16 }
  0xa7   : > { %v3039_v24 = vsel %vm2977_vm2, %v3029_v54, %v3038_v16 }
  0xa8   : > { %v2013_v20 = vsel %vm1961_vm1, %v2008_v12, %v2012_v13  ;;  %v2734_v29 = vsel %vm2332_vm0, %v2731_v60, %v2733_v22  ;;  %v2016_v46 = vor.u32 %v2014_v36, %v2012_v13  ;;  %v2735_v60 = vrot.slane %v5714_v50, 1 }
  0xa9   : > { %v2022_v12 = vshrl.u32 %v5679_v28, 16  ;;  %v2026_v13 = vshll.u32 %v5680_v2, 16  ;;  %v3055_v18 = vrot.slane %v3053_v7, 2 }
  0xaa   : > { %v2736_v3 = vsel %vm2332_vm0, %v2733_v22, %v2735_v60  ;;  %v6431_v22 = vld [vmem:[%s6149_s26 + $0x58] sm:$0xff] }
  0xb0   : > { %v6332_v30 = vpop.f32.mrf.mxu1 }
  0xb3   : > { %v6336_v34 = vpop.f32.mrf.mxu0  ;;  %2199 = vmatmul.bf16.gmra.mxu1 %v1997_v31  ;;  %2459 = vmatmul.bf16.gmra.mxu2 %v2341_v32  ;;  %v3041_v31 = vshrl.u32 %v5712_v53, 16  ;;  %v3044_v32 = vshll.u32 %v5712_v53, 16 }
  0xb5   : > { %2854 = vmatmul.bf16.gmra.mxu3 %v2730_v37  ;;  %v2018_v37 = vshll.u32 %v5679_v28, 16  ;;  %v3043_v39 = vrot.slane %v3041_v31, 1  ;;  %v3046_v40 = vrot.slane %v3044_v32, 2  ;;  %v2349_v31 = vsel %vm2332_vm0, %v2346_v49, %v2348_v25 }
  0xb6   : > { %3237 = vmatmul.bf16.gmra.mxu0 %v3021_v35  ;;  %v6344_v41 = vpop.f32.mrf.mxu2  ;;  %v2737_v32 = vrot.slane %v6431_v22, 1 }
  0xb7   : > { %v2020_v47 = vrot.slane %v2018_v37, 1  ;;  %v3047_v51 = vor.u32 %v3046_v40, %v3043_v39  ;;  %v5767_v40 = vld [vmem:[%s8260_s1 + $0x198] sm:$0xff] }
  0xb8   : > { %v6346_v42 = vpop.f32.mrf.mxu1  ;;  %v6350_v48 = vpop.f32.mrf.mxu3  ;;  %3863 = vmatpush.bf16.msra.mxu2 %v5767_v40 }
  0xb9   : > { %v3048_v0 = vsel %vm2977_vm2, %v3038_v16, %v3047_v51  ;;  %v3052_v16 = vrot.slane %v3050_v6, 1 }
  0xbb   : > { %v6348_v45 = vpop.f32.mrf.mxu0  ;;  %v3056_v15 = vor.u32 %v3055_v18, %v3052_v16  ;;  %v2350_v18 = vrot.slane %v6449_v43, 1 }
  0xbd   : > { %v3057_v37 = vsel %vm2977_vm2, %v3047_v51, %v3056_v15 }
  0xbe   : > { %v6353_v56 = vpop.f32.mrf.mxu2 }
  0xc0   : > { %v6355_v57 = vpop.f32.mrf.mxu1  ;;  %v6362_v63 = vpop.f32.mrf.mxu3 }
  0xc3   : > { %v6359_v61 = vpop.f32.mrf.mxu0  ;;  %2204 = vmatmul.bf16.gmra.mxu1 %v2005_v58  ;;  %2464 = vmatmul.bf16.gmra.mxu2 %v2343_v59  ;;  %v2021_v58 = vsel %vm1961_vm1, %v2016_v46, %v2020_v47  ;;  %v2347_v59 = vsel %vm2332_vm0, %v2344_v14, %v2346_v49  ;;  %v2738_v46 = vsel %vm2332_vm0, %v2735_v60, %v2737_v32  ;;  %v3059_v49 = vshrl.u32 %v5714_v50, 16 }
  0xc5   : > { %2859 = vmatmul.bf16.gmra.mxu3 %v2732_v1  ;;  %v3061_v60 = vrot.slane %v3059_v49, 1 }
  0xc6   : > { %3242 = vmatmul.bf16.gmra.mxu0 %v3030_v62  ;;  %v6366_v4 = vpop.f32.mrf.mxu2 }
  0xc8   : > { %v6368_v5 = vpop.f32.mrf.mxu1  ;;  %v6372_v11 = vpop.f32.mrf.mxu3 }
  0xcb   : > { %v6370_v8 = vpop.f32.mrf.mxu0 }
  0xce   : > { %v6375_v17 = vpop.f32.mrf.mxu2 }
  0xd0   : > { %v6380_v19 = vpop.f32.mrf.mxu1  ;;  %v6390_v26 = vpop.f32.mrf.mxu3 }
  0xd1   : > { %8277 = vst [vmem:[#allocation5_spill] sm:$0xff] %v6390_v26 }
  0xd3   : > { %v6384_v23 = vpop.f32.mrf.mxu0  ;;  %2209 = vmatmul.bf16.gmra.mxu1 %v2013_v20  ;;  %2469 = vmatmul.bf16.gmra.mxu2 %v2345_v21  ;;  %v2024_v21 = vor.u32 %v2022_v12, %v2020_v47  ;;  %v5775_v47 = vld [vmem:[%s8260_s1 + $0x1d8] sm:$0xff] }
  0xd4   : > { %4256 = vmatpush.bf16.msra.mxu3 %v5775_v47  ;;  %v5742_v12 = vld [vmem:[%s8260_s1 + $0x158] sm:$0xff]  ;;  %v2351_v47 = vsel %vm2332_vm0, %v2348_v25, %v2350_v18 }
  0xd5   : > { %2864 = vmatmul.bf16.gmra.mxu3 %v2734_v29  ;;  %3478 = vmatpush.bf16.msra.mxu1 %v5742_v12 }
  0xd6   : > { %3247 = vmatmul.bf16.gmra.mxu0 %v3039_v24  ;;  %v6397_v33 = vpop.f32.mrf.mxu2  ;;  %v2028_v24 = vrot.slane %v2026_v13, 1 }
  0xd8   : > { %v6399_v35 = vpop.f32.mrf.mxu1  ;;  %v6406_v44 = vpop.f32.mrf.mxu3  ;;  %v2029_v28 = vsel %vm1961_vm1, %v2024_v21, %v2028_v24  ;;  %v6472_v21 = vld [vmem:[%s6149_s26 + $0x60] sm:$0xff] }
  0xd9   : > { %8278 = vst [vmem:[#allocation6_spill] sm:$0xff] %v6406_v44  ;;  %v2739_v49 = vrot.slane %v6472_v21, 1 }
  0xdb   : > { %v6401_v38 = vpop.f32.mrf.mxu0 }
  0xde   : > { %v6409_v53 = vpop.f32.mrf.mxu2 }
  0xe0   : > { %v6411_v54 = vpop.f32.mrf.mxu1  ;;  %v6418_v1 = vpop.f32.mrf.mxu3 }
  0xe1   : > { %8279 = vst [vmem:[#allocation7_spill] sm:$0xff] %v6418_v1 }
  0xe3   : > { %v6415_v62 = vpop.f32.mrf.mxu0  ;;  %2214 = vmatmul.bf16.gmra.mxu1 %v2021_v58  ;;  %2474 = vmatmul.bf16.gmra.mxu2 %v2347_v59  ;;  %v3062_v58 = vshll.u32 %v5714_v50, 16  ;;  %v5783_v50 = vld [vmem:[%s8260_s1 + $0x218] sm:$0xff] }
  0xe4   : > { %4516 = vmatpush.bf16.msra.mxu0 %v5783_v50  ;;  %v3071_v50 = vshll.u32 %v6431_v22, 16 }
  0xe5   : > { %2869 = vmatmul.bf16.gmra.mxu3 %v2736_v3  ;;  %v2034_v3 = vshll.u32 %v6449_v43, 16  ;;  %v3064_v7 = vrot.slane %v3062_v58, 2 }
  0xe6   : > { %3252 = vmatmul.bf16.gmra.mxu0 %v3048_v0  ;;  %v6422_v9 = vpop.f32.mrf.mxu2  ;;  %v2030_v0 = vshrl.u32 %v5680_v2, 16  ;;  %v3073_v1 = vrot.slane %v3071_v50, 2 }
  0xe7   : > { %v2036_v2 = vrot.slane %v2034_v3, 1 }
  0xe8   : > { %v6424_v10 = vpop.f32.mrf.mxu1  ;;  %v6428_v20 = vpop.f32.mrf.mxu3  ;;  %v2032_v16 = vor.u32 %v2030_v0, %v2028_v24 }
  0xea   : > { %v2037_v24 = vsel %vm1961_vm1, %v2032_v16, %v2036_v2 }
  0xeb   : > { %v6426_v14 = vpop.f32.mrf.mxu0 }
  0xee   : > { %v6433_v27 = vpop.f32.mrf.mxu2 }
  0xf0   : > { %v6435_v29 = vpop.f32.mrf.mxu1  ;;  %v6443_v39 = vpop.f32.mrf.mxu3 }
  0xf3   : > { %v6440_v36 = vpop.f32.mrf.mxu0  ;;  %2219 = vmatmul.bf16.gmra.mxu1 %v2029_v28  ;;  %2479 = vmatmul.bf16.gmra.mxu2 %v2349_v31  ;;  %v6477_v28 = vld [vmem:[%s8261_s2] ss:$0 sm:$0xff]  ;;  %v3065_v31 = vor.u32 %v3064_v7, %v3061_v60  ;;  %v6490_v60 = vld [vmem:[%s6149_s26 + $0x50] sm:$0xff]  ;;  %v3068_v7 = vshrl.u32 %v6431_v22, 16 }
  0xf4   : > { %v1778_v40 = vadd.f32 %v6477_v28, %v6336_v34  ;;  %v2740_v34 = vsel %vm2332_vm0, %v2737_v32, %v2739_v49  ;;  %v1779_v16 = vadd.f32 %v6477_v28, %v6348_v45 }
  0xf5   : > { %2874 = vmatmul.bf16.gmra.mxu3 %v2738_v46  ;;  %v3066_v3 = vsel %vm2977_vm2, %v3056_v15, %v3065_v31  ;;  %v3070_v55 = vrot.slane %v3068_v7, 1 }
  0xf6   : > { %3257 = vmatmul.bf16.gmra.mxu0 %v3057_v37  ;;  %v6455_v51 = vpop.f32.mrf.mxu2 }
  0xf8   : > { %v6457_v59 = vpop.f32.mrf.mxu1  ;;  %v6468_v13 = vpop.f32.mrf.mxu3 }
  0xfb   : > { %v6460_v6 = vpop.f32.mrf.mxu0 }
  0xfe   : > { %v6479_v37 = vpop.f32.mrf.mxu2 }
 0x100   : > { %v2185_v46 = vpop.f32.mrf.mxu1  ;;  %v6487_v12 = vpop.f32.mrf.mxu3 }
 0x101   : > { %v2275_v58 = vadd.f32 %v2185_v46, %v1778_v40  ;;  %v2038_v46 = vshrl.u32 %v6449_v43, 16 }
 0x103   : > { %v3223_v0 = vpop.f32.mrf.mxu0  ;;  %2224 = vmatmul.bf16.gmra.mxu1 %v2037_v24  ;;  %2484 = vmatmul.bf16.gmra.mxu2 %v2351_v47  ;;  %v2042_v24 = vshll.u32 %v6490_v60, 16  ;;  %v2040_v26 = vor.u32 %v2038_v46, %v2036_v2 }
 0x105   : > { %2879 = vmatmul.bf16.gmra.mxu3 %v2740_v34  ;;  %v2044_v45 = vrot.slane %v2042_v24, 1  ;;  %v6506_v34 = vld [vmem:[%s6149_s26 + $0x68] sm:$0xff] }
 0x106   : > { %3262 = vmatmul.bf16.gmra.mxu0 %v3066_v3  ;;  %v2445_v25 = vpop.f32.mrf.mxu2 }
 0x107   : > { %v2535_v40 = vadd.f32 %v2445_v25, %v2275_v58  ;;  %v2352_v58 = vrot.slane %v6490_v60, 1  ;;  %v3074_v25 = vor.u32 %v3073_v1, %v3070_v55  ;;  %v2045_v7 = vsel %vm1961_vm1, %v2040_v26, %v2044_v45 }
 0x108   : > { %v2187_v15 = vpop.f32.mrf.mxu1  ;;  %v6500_v44 = vpop.f32.mrf.mxu3 }
 0x109   : > { %v2920_v47 = vadd.f32 %v6428_v20, %v2535_v40  ;;  %v2276_v3 = vadd.f32 %v2187_v15, %v1779_v16  ;;  %v1780_v20 = vadd.f32 %v6477_v28, %v6359_v61  ;;  %v2353_v50 = vsel %vm2332_vm0, %v2350_v18, %v2352_v58  ;;  %v6520_v61 = vld [vmem:[%s6149_s26 + $0x58] sm:$0xff] }
 0x10a   : > { %v3075_v24 = vsel %vm2977_vm2, %v3065_v31, %v3074_v25  ;;  %v3077_v18 = vshrl.u32 %v6472_v21, 16 }
 0x10b   : > { %v3225_v32 = vpop.f32.mrf.mxu0  ;;  %v6502_v22 = vadd.f32 %v3223_v0, %v2920_v47  ;;  %v2741_v0 = vrot.slane %v6506_v34, 1  ;;  %v3080_v47 = vshll.u32 %v6472_v21, 16  ;;  %v5766_v21 = vld [vmem:[%s8260_s1 + $0x190] sm:$0xff] }
 0x10c   : > { %3864 = vmatpush.bf16.msra.mxu2 %v5766_v21 }
 0x10d   : > { %v2742_v26 = vsel %vm2332_vm0, %v2739_v49, %v2741_v0 }
 0x10e   : > { %v2447_v43 = vpop.f32.mrf.mxu2 }
 0x10f   : > { %v2536_v16 = vadd.f32 %v2447_v43, %v2276_v3  ;;  %v1781_v3 = vadd.f32 %v6477_v28, %v6370_v8  ;;  %v5774_v8 = vld [vmem:[%s8260_s1 + $0x1d0] sm:$0xff] }
 0x110   : > { %v2190_v40 = vpop.f32.mrf.mxu1  ;;  %v6515_v55 = vpop.f32.mrf.mxu3  ;;  %4257 = vmatpush.bf16.msra.mxu3 %v5774_v8 }
 0x111   : > { %v2921_v2 = vadd.f32 %v6443_v39, %v2536_v16  ;;  %v2277_v15 = vadd.f32 %v2190_v40, %v1780_v20  ;;  %v2046_v20 = vshrl.u32 %v6490_v60, 16  ;;  %v5741_v60 = vld [vmem:[%s8260_s1 + $0x150] sm:$0xff] }
 0x112   : > { %3479 = vmatpush.bf16.msra.mxu1 %v5741_v60  ;;  %v3089_v60 = vshll.u32 %v6506_v34, 16 }
 0x113   : > { %v3228_v46 = vpop.f32.mrf.mxu0  ;;  %2229 = vmatmul.bf16.gmra.mxu1 %v2045_v7  ;;  %2489 = vmatmul.bf16.gmra.mxu2 %v2353_v50  ;;  %v6517_v1 = vadd.f32 %v3225_v32, %v2921_v2  ;;  %v2050_v32 = vshll.u32 %v6520_v61, 16  ;;  %v3079_v7 = vrot.slane %v3077_v18, 1  ;;  %v3082_v50 = vrot.slane %v3080_v47, 2  ;;  %v6545_v18 = vld [vmem:[%s6149_s26 + $0x70] sm:$0xff] }
 0x115   : > { %2884 = vmatmul.bf16.gmra.mxu3 %v2742_v26  ;;  %v2354_v26 = vrot.slane %v6520_v61, 1  ;;  %v3083_v47 = vor.u32 %v3082_v50, %v3079_v7  ;;  %v5782_v7 = vld [vmem:[%s8260_s1 + $0x210] sm:$0xff] }
 0x116   : > { %3267 = vmatmul.bf16.gmra.mxu0 %v3075_v24  ;;  %v2450_v39 = vpop.f32.mrf.mxu2  ;;  %v2052_v24 = vrot.slane %v2050_v32, 1 }
 0x117   : > { %v2537_v31 = vadd.f32 %v2450_v39, %v2277_v15  ;;  %v2048_v15 = vor.u32 %v2046_v20, %v2044_v45  ;;  %v2743_v45 = vrot.slane %v6545_v18, 1  ;;  %v3084_v8 = vsel %vm2977_vm2, %v3074_v25, %v3083_v47  ;;  %4517 = vmatpush.bf16.msra.mxu0 %v5782_v7 }
 0x118   : > { %v2192_v43 = vpop.f32.mrf.mxu1  ;;  %v6539_v2 = vpop.f32.mrf.mxu3 }
 0x119   : > { %v2922_v16 = vadd.f32 %v6468_v13, %v2537_v31  ;;  %v2278_v40 = vadd.f32 %v2192_v43, %v1781_v3  ;;  %v1782_v3 = vadd.f32 %v6477_v28, %v6384_v23  ;;  %v2053_v21 = vsel %vm1961_vm1, %v2048_v15, %v2052_v24 }
 0x11a   : > { %v2744_v50 = vsel %vm2332_vm0, %v2741_v0, %v2743_v45  ;;  %v1783_v15 = vadd.f32 %v6477_v28, %v6401_v38 }
 0x11b   : > { %v3230_v49 = vpop.f32.mrf.mxu0  ;;  %v6541_v13 = vadd.f32 %v3228_v46, %v2922_v16  ;;  %v2355_v46 = vsel %vm2332_vm0, %v2352_v58, %v2354_v26  ;;  %v6562_v58 = vld [vmem:[%s6149_s26 + $0x60] sm:$0xff] }
 0x11e   : > { %v2452_v39 = vpop.f32.mrf.mxu2 }
 0x11f   : > { %v2538_v31 = vadd.f32 %v2452_v39, %v2278_v40 }
 0x120   : > { %v2195_v43 = vpop.f32.mrf.mxu1  ;;  %v6557_v23 = vpop.f32.mrf.mxu3 }
 0x121   : > { %v2923_v20 = vadd.f32 %v6487_v12, %v2538_v31  ;;  %v2279_v32 = vadd.f32 %v2195_v43, %v1782_v3  ;;  %v3086_v12 = vshrl.u32 %v6506_v34, 16  ;;  %v2058_v31 = vshll.u32 %v6562_v58, 16 }
 0x123   : > { %v3233_v16 = vpop.f32.mrf.mxu0  ;;  %2234 = vmatmul.bf16.gmra.mxu1 %v2053_v21  ;;  %2494 = vmatmul.bf16.gmra.mxu2 %v2355_v46  ;;  %v6559_v40 = vadd.f32 %v3230_v49, %v2923_v20  ;;  %v2054_v49 = vshrl.u32 %v6520_v61, 16  ;;  %v3088_v46 = vrot.slane %v3086_v12, 1  ;;  %v3091_v20 = vrot.slane %v3089_v60, 2 }
 0x124   : > { %v2060_v38 = vrot.slane %v2058_v31, 1 }
 0x125   : > { %2889 = vmatmul.bf16.gmra.mxu3 %v2744_v50  ;;  %v2056_v7 = vor.u32 %v2054_v49, %v2052_v24  ;;  %v6578_v50 = vld [vmem:[%s6149_s26 + $0x78] sm:$0xff] }
 0x126   : > { %3272 = vmatmul.bf16.gmra.mxu0 %v3084_v8  ;;  %v2455_v25 = vpop.f32.mrf.mxu2 }
 0x127   : > { %v2539_v39 = vadd.f32 %v2455_v25, %v2279_v32  ;;  %v2356_v32 = vrot.slane %v6562_v58, 1  ;;  %v3092_v25 = vor.u32 %v3091_v20, %v3088_v46  ;;  %v2061_v12 = vsel %vm1961_vm1, %v2056_v7, %v2060_v38 }
 0x128   : > { %v2197_v3 = vpop.f32.mrf.mxu1  ;;  %v6572_v34 = vpop.f32.mrf.mxu3  ;;  %v3098_v20 = vshll.u32 %v6545_v18, 16  ;;  %v1785_v7 = vadd.f32 %v6477_v28, %v6426_v14  ;;  %v5773_v14 = vld [vmem:[%s8260_s1 + $0x1c8] sm:$0xff] }
 0x129   : > { %v2924_v43 = vadd.f32 %v6500_v44, %v2539_v39  ;;  %v2280_v0 = vadd.f32 %v2197_v3, %v1783_v15  ;;  %v1784_v44 = vadd.f32 %v6477_v28, %v6415_v62  ;;  %v2357_v60 = vsel %vm2332_vm0, %v2354_v26, %v2356_v32  ;;  %v6592_v62 = vld [vmem:[%s6149_s26 + $0x68] sm:$0xff]  ;;  %4258 = vmatpush.bf16.msra.mxu3 %v5773_v14 }
 0x12a   : > { %v3093_v31 = vsel %vm2977_vm2, %v3083_v47, %v3092_v25  ;;  %v3095_v26 = vshrl.u32 %v6545_v18, 16  ;;  %v5765_v18 = vld [vmem:[%s8260_s1 + $0x188] sm:$0xff]  ;;  %v3107_v14 = vshll.u32 %v6578_v50, 16 }
 0x12b   : > { %v3235_v21 = vpop.f32.mrf.mxu0  ;;  %v6574_v8 = vadd.f32 %v3233_v16, %v2924_v43  ;;  %v2745_v16 = vrot.slane %v6578_v50, 1  ;;  %3865 = vmatpush.bf16.msra.mxu2 %v5765_v18 }
 0x12e   : > { %v2457_v61 = vpop.f32.mrf.mxu2 }
 0x12f   : > { %v2540_v15 = vadd.f32 %v2457_v61, %v2280_v0  ;;  %v2746_v0 = vsel %vm2332_vm0, %v2743_v45, %v2745_v16 }
 0x130   : > { %v2200_v39 = vpop.f32.mrf.mxu1  ;;  %v6587_v43 = vpop.f32.mrf.mxu3 }
 0x131   : > { %v2925_v24 = vadd.f32 %v6515_v55, %v2540_v15  ;;  %v2281_v3 = vadd.f32 %v2200_v39, %v1784_v44  ;;  %v2062_v44 = vshrl.u32 %v6562_v58, 16 }
 0x133   : > { %v3238_v49 = vpop.f32.mrf.mxu0  ;;  %2239 = vmatmul.bf16.gmra.mxu1 %v2061_v12  ;;  %2499 = vmatmul.bf16.gmra.mxu2 %v2357_v60  ;;  %v6589_v46 = vadd.f32 %v3235_v21, %v2925_v24  ;;  %v2066_v21 = vshll.u32 %v6592_v62, 16  ;;  %v3097_v12 = vrot.slane %v3095_v26, 1  ;;  %v3100_v60 = vrot.slane %v3098_v20, 2 }
 0x135   : > { %2894 = vmatmul.bf16.gmra.mxu3 %v2746_v0  ;;  %v6614_v0 = vld [vmem:[%s6149_s26 + $0x80] sm:$0xff]  ;;  %v3101_v26 = vor.u32 %v3100_v60, %v3097_v12  ;;  %v5740_v12 = vld [vmem:[%s8260_s1 + $0x148] sm:$0xff] }
 0x136   : > { %3277 = vmatmul.bf16.gmra.mxu0 %v3093_v31  ;;  %v2460_v55 = vpop.f32.mrf.mxu2  ;;  %v2358_v31 = vrot.slane %v6592_v62, 1  ;;  %3480 = vmatpush.bf16.msra.mxu1 %v5740_v12 }
 0x137   : > { %v2541_v47 = vadd.f32 %v2460_v55, %v2281_v3  ;;  %v2064_v3 = vor.u32 %v2062_v44, %v2060_v38  ;;  %v1786_v55 = vadd.f32 %v6477_v28, %v6440_v36 }
 0x138   : > { %v2202_v61 = vpop.f32.mrf.mxu1  ;;  %v6608_v24 = vpop.f32.mrf.mxu3  ;;  %v2359_v18 = vsel %vm2332_vm0, %v2356_v32, %v2358_v31  ;;  %v6631_v32 = vld [vmem:[%s6149_s26 + $0x70] sm:$0xff] }
 0x139   : > { %v2926_v15 = vadd.f32 %v6539_v2, %v2541_v47  ;;  %v2282_v39 = vadd.f32 %v2202_v61, %v1785_v7  ;;  %v2068_v2 = vrot.slane %v2066_v21, 1 }
 0x13b   : > { %v3240_v45 = vpop.f32.mrf.mxu0  ;;  %v6610_v58 = vadd.f32 %v3238_v49, %v2926_v15  ;;  %v2069_v61 = vsel %vm1961_vm1, %v2064_v3, %v2068_v2  ;;  %v2747_v49 = vrot.slane %v6614_v0, 1  ;;  %v3102_v15 = vsel %vm2977_vm2, %v3092_v25, %v3101_v26 }
 0x13c   : > { %v3104_v25 = vshrl.u32 %v6578_v50, 16 }
 0x13d   : > { %8280 = vst [vmem:[#allocation8_spill] sm:$0xff] %v6610_v58  ;;  %v2748_v60 = vsel %vm2332_vm0, %v2745_v16, %v2747_v49  ;;  %v2070_v16 = vshrl.u32 %v6592_v62, 16 }
 0x13e   : > { %v2462_v20 = vpop.f32.mrf.mxu2 }
 0x13f   : > { %v2542_v7 = vadd.f32 %v2462_v20, %v2282_v39 }
 0x140   : > { %v2205_v47 = vpop.f32.mrf.mxu1  ;;  %v6626_v36 = vpop.f32.mrf.mxu3 }
 0x141   : > { %v2927_v38 = vadd.f32 %v6557_v23, %v2542_v7  ;;  %v2283_v44 = vadd.f32 %v2205_v47, %v1786_v55  ;;  %v5781_v23 = vld [vmem:[%s8260_s1 + $0x208] sm:$0xff]  ;;  %v2074_v7 = vshll.u32 %v6631_v32, 16 }
 0x142   : > { %4518 = vmatpush.bf16.msra.mxu0 %v5781_v23  ;;  %v2072_v23 = vor.u32 %v2070_v16, %v2068_v2 }
 0x143   : > { %v3243_v21 = vpop.f32.mrf.mxu0  ;;  %2244 = vmatmul.bf16.gmra.mxu1 %v2069_v61  ;;  %2504 = vmatmul.bf16.gmra.mxu2 %v2359_v18  ;;  %v6628_v39 = vadd.f32 %v3240_v45, %v2927_v38  ;;  %v1787_v45 = vadd.f32 %v6477_v28, %v6460_v6  ;;  %v3106_v38 = vrot.slane %v3104_v25, 1  ;;  %v2076_v6 = vrot.slane %v2074_v7, 1 }
 0x145   : > { %8281 = vst [vmem:[#allocation9_spill] sm:$0xff] %v6628_v39  ;;  %2899 = vmatmul.bf16.gmra.mxu3 %v2748_v60  ;;  %v6650_v60 = vld [vmem:[%s6149_s26 + $0x88] sm:$0xff]  ;;  %v2077_v25 = vsel %vm1961_vm1, %v2072_v23, %v2076_v6  ;;  %v1789_v23 = vadd.f32 %v6477_v28, %v6346_v42  ;;  %v1850_v39 = vld [vmem:[%s6149_s26 + $0x90] sm:$0x1] }
 0x146   : > { %3282 = vmatmul.bf16.gmra.mxu0 %v3102_v15  ;;  %v2465_v3 = vpop.f32.mrf.mxu2  ;;  %v3109_v15 = vrot.slane %v3107_v14, 2 }
 0x147   : > { %v2543_v20 = vadd.f32 %v2465_v3, %v2283_v44  ;;  %v2360_v44 = vrot.slane %v6631_v32, 1 }
 0x148   : > { %v2207_v55 = vpop.f32.mrf.mxu1  ;;  %v6644_v50 = vpop.f32.mrf.mxu3  ;;  %v3110_v3 = vor.u32 %v3109_v15, %v3106_v38  ;;  %v3116_v15 = vshll.u32 %v6614_v0, 16 }
 0x149   : > { %v2928_v47 = vadd.f32 %v6572_v34, %v2543_v20  ;;  %v2284_v61 = vadd.f32 %v2207_v55, %v1787_v45  ;;  %v1788_v34 = vadd.f32 %v6477_v28, %v6332_v30  ;;  %v2361_v14 = vsel %vm2332_vm0, %v2358_v31, %v2360_v44  ;;  %v6664_v30 = vld [vmem:[%s6149_s26 + $0x78] sm:$0xff] }
 0x14a   : > { %v3111_v7 = vsel %vm2977_vm2, %v3101_v26, %v3110_v3  ;;  %v3113_v31 = vshrl.u32 %v6614_v0, 16 }
 0x14b   : > { %v3245_v18 = vpop.f32.mrf.mxu0  ;;  %v6646_v12 = vadd.f32 %v3243_v21, %v2928_v47  ;;  %v2749_v21 = vrot.slane %v6650_v60, 1 }
 0x14d   : > { %8282 = vst [vmem:[#allocation10_spill] sm:$0xff] %v6646_v12 }
 0x14e   : > { %v2467_v62 = vpop.f32.mrf.mxu2 }
 0x14f   : > { %v2544_v45 = vadd.f32 %v2467_v62, %v2284_v61  ;;  %v2750_v61 = vsel %vm2332_vm0, %v2747_v49, %v2749_v21 }
 0x150   : > { %v2210_v20 = vpop.f32.mrf.mxu1  ;;  %v6659_v47 = vpop.f32.mrf.mxu3 }
 0x151   : > { %v2929_v2 = vadd.f32 %v6587_v43, %v2544_v45  ;;  %v2285_v55 = vadd.f32 %v2210_v20, %v1788_v34  ;;  %v2082_v34 = vshll.u32 %v6664_v30, 16 }
 0x153   : > { %v3248_v16 = vpop.f32.mrf.mxu0  ;;  %2249 = vmatmul.bf16.gmra.mxu1 %v2077_v25  ;;  %2509 = vmatmul.bf16.gmra.mxu2 %v2361_v14  ;;  %v6661_v38 = vadd.f32 %v3245_v18, %v2929_v2  ;;  %v2078_v18 = vshrl.u32 %v6631_v32, 16  ;;  %v3115_v25 = vrot.slane %v3113_v31, 1  ;;  %v3118_v14 = vrot.slane %v3116_v15, 2 }
 0x154   : > { %v2084_v42 = vrot.slane %v2082_v34, 1  ;;  %v5772_v34 = vld [vmem:[%s8260_s1 + $0x1c0] sm:$0xff] }
 0x155   : > { %8283 = vst [vmem:[#allocation11_spill] sm:$0xff] %v6661_v38  ;;  %2904 = vmatmul.bf16.gmra.mxu3 %v2750_v61  ;;  %v6680_v61 = vld [vmem:[%s6149_s26 + $0x90] sm:$0xff]  ;;  %v1790_v38 = vadd.f32 %v6477_v28, %v6355_v57  ;;  %v5764_v57 = vld [vmem:[%s8260_s1 + $0x180] sm:$0xff] }
 0x156   : > { %3287 = vmatmul.bf16.gmra.mxu0 %v3111_v7  ;;  %v2470_v43 = vpop.f32.mrf.mxu2  ;;  %v2080_v7 = vor.u32 %v2078_v18, %v2076_v6  ;;  %3866 = vmatpush.bf16.msra.mxu2 %v5764_v57 }
 0x157   : > { %v2545_v26 = vadd.f32 %v2470_v43, %v2285_v55  ;;  %v2362_v55 = vrot.slane %v6664_v30, 1  ;;  %v3119_v43 = vor.u32 %v3118_v14, %v3115_v25  ;;  %v3125_v25 = vshll.u32 %v6650_v60, 16  ;;  %4259 = vmatpush.bf16.msra.mxu3 %v5772_v34  ;;  %v2607_v14 = vld [vmem:[%s6149_s26 + $0x98] sm:$0x1]  ;;  %v5780_v34 = vld [vmem:[%s8260_s1 + $0x200] sm:$0xff] }
 0x158   : > { %v2212_v62 = vpop.f32.mrf.mxu1  ;;  %v6674_v2 = vpop.f32.mrf.mxu3  ;;  %v2085_v31 = vsel %vm1961_vm1, %v2080_v7, %v2084_v42  ;;  %4519 = vmatpush.bf16.msra.mxu0 %v5780_v34  ;;  %v3134_v34 = vshll.u32 %v6680_v61, 16 }
 0x159   : > { %v2930_v45 = vadd.f32 %v6608_v24, %v2545_v26  ;;  %v2286_v20 = vadd.f32 %v2212_v62, %v1789_v23  ;;  %v2363_v15 = vsel %vm2332_vm0, %v2360_v44, %v2362_v55  ;;  %v3120_v18 = vsel %vm2977_vm2, %v3110_v3, %v3119_v43  ;;  %v6703_v3 = vld [vmem:[%s6149_s26 + $0x80] sm:$0xff] }
 0x15a   : > { %v3127_v57 = vrot.slane %v3125_v25, 2  ;;  %v1792_v25 = vadd.f32 %v6477_v28, %v6380_v19  ;;  %v6737_v19 = vld [vmem:[%s6149_s26 + $0x14] sm:$0xf] }
 0x15b   : > { %v3250_v49 = vpop.f32.mrf.mxu0  ;;  %v6676_v0 = vadd.f32 %v3248_v16, %v2930_v45  ;;  %v2751_v16 = vrot.slane %v6680_v61, 1 }
 0x15d   : > { %8284 = vst [vmem:[#allocation12_spill] sm:$0xff] %v6676_v0 }
 0x15e   : > { %v2472_v32 = vpop.f32.mrf.mxu2 }
 0x15f   : > { %v2546_v24 = vadd.f32 %v2472_v32, %v2286_v20  ;;  %v3122_v20 = vshrl.u32 %v6650_v60, 16 }
 0x160   : > { %v2215_v23 = vpop.f32.mrf.mxu1  ;;  %v6695_v45 = vpop.f32.mrf.mxu3 }
 0x161   : > { %v2931_v6 = vadd.f32 %v6626_v36, %v2546_v24  ;;  %v2287_v26 = vadd.f32 %v2215_v23, %v1790_v38  ;;  %v5739_v36 = vld [vmem:[%s8260_s1 + $0x140] sm:$0xff]  ;;  %v2752_v38 = vsel %vm2332_vm0, %v2749_v21, %v2751_v16  ;;  %v2086_v23 = vshrl.u32 %v6664_v30, 16 }
 0x162   : > { %3481 = vmatpush.bf16.msra.mxu1 %v5739_v36  ;;  %v2698_v21 = vunpack.c.l.b16 %v2607_v14  ;;  %v3124_v60 = vrot.slane %v3122_v20, 1 }
 0x163   : > { %v3253_v62 = vpop.f32.mrf.mxu0  ;;  %2254 = vmatmul.bf16.gmra.mxu1 %v2085_v31  ;;  %2514 = vmatmul.bf16.gmra.mxu2 %v2363_v15  ;;  %v6700_v44 = vadd.f32 %v3250_v49, %v2931_v6  ;;  %v1791_v49 = vadd.f32 %v6477_v28, %v6368_v5  ;;  %v2090_v31 = vshll.u32 %v6703_v3, 16 }
 0x164   : > { %v6724_v14 = vor.u32 %v3127_v57, %v3124_v60  ;;  %v8264_v57 = vunpack.c.l.b16 %v6737_v19 }
 0x165   : > { %8285 = vst [vmem:[#allocation13_spill] sm:$0xff] %v6700_v44  ;;  %2909 = vmatmul.bf16.gmra.mxu3 %v2752_v38  ;;  %v2092_v30 = vrot.slane %v2090_v31, 1  ;;  %v8265_v38 = vrot.slane %v6703_v3, 1 }
 0x166   : > { %3292 = vmatmul.bf16.gmra.mxu0 %v3120_v18  ;;  %v2475_v7 = vpop.f32.mrf.mxu2 }
 0x167   : > { %v2547_v32 = vadd.f32 %v2475_v7, %v2287_v26  ;;  %v2088_v26 = vor.u32 %v2086_v23, %v2084_v42  ;;  %v2365_v42 = vsel %vm2332_vm0, %v2362_v55, %v8265_v38  ;;  %v6743_v55 = vld [vmem:[%s6149_s26 + $0x88] sm:$0xff] }
 0x168   : > { %v2217_v24 = vpop.f32.mrf.mxu1  ;;  %v6719_v36 = vpop.f32.mrf.mxu3 }
 0x169   : > { %v2932_v15 = vadd.f32 %v6644_v50, %v2547_v32  ;;  %v2288_v6 = vadd.f32 %v2217_v24, %v1791_v49  ;;  %v2717_v50 = vpack.c.b16 %v2698_v21, %v2698_v21  ;;  %v2093_v32 = vsel %vm1961_vm1, %v2088_v26, %v2092_v30 }
 0x16a   : > { %v3129_v21 = vsel %vm2977_vm2, %v3119_v43, %v6724_v14 }
 0x16b   : > { %v3255_v18 = vpop.f32.mrf.mxu0  ;;  %v6721_v5 = vadd.f32 %v3253_v62, %v2932_v15  ;;  %v2753_v62 = vrot.slane %v2717_v50, 1  ;;  %v3609_v15 = vld [vmem:[%s6149_s26 + $0x10] sm:$0xc]  ;;  %v6753_v50 = vld [vmem:[%s6149_s26 + $0x18] sm:$0xff] }
 0x16c   : > { %v3700_v60 = vunpack.c.l.b16 %v3609_v15 }
 0x16d   : > { %8286 = vst [vmem:[#allocation14_spill] sm:$0xff] %v6721_v5  ;;  %v2754_v43 = vsel %vm2332_vm0, %v2751_v16, %v2753_v62 }
 0x16e   : > { %v2477_v20 = vpop.f32.mrf.mxu2 }
 0x16f   : > { %v2548_v7 = vadd.f32 %v2477_v20, %v2288_v6  ;;  %v6757_v20 = vpack.c.b16 %v8264_v57, %v3700_v60 }
 0x170   : > { %v2220_v49 = vpop.f32.mrf.mxu1  ;;  %v6739_v6 = vpop.f32.mrf.mxu3 }
 0x171   : > { %v2933_v24 = vadd.f32 %v6659_v47, %v2548_v7  ;;  %v2289_v23 = vadd.f32 %v2220_v49, %v1792_v25  ;;  %v3131_v47 = vshrl.u32 %v6680_v61, 16  ;;  %v1793_v25 = vadd.f32 %v6477_v28, %v6399_v35 }
 0x172   : > { %v2094_v49 = vshrl.u32 %v6703_v3, 16  ;;  %v3136_v61 = vrot.slane %v3134_v34, 2  ;;  %v4017_v62 = vshrl.u32 %v6757_v20, 16  ;;  %v4028_v35 = vshll.u32 %v6753_v50, 16 }
 0x173   : > { %v3258_v31 = vpop.f32.mrf.mxu0  ;;  %2259 = vmatmul.bf16.gmra.mxu1 %v2093_v32  ;;  %2519 = vmatmul.bf16.gmra.mxu2 %v2365_v42  ;;  %v6747_v26 = vadd.f32 %v3255_v18, %v2933_v24  ;;  %v2098_v32 = vshll.u32 %v6743_v55, 16  ;;  %v3133_v42 = vrot.slane %v3131_v47, 1  ;;  %v4020_v24 = vshll.u32 %v6757_v20, 16  ;;  %v2956_v47 = vld [vmem:[%s6149_s26 + $0x98] sm:$0x3] }
 0x174   : > { %v4019_v5 = vrot.slane %v4017_v62, 2  ;;  %v4030_v12 = vrot.slane %v4028_v35, 3  ;;  %v2975_v58 = vunpack.c.l.b16 %v2956_v47 }
 0x175   : > { %8287 = vst [vmem:[#allocation15_spill] sm:$0xff] %v6747_v26  ;;  %2914 = vmatmul.bf16.gmra.mxu3 %v2754_v43  ;;  %v2100_v34 = vrot.slane %v2098_v32, 1  ;;  %v2366_v43 = vrot.slane %v6743_v55, 1  ;;  %v6772_v38 = vor.u32 %v3136_v61, %v3133_v42  ;;  %v4022_v44 = vrot.slane %v4020_v24, 3 }
 0x176   : > { %3297 = vmatmul.bf16.gmra.mxu0 %v3129_v21  ;;  %v2480_v7 = vpop.f32.mrf.mxu2  ;;  %v4025_v21 = vshrl.u32 %v6753_v50, 16  ;;  %v1941_v61 = vunpack.c.l.b16 %v1850_v39  ;;  %v6787_v35 = vpack.c.b16 %v2975_v58, %v2975_v58  ;;  %v6795_v39 = vld [vmem:[%s6149_s26 + $0x20] sm:$0xff]  ;;  %v1795_v58 = vadd.f32 %v6477_v28, %v6424_v10 }
 0x177   : > { %v2549_v18 = vadd.f32 %v2480_v7, %v2289_v23  ;;  %v2096_v23 = vor.u32 %v2094_v49, %v2092_v30  ;;  %v1794_v30 = vadd.f32 %v6477_v28, %v6411_v54  ;;  %v4034_v47 = vshrl.u32 %v6795_v39, 16 }
 0x178   : > { %v2222_v16 = vpop.f32.mrf.mxu1  ;;  %v6768_v7 = vpop.f32.mrf.mxu3  ;;  %v4027_v0 = vrot.slane %v4025_v21, 2 }
 0x179   : > { %v2934_v15 = vadd.f32 %v6674_v2, %v2549_v18  ;;  %v2290_v60 = vadd.f32 %v2222_v16, %v1793_v25  ;;  %v2101_v49 = vsel %vm1961_vm1, %v2096_v23, %v2100_v34  ;;  %v8288_v18 = vrot.slane %v6703_v3, 1 }
 0x17a   : > { %v4023_v16 = vor.u32 %v4022_v44, %v4019_v5  ;;  %v4031_v62 = vor.u32 %v4030_v12, %v4027_v0  ;;  %v3140_v12 = vshrl.u32 %v6787_v35, 16  ;;  %v3143_v0 = vshll.u32 %v6787_v35, 16 }
 0x17b   : > { %v3260_v57 = vpop.f32.mrf.mxu0  ;;  %v6774_v26 = vadd.f32 %v3258_v31, %v2934_v15  ;;  %v2367_v32 = vsel %vm2332_vm0, %v8288_v18, %v2366_v43  ;;  %v3138_v31 = vsel %vm2977_vm2, %v6724_v14, %v6772_v38  ;;  %v2102_v5 = vshrl.u32 %v6743_v55, 16 }
 0x17c   : > { %v4032_v14 = vsel %vm4015_vm3, %v4023_v16, %v4031_v62  ;;  %v3142_v18 = vrot.slane %v3140_v12, 1  ;;  %v4036_v16 = vrot.slane %v4034_v47, 2 }
 0x17d   : > { %v2104_v10 = vor.u32 %v2102_v5, %v2100_v34  ;;  %v3349_v34 = vld [vmem:[%s6149_s26 + $0x8] sm:$0xc] }
 0x17e   : > { %v2482_v2 = vpop.f32.mrf.mxu2 }
 0x17f   : > { %v2550_v25 = vadd.f32 %v2482_v2, %v2290_v60  ;;  %v1960_v60 = vpack.c.b16 %v1941_v61, %v1941_v61  ;;  %v4037_v2 = vshll.u32 %v6795_v39, 16 }
 0x180   : > { %v2225_v42 = vpop.f32.mrf.mxu1  ;;  %v6789_v15 = vpop.f32.mrf.mxu3 }
 0x181   : > { %v2935_v24 = vadd.f32 %v6695_v45, %v2550_v25  ;;  %v2291_v21 = vadd.f32 %v2225_v42, %v1794_v30  ;;  %v2106_v23 = vshll.u32 %v1960_v60, 16  ;;  %v2368_v61 = vrot.slane %v1960_v60, 1 }
 0x183   : > { %v3263_v54 = vpop.f32.mrf.mxu0  ;;  %2264 = vmatmul.bf16.gmra.mxu1 %v2101_v49  ;;  %2524 = vmatmul.bf16.gmra.mxu2 %v2367_v32  ;;  %v6791_v3 = vadd.f32 %v3260_v57, %v2935_v24  ;;  %v3145_v32 = vrot.slane %v3143_v0, 2  ;;  %v2108_v55 = vrot.slane %v2106_v23, 1  ;;  %v4039_v24 = vrot.slane %v4037_v2, 3  ;;  %v4387_v23 = vld [vmem:[%s6149_s26 + $0x10] sm:$0x8] }
 0x184   : > { %v2369_v0 = vsel %vm2332_vm0, %v2366_v43, %v2368_v61 }
 0x185   : > { %4260 = vmatmul.bf16.vlgmr.msra.gmra.mxu3 %v4032_v14  ;;  %v2109_v12 = vsel %vm1961_vm1, %v2104_v10, %v2108_v55 }
 0x186   : > { %3302 = vmatmul.bf16.gmra.mxu0 %v3138_v31  ;;  %v2485_v45 = vpop.f32.mrf.mxu2 }
 0x187   : > { %v2551_v44 = vadd.f32 %v2485_v45, %v2291_v21  ;;  %v3146_v21 = vor.u32 %v3145_v32, %v3142_v18  ;;  %v1797_v18 = vadd.f32 %v6477_v28, %v6457_v59  ;;  %v8289_v32 = vunpack.c.l.b16 %v6258_v52 }
 0x188   : > { %v2227_v57 = vpop.f32.mrf.mxu1  ;;  %v6805_v42 = vpop.f32.mrf.mxu3 }
 0x189   : > { %v2936_v30 = vadd.f32 %v6719_v36, %v2551_v44  ;;  %v2292_v25 = vadd.f32 %v2227_v57, %v1795_v58  ;;  %v1796_v36 = vadd.f32 %v6477_v28, %v6435_v29  ;;  %v3147_v57 = vsel %vm2977_vm2, %v6772_v38, %v3146_v21 }
 0x18a   : > { %v3368_v29 = vunpack.c.l.b16 %v3349_v34  ;;  %v8290_v21 = vunpack.c.l.b16 %v6737_v19  ;;  %v1798_v19 = vadd.f32 %v6477_v28, %v6344_v41 }
 0x18b   : > { %v3265_v49 = vpop.f32.mrf.mxu0  ;;  %v6807_v31 = vadd.f32 %v3263_v54, %v2936_v30  ;;  %v4040_v54 = vor.u32 %v4039_v24, %v4036_v16  ;;  %v6824_v30 = vld [vmem:[%s6149_s26 + $0x28] sm:$0xff] }
 0x18c   : > { %v3369_v10 = vpack.c.b16 %v8289_v32, %v3368_v29  ;;  %v4046_v61 = vshll.u32 %v6824_v30, 16 }
 0x18d   : > { %v4041_v43 = vsel %vm4015_vm3, %v4031_v62, %v4040_v54 }
 0x18e   : > { %v2487_v14 = vpop.f32.mrf.mxu2  ;;  %v3371_v59 = vrot.slane %v3369_v10, 2  ;;  %v6855_v10 = vld [vmem:[%s6149_s26 + $0x30] sm:$0xff] }
 0x18f   : > { %v2552_v45 = vadd.f32 %v2487_v14, %v2292_v25 }
 0x190   : > { %v2230_v58 = vpop.f32.mrf.mxu1  ;;  %v6818_v47 = vpop.f32.mrf.mxu3 }
 0x191   : > { %v2937_v44 = vadd.f32 %v6739_v6, %v2552_v45  ;;  %v2293_v60 = vadd.f32 %v2230_v58, %v1796_v36  ;;  %v4406_v6 = vunpack.c.l.b16 %v4387_v23  ;;  %v5967_v45 = vld [vmem:[%s6149_s26 + $0x10] sm:$0xff] }
 0x192   : > { %v3372_v58 = vrot.slane %v5967_v45, 2  ;;  %v5968_v45 = vld [vmem:[%s6149_s26 + $0x18] sm:$0xff] }
 0x193   : > { %v3268_v5 = vpop.f32.mrf.mxu0  ;;  %2269 = vmatmul.bf16.gmra.mxu1 %v2109_v12  ;;  %2529 = vmatmul.bf16.gmra.mxu2 %v2369_v0  ;;  %v6820_v2 = vadd.f32 %v3265_v49, %v2937_v44  ;;  %v4043_v49 = vshrl.u32 %v6824_v30, 16  ;;  %v4407_v14 = vpack.c.b16 %v8290_v21, %v4406_v6  ;;  %v3756_v12 = vrot.slane %v6757_v20, 2 }
 0x194   : > { %v3757_v0 = vrot.slane %v6753_v50, 2  ;;  %v4048_v44 = vrot.slane %v4046_v61, 3 }
 0x195   : > { %4265 = vmatmul.bf16.gmra.mxu3 %v4041_v43  ;;  %v4045_v34 = vrot.slane %v4043_v49, 2 }
 0x196   : > { %3307 = vmatmul.bf16.gmra.mxu0 %v3147_v57  ;;  %v2490_v25 = vpop.f32.mrf.mxu2  ;;  %v3758_v20 = vsel %vm3370_vm4, %v3756_v12, %v3757_v0  ;;  %v3374_v12 = vrot.slane %v5968_v45, 2  ;;  %v3761_v45 = vrot.slane %v6824_v30, 2 }
 0x197   : > { %v2553_v38 = vadd.f32 %v2490_v25, %v2293_v60  ;;  %v4410_v60 = vrot.slane %v6753_v50, 3  ;;  %v4049_v43 = vor.u32 %v4048_v44, %v4045_v34  ;;  %v3759_v34 = vrot.slane %v6795_v39, 2 }
 0x198   : > { %v2232_v55 = vpop.f32.mrf.mxu1  ;;  %v6835_v36 = vpop.f32.mrf.mxu3 }
 0x199   : > { %v2938_v62 = vadd.f32 %v6768_v7, %v2553_v38  ;;  %v2294_v16 = vadd.f32 %v2232_v55, %v1797_v18  ;;  %v4409_v7 = vrot.slane %v4407_v14, 3  ;;  %v4050_v41 = vsel %vm4015_vm3, %v4040_v54, %v4049_v43 }
 0x19b   : > { %v3270_v24 = vpop.f32.mrf.mxu0  ;;  %v6838_v52 = vadd.f32 %v3268_v5, %v2938_v62  ;;  %v3373_v5 = vsel %vm3370_vm4, %v3371_v59, %v3372_v58  ;;  %v4411_v38 = vsel %vm4408_vm5, %v4409_v7, %v4410_v60  ;;  %v4052_v62 = vshrl.u32 %v6855_v10, 16 }
 0x19c   : > { %v4412_v7 = vrot.slane %v6795_v39, 3 }
 0x19e   : > { %v2492_v57 = vpop.f32.mrf.mxu2 }
 0x19f   : > { %v2554_v23 = vadd.f32 %v2492_v57, %v2294_v16  ;;  %v4055_v16 = vshll.u32 %v6855_v10, 16 }
 0x1a0   : > { %v2235_v29 = vpop.f32.mrf.mxu1  ;;  %v6849_v50 = vpop.f32.mrf.mxu3 }
 0x1a1   : > { %v2939_v6 = vadd.f32 %v6789_v15, %v2554_v23  ;;  %v2295_v25 = vadd.f32 %v2235_v29, %v1798_v19  ;;  %v1799_v15 = vadd.f32 %v6477_v28, %v6353_v56  ;;  %v4054_v56 = vrot.slane %v4052_v62, 2 }
 0x1a2   : > { %v4057_v44 = vrot.slane %v4055_v16, 3  ;;  %v1800_v19 = vadd.f32 %v6477_v28, %v6366_v4  ;;  %v3375_v29 = vsel %vm3370_vm4, %v3372_v58, %v3374_v12  ;;  %v6881_v58 = vld [vmem:[%s6149_s26 + $0x38] sm:$0xff] }
 0x1a3   : > { %v3273_v18 = vpop.f32.mrf.mxu0  ;;  %3482 = vmatmul.bf16.vlgmr.msra.gmra.mxu1 %v3373_v5  ;;  %3867 = vmatmul.bf16.vlgmr.msra.gmra.mxu2 %v3758_v20  ;;  %v6851_v32 = vadd.f32 %v3270_v24, %v2939_v6  ;;  %v3760_v5 = vsel %vm3370_vm4, %v3757_v0, %v3759_v34 }
 0x1a4   : > { %v4058_v20 = vor.u32 %v4057_v44, %v4054_v56  ;;  %v4414_v56 = vrot.slane %v6824_v30, 3 }
 0x1a5   : > { %4270 = vmatmul.bf16.gmra.mxu3 %v4050_v41 }
 0x1a6   : > { %4520 = vmatmul.bf16.vlgmr.msra.gmra.mxu0 %v4411_v38  ;;  %v2495_v55 = vpop.f32.mrf.mxu2  ;;  %v4413_v38 = vsel %vm4408_vm5, %v4410_v60, %v4412_v7  ;;  %v4059_v4 = vsel %vm4015_vm3, %v4049_v43, %v4058_v20  ;;  %v4061_v60 = vshrl.u32 %v6881_v58, 16 }
 0x1a7   : > { %v2555_v49 = vadd.f32 %v2495_v55, %v2295_v25 }
 0x1a8   : > { %v2237_v61 = vpop.f32.mrf.mxu1  ;;  %v6862_v59 = vpop.f32.mrf.mxu3 }
 0x1a9   : > { %v2940_v24 = vadd.f32 %v6805_v42, %v2555_v49  ;;  %v2296_v21 = vadd.f32 %v2237_v61, %v1799_v15  ;;  %v4064_v49 = vshll.u32 %v6881_v58, 16 }
 0x1ab   : > { %v3275_v14 = vpop.f32.mrf.mxu0  ;;  %v6864_v54 = vadd.f32 %v3273_v18, %v2940_v24 }
 0x1ae   : > { %v2497_v57 = vpop.f32.mrf.mxu2 }
 0x1af   : > { %v2556_v42 = vadd.f32 %v2497_v57, %v2296_v21  ;;  %v5969_v21 = vld [vmem:[%s6149_s26 + $0x20] sm:$0xff] }
 0x1b0   : > { %v2240_v23 = vpop.f32.mrf.mxu1  ;;  %v6875_v41 = vpop.f32.mrf.mxu3  ;;  %v6898_v57 = vld [vmem:[%s8261_s2] ss:$0 sm:$0xff] }
 0x1b1   : > { %v2941_v6 = vadd.f32 %v6818_v47, %v2556_v42  ;;  %v2297_v25 = vadd.f32 %v2240_v23, %v1800_v19  ;;  %v1801_v47 = vadd.f32 %v6477_v28, %v6375_v17  ;;  %v4063_v17 = vrot.slane %v4061_v60, 2 }
 0x1b2   : > { %v4066_v28 = vrot.slane %v4064_v49, 3 }
 0x1b3   : > { %v3278_v18 = vpop.f32.mrf.mxu0  ;;  %3487 = vmatmul.bf16.gmra.mxu1 %v3375_v29  ;;  %3872 = vmatmul.bf16.gmra.mxu2 %v3760_v5  ;;  %v6877_v39 = vadd.f32 %v3275_v14, %v2941_v6  ;;  %v3376_v14 = vrot.slane %v5969_v21, 2  ;;  %v3762_v29 = vsel %vm3370_vm4, %v3759_v34, %v3761_v45  ;;  %v3763_v21 = vrot.slane %v6855_v10, 2 }
 0x1b4   : > { %v4067_v5 = vor.u32 %v4066_v28, %v4063_v17  ;;  %v4416_v28 = vrot.slane %v6855_v10, 3 }
 0x1b5   : > { %8291 = vst [vmem:[#allocation16_spill] sm:$0xff] %v6877_v39  ;;  %4275 = vmatmul.bf16.gmra.mxu3 %v4059_v4  ;;  %v3377_v23 = vsel %vm3370_vm4, %v3374_v12, %v3376_v14  ;;  %v6912_v12 = vld [vmem:[%s6149_s26 + $0x40] sm:$0xff] }
 0x1b6   : > { %4525 = vmatmul.bf16.gmra.mxu0 %v4413_v38  ;;  %v2500_v0 = vpop.f32.mrf.mxu2 }
 0x1b7   : > { %v2557_v55 = vadd.f32 %v2500_v0, %v2297_v25 }
 0x1b8   : > { %v2242_v15 = vpop.f32.mrf.mxu1  ;;  %v6888_v24 = vpop.f32.mrf.mxu3 }
 0x1b9   : > { %v2942_v61 = vadd.f32 %v6835_v36, %v2557_v55  ;;  %v2298_v62 = vadd.f32 %v2242_v15, %v1801_v47  ;;  %v1802_v36 = vadd.f32 %v6898_v57, %v6397_v33  ;;  %v4068_v33 = vsel %vm4015_vm3, %v4058_v20, %v4067_v5 }
 0x1ba   : > { %v4073_v55 = vshll.u32 %v6912_v12, 16 }
 0x1bb   : > { %v3280_v16 = vpop.f32.mrf.mxu0  ;;  %v6890_v43 = vadd.f32 %v3278_v18, %v2942_v61  ;;  %v4415_v18 = vsel %vm4408_vm5, %v4412_v7, %v4414_v56  ;;  %v4070_v7 = vshrl.u32 %v6912_v12, 16 }
 0x1bc   : > { %v4075_v17 = vrot.slane %v4073_v55, 3 }
 0x1bd   : > { %8292 = vst [vmem:[#allocation17_spill] sm:$0xff] %v6890_v43 }
 0x1be   : > { %v2502_v44 = vpop.f32.mrf.mxu2 }
 0x1bf   : > { %v2558_v19 = vadd.f32 %v2502_v44, %v2298_v62  ;;  %v5971_v62 = vld [vmem:[%s6149_s26 + $0x28] sm:$0xff] }
 0x1c0   : > { %v2245_v42 = vpop.f32.mrf.mxu1  ;;  %v6906_v38 = vpop.f32.mrf.mxu3 }
 0x1c1   : > { %v2943_v6 = vadd.f32 %v6849_v50, %v2558_v19  ;;  %v2299_v30 = vadd.f32 %v2245_v42, %v1802_v36  ;;  %v1803_v50 = vadd.f32 %v6898_v57, %v6409_v53  ;;  %v4072_v53 = vrot.slane %v4070_v7, 2 }
 0x1c2   : > { %v1804_v36 = vadd.f32 %v6898_v57, %v6422_v9 }
 0x1c3   : > { %v3283_v25 = vpop.f32.mrf.mxu0  ;;  %3492 = vmatmul.bf16.gmra.mxu1 %v3377_v23  ;;  %3877 = vmatmul.bf16.gmra.mxu2 %v3762_v29  ;;  %v6908_v4 = vadd.f32 %v3280_v16, %v2943_v6  ;;  %v3378_v16 = vrot.slane %v5971_v62, 2  ;;  %v3764_v23 = vsel %vm3370_vm4, %v3761_v45, %v3763_v21  ;;  %v4076_v29 = vor.u32 %v4075_v17, %v4072_v53 }
 0x1c4   : > { %v3765_v62 = vrot.slane %v6881_v58, 2  ;;  %v4418_v17 = vrot.slane %v6881_v58, 3 }
 0x1c5   : > { %8293 = vst [vmem:[#allocation18_spill] sm:$0xff] %v6908_v4  ;;  %4280 = vmatmul.bf16.gmra.mxu3 %v4068_v33  ;;  %v3379_v42 = vsel %vm3370_vm4, %v3376_v14, %v3378_v16  ;;  %v4077_v9 = vsel %vm4015_vm3, %v4067_v5, %v4076_v29  ;;  %v6938_v14 = vld [vmem:[%s6149_s26 + $0x48] sm:$0xff] }
 0x1c6   : > { %4530 = vmatmul.bf16.gmra.mxu0 %v4415_v18  ;;  %v2505_v34 = vpop.f32.mrf.mxu2  ;;  %v4417_v18 = vsel %vm4408_vm5, %v4414_v56, %v4416_v28  ;;  %v4079_v56 = vshrl.u32 %v6938_v14, 16 }
 0x1c7   : > { %v2559_v0 = vadd.f32 %v2505_v34, %v2299_v30 }
 0x1c8   : > { %v2247_v47 = vpop.f32.mrf.mxu1  ;;  %v6919_v61 = vpop.f32.mrf.mxu3 }
 0x1c9   : > { %v2944_v15 = vadd.f32 %v6862_v59, %v2559_v0  ;;  %v2300_v60 = vadd.f32 %v2247_v47, %v1803_v50  ;;  %v4082_v0 = vshll.u32 %v6938_v14, 16 }
 0x1cb   : > { %v3285_v49 = vpop.f32.mrf.mxu0  ;;  %v6921_v20 = vadd.f32 %v3283_v25, %v2944_v15  ;;  %v4084_v53 = vrot.slane %v4082_v0, 3 }
 0x1cd   : > { %8294 = vst [vmem:[#allocation19_spill] sm:$0xff] %v6921_v20 }
 0x1ce   : > { %v2507_v44 = vpop.f32.mrf.mxu2 }
 0x1cf   : > { %v2560_v59 = vadd.f32 %v2507_v44, %v2300_v60  ;;  %v5972_v60 = vld [vmem:[%s6149_s26 + $0x30] sm:$0xff] }
 0x1d0   : > { %v2250_v19 = vpop.f32.mrf.mxu1  ;;  %v6932_v33 = vpop.f32.mrf.mxu3 }
 0x1d1   : > { %v2945_v6 = vadd.f32 %v6875_v41, %v2560_v59  ;;  %v2301_v30 = vadd.f32 %v2250_v19, %v1804_v36  ;;  %v1805_v41 = vadd.f32 %v6898_v57, %v6433_v27  ;;  %v4081_v27 = vrot.slane %v4079_v56, 2 }
 0x1d2   : > { %v1806_v36 = vadd.f32 %v6898_v57, %v6455_v51 }
 0x1d3   : > { %v3288_v25 = vpop.f32.mrf.mxu0  ;;  %3497 = vmatmul.bf16.gmra.mxu1 %v3379_v42  ;;  %3882 = vmatmul.bf16.gmra.mxu2 %v3764_v23  ;;  %v6934_v10 = vadd.f32 %v3285_v49, %v2945_v6  ;;  %v3380_v49 = vrot.slane %v5972_v60, 2  ;;  %v3766_v42 = vsel %vm3370_vm4, %v3763_v21, %v3765_v62  ;;  %v4085_v23 = vor.u32 %v4084_v53, %v4081_v27 }
 0x1d4   : > { %v8266_v53 = vrot.slane %v6912_v12, 3 }
 0x1d5   : > { %8295 = vst [vmem:[#allocation20_spill] sm:$0xff] %v6934_v10  ;;  %4285 = vmatmul.bf16.gmra.mxu3 %v4077_v9  ;;  %v3381_v19 = vsel %vm3370_vm4, %v3378_v16, %v3380_v49  ;;  %v4086_v51 = vsel %vm4015_vm3, %v4076_v29, %v4085_v23  ;;  %v6964_v16 = vld [vmem:[%s6149_s26 + $0x50] sm:$0xff] }
 0x1d6   : > { %4535 = vmatmul.bf16.gmra.mxu0 %v4417_v18  ;;  %v2510_v45 = vpop.f32.mrf.mxu2  ;;  %v4419_v18 = vsel %vm4408_vm5, %v4416_v28, %v4418_v17  ;;  %v4088_v28 = vshrl.u32 %v6964_v16, 16 }
 0x1d7   : > { %v2561_v34 = vadd.f32 %v2510_v45, %v2301_v30 }
 0x1d8   : > { %v2252_v50 = vpop.f32.mrf.mxu1  ;;  %v6945_v15 = vpop.f32.mrf.mxu3  ;;  %v4090_v60 = vrot.slane %v4088_v28, 2 }
 0x1d9   : > { %v2946_v47 = vadd.f32 %v6888_v24, %v2561_v34  ;;  %v2302_v7 = vadd.f32 %v2252_v50, %v1805_v41  ;;  %v4091_v34 = vshll.u32 %v6964_v16, 16 }
 0x1db   : > { %v3290_v55 = vpop.f32.mrf.mxu0  ;;  %v6947_v5 = vadd.f32 %v3288_v25, %v2946_v47  ;;  %v4093_v27 = vrot.slane %v4091_v34, 3 }
 0x1dd   : > { %8296 = vst [vmem:[#allocation21_spill] sm:$0xff] %v6947_v5 }
 0x1de   : > { %v2512_v44 = vpop.f32.mrf.mxu2 }
 0x1df   : > { %v2562_v24 = vadd.f32 %v2512_v44, %v2302_v7  ;;  %v6976_v7 = vld [vmem:[%s6149_s26 + $0x38] sm:$0xff] }
 0x1e0   : > { %v2255_v59 = vpop.f32.mrf.mxu1  ;;  %v6958_v9 = vpop.f32.mrf.mxu3 }
 0x1e1   : > { %v2947_v6 = vadd.f32 %v6906_v38, %v2562_v24  ;;  %v2303_v30 = vadd.f32 %v2255_v59, %v1806_v36  ;;  %v1807_v38 = vadd.f32 %v6898_v57, %v6479_v37  ;;  %v3767_v37 = vrot.slane %v6912_v12, 2 }
 0x1e3   : > { %v3293_v25 = vpop.f32.mrf.mxu0  ;;  %3502 = vmatmul.bf16.gmra.mxu1 %v3381_v19  ;;  %3887 = vmatmul.bf16.gmra.mxu2 %v3766_v42  ;;  %v6960_v58 = vadd.f32 %v3290_v55, %v2947_v6  ;;  %v3382_v55 = vrot.slane %v6976_v7, 2  ;;  %v3768_v19 = vsel %vm3370_vm4, %v3765_v62, %v3767_v37  ;;  %v6989_v42 = vor.u32 %v4093_v27, %v4090_v60 }
 0x1e5   : > { %8297 = vst [vmem:[#allocation22_spill] sm:$0xff] %v6960_v58  ;;  %4290 = vmatmul.bf16.gmra.mxu3 %v4086_v51  ;;  %v3383_v59 = vsel %vm3370_vm4, %v3380_v49, %v3382_v55  ;;  %v7199_v58 = vld [vmem:[%s6149_s26 + $0x68] sm:$0xff] }
 0x1e6   : > { %4540 = vmatmul.bf16.gmra.mxu0 %v4419_v18  ;;  %v2515_v21 = vpop.f32.mrf.mxu2  ;;  %v174_v18 = vlaneseq }
 0x1e7   : > { %v2563_v45 = vadd.f32 %v2515_v21, %v2303_v30  ;;  %v7004_v21 = vld [vmem:[%s6149_s26 + $0x58] sm:$0xff] }
 0x1e8   : > { %v2257_v41 = vpop.f32.mrf.mxu1  ;;  %v6971_v47 = vpop.f32.mrf.mxu3  ;;  %v6997_v49 = vshrl.u32 %v174_v18, 7  ;;  %v4100_v60 = vshll.u32 %v7004_v21, 16 }
 0x1e9   : > { %v2948_v50 = vadd.f32 %v6919_v61, %v2563_v45  ;;  %v2304_v56 = vadd.f32 %v2257_v41, %v1807_v38  ;;  %v1808_v61 = vadd.f32 %v6898_v57, %v6350_v48  ;;  %v4421_v48 = vsel %vm4408_vm5, %v4418_v17, %v8266_v53 }
 0x1ea   : > { %v214_v17 = vand.u32 65535, %v6997_v49  ;;  %v4097_v45 = vshrl.u32 %v7004_v21, 16  ;;  %v1809_v41 = vadd.f32 %v6898_v57, %v6362_v63  ;;  %v215_v34 = vshrl.u32 %v6997_v49, 16 }
 0x1eb   : > { %v3295_v0 = vpop.f32.mrf.mxu0  ;;  %v6973_v29 = vadd.f32 %v3293_v25, %v2948_v50 }
 0x1ec   : > { %v218_v50 = vmul.u32 58254, %v214_v17  ;;  %v217_v63 = vmul.u32 14564, %v214_v17  ;;  %v8270_v17 = vmov 0  }
 0x1ed   : > { %8298 = vst [vmem:[#allocation23_spill] sm:$0xff] %v6973_v29 }
 0x1ee   : > { %v2517_v44 = vpop.f32.mrf.mxu2  ;;  %4827 = vst [vmem:[%s7029_s24] sm:$0xf] %v8270_v17 }
 0x1ef   : > { %v2564_v36 = vadd.f32 %v2517_v44, %v2304_v56  ;;  %4828 = vst [vmem:[%s7029_s24 + $0x4] sm:$0xf] %v8270_v17 }
 0x1f0   : > { %v2260_v24 = vpop.f32.mrf.mxu1  ;;  %v6995_v51 = vpop.f32.mrf.mxu3  ;;  %4829 = vst [vmem:[%s7029_s24 + $0x8] sm:$0xf] %v8270_v17 }
 0x1f1   : > { %v2949_v6 = vadd.f32 %v6932_v33, %v2564_v36  ;;  %v2305_v30 = vadd.f32 %v2260_v24, %v1808_v61  ;;  %v4095_v33 = vsel %vm4015_vm3, %v4085_v23, %v6989_v42  ;;  %v7015_v23 = vld [vmem:[%s6149_s26 + $0x40] sm:$0xff]  ;;  %v219_v36 = vmul.u32 14564, %v215_v34  ;;  %4866 = vst [vmem:[%s7029_s24 + $0x9c] sm:$0xf] %v8270_v17 }
 0x1f2   : > { %v8268_v24 = vrot.slane %v6938_v14, 2  ;;  %4867 = vst [vmem:[%s7029_s24 + $0xa0] sm:$0xf] %v8270_v17 }
 0x1f3   : > { %v3298_v25 = vpop.f32.mrf.mxu0  ;;  %3507 = vmatmul.bf16.gmra.mxu1 %v3383_v59  ;;  %3892 = vmatmul.bf16.gmra.mxu2 %v3768_v19  ;;  %v6999_v62 = vadd.f32 %v3295_v0, %v2949_v6  ;;  %v8267_v0 = vrot.slane %v7015_v23, 2  ;;  %v8269_v59 = vrot.slane %v6938_v14, 3  ;;  %v4099_v6 = vrot.slane %v4097_v45, 2  ;;  %4868 = vst [vmem:[%s7029_s24 + $0xa4] sm:$0xf] %v8270_v17 }
 0x1f4   : > { %v223_v18 = vshll.u32 %v219_v36, 16  ;;  %v1810_v45 = vadd.f32 %v6898_v57, %v6372_v11  ;;  %v3770_v11 = vsel %vm3370_vm4, %v3767_v37, %v8268_v24 }
 0x1f5   : > { %8299 = vst [vmem:[#allocation24_spill] sm:$0xff] %v6999_v62  ;;  %4295 = vmatmul.bf16.gmra.mxu3 %v4095_v33  ;;  %v7027_v33 = vadd.s32 8, %v6997_v49 }
 0x1f6   : > { %4545 = vmatmul.bf16.gmra.mxu0 %v4421_v48  ;;  %v2520_v38 = vpop.f32.mrf.mxu2  ;;  %v220_v48 = vmul.u32 58254, %v215_v34 }
 0x1f7   : > { %v2565_v28 = vadd.f32 %v2520_v38, %v2305_v30  ;;  %v221_v30 = vshll.u32 %v218_v50, 16  ;;  %v4102_v38 = vrot.slane %v4100_v60, 3  ;;  %v243_v60 = vand.u32 65535, %v7027_v33 }
 0x1f8   : > { %v2262_v56 = vpop.f32.mrf.mxu1  ;;  %v7024_v19 = vpop.f32.mrf.mxu3  ;;  %v244_v7 = vshrl.u32 %v7027_v33, 16 }
 0x1f9   : > { %v2950_v27 = vadd.f32 %v6945_v15, %v2565_v28  ;;  %v2306_v44 = vadd.f32 %v2262_v56, %v1809_v41  ;;  %vm225_vm6 = vc.u32 %v217_v63, %v221_v30  ;;  %v227_v15 = vadd.s32 %v221_v30, %v217_v63  ;;  %v8301_v28 = vld [vmem:[#allocation5_spill] sm:$0xff] }
 0x1fa   : > { %v7039_v34 = vadd.f32 %v6898_v57, %v8301_v28  ;;  %v226_v56 = vsel %vm225_vm6, 1, %v8270_v17  ;;  %v222_v28 = vshrl.u32 %v218_v50, 16  ;;  %v247_v50 = vmul.u32 58254, %v243_v60 }
 0x1fb   : > { %v7020_v61 = vpop.f32.mrf.mxu0  ;;  %v7033_v41 = vadd.f32 %v3298_v25, %v2950_v27  ;;  %v3385_v25 = vsel %vm3370_vm4, %v3382_v55, %v8267_v0  ;;  %v228_v27 = vadd.s32 %v226_v56, %v220_v48  ;;  %vm229_vm7 = vc.u32 %v227_v15, %v223_v18 }
 0x1fc   : > { %v230_v53 = vsel %vm229_vm7, 1, %v8270_v17  ;;  %v8302_v0 = vrot.slane %v6912_v12, 3  ;;  %v7066_v48 = vor.u32 %v4102_v38, %v4099_v6  ;;  %v246_v24 = vmul.u32 14564, %v243_v60  ;;  %v8304_v12 = vld [vmem:[#allocation7_spill] sm:$0xff] }
 0x1fd   : > { %8300 = vst [vmem:[#allocation25_spill] sm:$0xff] %v7033_v41  ;;  %v232_v18 = vadd.s32 %v230_v53, %v228_v27  ;;  %v8303_v41 = vld [vmem:[#allocation6_spill] sm:$0xff]  ;;  %v7082_v53 = vld [vmem:[%s6149_s26 + $0x48] sm:$0xff]  ;;  %v250_v60 = vshll.u32 %v247_v50, 16 }
 0x1fe   : > { %v2522_v63 = vpop.f32.mrf.mxu2  ;;  %v4423_v37 = vsel %vm4408_vm5, %v8302_v0, %v8269_v59  ;;  %v7075_v62 = vadd.f32 %v6898_v57, %v8303_v41  ;;  %v7079_v0 = vadd.f32 %v6898_v57, %v8304_v12  ;;  %v8272_v6 = vrot.slane %v7082_v53, 2 }
 0x1ff   : > { %v2566_v30 = vadd.f32 %v2522_v63, %v2306_v44  ;;  %v224_v63 = vshrl.u32 %v219_v36, 16  ;;  %v233_v38 = vadd.s32 %v232_v18, %v222_v28  ;;  %v248_v36 = vmul.u32 14564, %v244_v7 }
 0x200   : > { %v2265_v55 = vpop.f32.mrf.mxu1  ;;  %v7088_v41 = vadd.s32 16, %v6997_v49  ;;  %v4104_v57 = vsel %vm4015_vm3, %v6989_v42, %v7066_v48  ;;  %vm254_vm8 = vc.u32 %v246_v24, %v250_v60 }
 0x201   : > { %v2951_v44 = vadd.f32 %v6958_v9, %v2566_v30  ;;  %v2307_v15 = vadd.f32 %v2265_v55, %v1810_v45  ;;  %v7085_v9 = vpop.f32.mrf.mxu3  ;;  %v249_v45 = vmul.u32 58254, %v244_v7  ;;  %v234_v30 = vadd.s32 %v233_v38, %v224_v63  ;;  %v7095_v55 = vld [vmem:[%s6149_s26 + $0x60] sm:$0xff] }
 0x202   : > { %v272_v7 = vand.u32 65535, %v7088_v41  ;;  %v4109_v59 = vshll.u32 %v7095_v55, 16  ;;  %v255_v27 = vsel %vm254_vm8, 1, %v8270_v17  ;;  %v251_v63 = vshrl.u32 %v247_v50, 16 }
 0x203   : > { %v3303_v56 = vpop.f32.mrf.mxu0  ;;  %3512 = vmatmul.bf16.gmra.mxu1 %v3385_v25  ;;  %3897 = vmatmul.bf16.gmra.mxu2 %v3770_v11  ;;  %v7098_v28 = vadd.f32 %v7020_v61, %v2951_v44  ;;  %v252_v25 = vshll.u32 %v248_v36, 16  ;;  %v256_v11 = vadd.s32 %v250_v60, %v246_v24  ;;  %v235_v12 = vshrl.u32 %v234_v30, 4 }
 0x204   : > { %v257_v38 = vadd.s32 %v255_v27, %v249_v45  ;;  %v8306_v24 = vrot.slane %v7015_v23, 2  ;;  %v4424_v60 = vrot.slane %v6964_v16, 3  ;;  %v253_v45 = vshrl.u32 %v248_v36, 16 }
 0x205   : > { %8305 = vst [vmem:[#allocation5_spill] sm:$0xff] %v7098_v28  ;;  %4300 = vmatmul.bf16.gmra.mxu3 %v4104_v57  ;;  %vm258_vm9 = vc.u32 %v256_v11, %v252_v25  ;;  %v236_v30 = vmul.u32 18, %v235_v12  ;;  %v4111_v11 = vrot.slane %v4109_v59, 3  ;;  %v5976_v12 = vld [vmem:[%s6149_s26 + $0x50] sm:$0xff]  ;;  %v8310_v36 = vrot.slane %v6938_v14, 2 }
 0x206   : > { %4550 = vmatmul.bf16.gmra.mxu0 %v4423_v37  ;;  %v2525_v18 = vpop.f32.mrf.mxu2  ;;  %v4106_v37 = vshrl.u32 %v7095_v55, 16  ;;  %v3387_v44 = vsel %vm3370_vm4, %v8306_v24, %v8272_v6  ;;  %v259_v28 = vsel %vm258_vm9, 1, %v8270_v17  ;;  %v3388_v24 = vrot.slane %v5976_v12, 2 }
 0x207   : > { %v2567_v42 = vadd.f32 %v2525_v18, %v2307_v15  ;;  %v261_v27 = vadd.s32 %v259_v28, %v257_v38  ;;  %v7118_v25 = vsub.s32 %v6997_v49, %v236_v30  ;;  %v273_v18 = vshrl.u32 %v7088_v41, 16 }
 0x208   : > { %v2267_v61 = vpop.f32.mrf.mxu1  ;;  %v4108_v23 = vrot.slane %v4106_v37, 2  ;;  %v7122_v6 = vmul.u32 58254, %v272_v7  ;;  %v275_v59 = vmul.u32 14564, %v272_v7  ;;  %v7135_v38 = vadd.s32 24, %v6997_v49 }
 0x209   : > { %v2952_v29 = vadd.f32 %v6971_v47, %v2567_v42  ;;  %v2308_v15 = vadd.f32 %v2267_v61, %v7039_v34  ;;  %v7115_v57 = vpop.f32.mrf.mxu3  ;;  %v262_v17 = vadd.s32 %v261_v27, %v251_v63  ;;  %v8309_v34 = vrot.slane %v6964_v16, 2 }
 0x20a   : > { %v8311_v42 = vrot.slane %v6938_v14, 3  ;;  %v3773_v63 = vrot.slane %v7004_v21, 2  ;;  %vm1255_vm10 = vcmp.ne.s32.totalorder %v7118_v25, 0  ;;  %vm1291_vm11 = vcmp.lt.s32.totalorder %v7118_v25, 0 }
 0x20b   : > { %v7113_v50 = vpop.f32.mrf.mxu0  ;;  %v7124_v47 = vadd.f32 %v3303_v56, %v2952_v29  ;;  %v3772_v28 = vsel %vm3370_vm4, %v8310_v36, %v8309_v34  ;;  %v263_v61 = vadd.s32 %v262_v17, %v253_v45  ;;  %v7138_v29 = vmul.u32 14564, %v273_v18  ;;  %vm7169_vm13 = vmand %vm1291_vm11, %vm1255_vm10 }
 0x20c   : > { %8307 = vst [vmem:[#allocation6_spill] sm:$0xff] %v7113_v50  ;;  %v4425_v37 = vsel %vm4408_vm5, %v8311_v42, %v4424_v60  ;;  %v279_v56 = vshll.u32 %v7122_v6, 16  ;;  %v7144_v14 = vor.u32 %v4111_v11, %v4108_v23  ;;  %v8312_v12 = vrot.slane %v7082_v53, 2  ;;  %v7155_v50 = vld [vmem:[%s6149_s26 + $0x58] sm:$0xff] }
 0x20d   : > { %8308 = vst [vmem:[#allocation7_spill] sm:$0xff] %v7124_v47  ;;  %v264_v17 = vshrl.u32 %v263_v61, 4  ;;  %v278_v45 = vmul.u32 58254, %v273_v18  ;;  %v7152_v42 = vadd.s32 18, %v7118_v25  ;;  %v301_v23 = vand.u32 65535, %v7135_v38 }
 0x20e   : > { %v2527_v30 = vpop.f32.mrf.mxu2  ;;  %v7149_v34 = vsel %vm3370_vm4, %v8312_v12, %v3388_v24  ;;  %vm283_vm12 = vc.u32 %v275_v59, %v279_v56  ;;  %v8317_v12 = vrot.slane %v6964_v16, 2  ;;  %v4113_v27 = vsel %vm4015_vm3, %v7066_v48, %v7144_v14 }
 0x20f   : > { %v2568_v7 = vadd.f32 %v2527_v30, %v2308_v15  ;;  %v265_v61 = vmul.u32 18, %v264_v17  ;;  %v281_v30 = vshll.u32 %v7138_v29, 16  ;;  %v8319_v17 = vmov 0  }
 0x210   : > { %v2270_v36 = vpop.f32.mrf.mxu1  ;;  %v302_v47 = vshrl.u32 %v7135_v38, 16  ;;  %v282_v48 = vshrl.u32 %v7138_v29, 16  ;;  %v4118_v29 = vshll.u32 %v7199_v58, 16 }
 0x211   : > { %v7160_v15 = vadd.f32 %v6995_v51, %v2568_v7  ;;  %v2309_v53 = vadd.f32 %v2270_v36, %v7075_v62  ;;  %v7177_v51 = vsel %vm3370_vm4, %v8317_v12, %v3773_v63  ;;  %v8318_v62 = vrot.slane %v7004_v21, 3  ;;  %v7184_v36 = vpop.f32.mrf.mxu3 }
 0x212   : > { %v307_v5 = vmul.u32 58254, %v302_v47 }
 0x213   : > { %8313 = vst [vmem:[#allocation26_spill] sm:$0xff] %v7160_v15  ;;  %v7163_v11 = vpop.f32.mrf.mxu0  ;;  %v7182_v7 = vsel %vm4408_vm5, %v4424_v60, %v8318_v62  ;;  %3517 = vmatmul.bf16.gmra.mxu1 %v3387_v44  ;;  %3902 = vmatmul.bf16.gmra.mxu2 %v3772_v28  ;;  %v285_v15 = vadd.s32 %v279_v56, %v275_v59  ;;  %v280_v62 = vshrl.u32 %v7122_v6, 16  ;;  %v7201_v44 = vmul.u32 58254, %v301_v23 }
 0x214   : > { %8314 = vst [vmem:[#allocation27_spill] sm:$0xff] %v7163_v11  ;;  %v284_v11 = vsel %vm283_vm12, 1, %v8319_v17  ;;  %v7204_v28 = vsub.s32 %v7027_v33, %v265_v61  ;;  %v8320_v59 = vrot.slane %v7155_v50, 2  ;;  %v304_v56 = vmul.u32 14564, %v301_v23 }
 0x215   : > { %v286_v12 = vadd.s32 %v284_v11, %v278_v45  ;;  %vm287_vm14 = vc.u32 %v285_v15, %v281_v30  ;;  %v4115_v6 = vshrl.u32 %v7199_v58, 16  ;;  %v7214_v60 = vmul.u32 14564, %v302_v47  ;;  %4305 = vmatmul.bf16.gmra.mxu3 %v4113_v27 }
 0x216   : > { %4555 = vmatmul.bf16.gmra.mxu0 %v4425_v37  ;;  %v7209_v37 = vsel %vm3370_vm4, %v3388_v24, %v8320_v59  ;;  %v2530_v45 = vpop.f32.mrf.mxu2  ;;  %v288_v11 = vsel %vm287_vm14, 1, %v8319_v17  ;;  %v8321_v33 = vrot.slane %v7095_v55, 2  ;;  %v7222_v15 = vadd.s32 32, %v6997_v49 }
 0x217   : > { %v2569_v16 = vadd.f32 %v2530_v45, %v2309_v53  ;;  %v290_v24 = vadd.s32 %v288_v11, %v286_v12  ;;  %v4117_v59 = vrot.slane %v4115_v6, 2  ;;  %v308_v10 = vshll.u32 %v7201_v44, 16 }
 0x218   : > { %v7219_v61 = vsel %vm3370_vm4, %v3773_v63, %v8321_v33  ;;  %v2272_v23 = vpop.f32.mrf.mxu1  ;;  %v4120_v45 = vrot.slane %v4118_v29, 3  ;;  %vm1256_vm15 = vcmp.ne.s32.totalorder %v7204_v28, 0  ;;  %vm1292_vm0 = vcmp.lt.s32.totalorder %v7204_v28, 0 }
 0x219   : > { %v7227_v20 = vadd.f32 %v7024_v19, %v2569_v16  ;;  %v2310_v27 = vadd.f32 %v2272_v23, %v7079_v0  ;;  %v291_v63 = vadd.s32 %v290_v24, %v280_v62  ;;  %v7234_v12 = vpop.f32.mrf.mxu3  ;;  %v310_v11 = vshll.u32 %v7214_v60, 16  ;;  %vm7252_vm6 = vmand %vm1292_vm0, %vm1256_vm15 }
 0x21a   : > { %vm312_vm1 = vc.u32 %v304_v56, %v308_v10  ;;  %v314_v19 = vadd.s32 %v308_v10, %v304_v56  ;;  %v330_v16 = vand.u32 65535, %v7222_v15  ;;  %v7240_v0 = vadd.s32 18, %v7204_v28  ;;  %v7430_v10 = vld [vmem:[%s6149_s26 + $0x78] sm:$0xff] }
 0x21b   : > { %8322 = vst [vmem:[#allocation28_spill] sm:$0xff] %v7227_v20  ;;  %v7230_v53 = vpop.f32.mrf.mxu0  ;;  %v292_v47 = vadd.s32 %v291_v63, %v282_v48  ;;  %v313_v6 = vsel %vm312_vm1, 1, %v8319_v17  ;;  %v309_v62 = vshrl.u32 %v7201_v44, 16  ;;  %v331_v33 = vshrl.u32 %v7222_v15, 16  ;;  %v7271_v20 = vld [vmem:[%s6149_s26 + $0x60] sm:$0xff] }
 0x21c   : > { %8323 = vst [vmem:[#allocation29_spill] sm:$0xff] %v7230_v53  ;;  %v315_v29 = vadd.s32 %v313_v6, %v307_v5  ;;  %v7244_v23 = vor.u32 %v4120_v45, %v4117_v59  ;;  %vm316_vm2 = vc.u32 %v314_v19, %v310_v11  ;;  %v7246_v30 = vmul.u32 58254, %v330_v16 }
 0x21d   : > { %v293_v24 = vshrl.u32 %v292_v47, 4  ;;  %v8326_v5 = vrot.slane %v7095_v55, 3  ;;  %v8327_v44 = vrot.slane %v7004_v21, 3  ;;  %v317_v59 = vsel %vm316_vm2, 1, %v8319_v17 }
 0x21e   : > { %v2532_v48 = vpop.f32.mrf.mxu2  ;;  %v7264_v63 = vmul.u32 14564, %v331_v33  ;;  %v7267_v45 = vadd.s32 40, %v6997_v49  ;;  %v311_v6 = vshrl.u32 %v7214_v60, 16  ;;  %v319_v19 = vadd.s32 %v317_v59, %v315_v29 }
 0x21f   : > { %v7261_v56 = vsel %vm4408_vm5, %v8327_v44, %v8326_v5  ;;  %v2570_v11 = vadd.f32 %v2532_v48, %v2310_v27  ;;  %v294_v47 = vmul.u32 18, %v293_v24  ;;  %v8274_v21 = vrot.slane %v7271_v20, 2 }
 0x220   : > { %v3483_v53 = vpop.f32.mrf.mxu1  ;;  %v8273_v5 = vrot.slane %v7199_v58, 2  ;;  %v333_v44 = vmul.u32 14564, %v330_v16  ;;  %v337_v4 = vshll.u32 %v7246_v30, 16  ;;  %v4122_v27 = vsel %vm4015_vm3, %v7144_v14, %v7244_v23 }
 0x221   : > { %v7277_v43 = vadd.f32 %v7085_v9, %v2570_v11  ;;  %v320_v29 = vadd.s32 %v319_v19, %v309_v62  ;;  %v7287_v24 = vsub.s32 %v7088_v41, %v294_v47  ;;  %v7289_v16 = vpop.f32.mrf.mxu3  ;;  %v336_v48 = vmul.u32 58254, %v331_v33 }
 0x222   : > { %v339_v9 = vshll.u32 %v7264_v63, 16  ;;  %v359_v59 = vand.u32 65535, %v7267_v45  ;;  %v3573_v11 = vadd.f32 %v3483_v53, %v6502_v22  ;;  %v8329_v41 = vrot.slane %v7155_v50, 2  ;;  %v7322_v53 = vld [vmem:[%s6149_s26 + $0x70] sm:$0xff] }
 0x223   : > { %8328 = vst [vmem:[#allocation30_spill] sm:$0xff] %v7277_v43  ;;  %v4521_v39 = vpop.f32.mrf.mxu0  ;;  %3522 = vmatmul.bf16.gmra.mxu1 %v7149_v34  ;;  %3907 = vmatmul.bf16.gmra.mxu2 %v7177_v51  ;;  %v321_v60 = vadd.s32 %v320_v29, %v311_v6  ;;  %v338_v62 = vshrl.u32 %v7246_v30, 16  ;;  %v8330_v22 = vsel %vm7169_vm13, %v7152_v42, %v7118_v25  ;;  %v8333_v50 = vrot.slane %v7095_v55, 2 }
 0x224   : > { %v7301_v14 = vsel %vm3370_vm4, %v8329_v41, %v8274_v21  ;;  %vm7310_vm7 = vcmp.lt.s32.totalorder %v8330_v22, 16  ;;  %vm341_vm8 = vc.u32 %v333_v44, %v337_v4  ;;  %v343_v30 = vadd.s32 %v337_v4, %v333_v44 }
 0x225   : > { %v7319_v51 = vsel %vm3370_vm4, %v8333_v50, %v8273_v5  ;;  %v360_v18 = vshrl.u32 %v7267_v45, 16  ;;  %v340_v42 = vshrl.u32 %v7264_v63, 16  ;;  %v342_v33 = vsel %vm341_vm8, 1, %v8319_v17  ;;  %4310 = vmatmul.bf16.gmra.mxu3 %v4122_v27 }
 0x226   : > { %4560 = vmatmul.bf16.gmra.mxu0 %v7182_v7  ;;  %v322_v7 = vshrl.u32 %v321_v60, 4  ;;  %v3868_v47 = vpop.f32.mrf.mxu2  ;;  %vm1257_vm9 = vcmp.ne.s32.totalorder %v7287_v24, 0  ;;  %v344_v6 = vadd.s32 %v342_v33, %v336_v48  ;;  %vm345_vm10 = vc.u32 %v343_v30, %v339_v9 }
 0x227   : > { %v4124_v19 = vshrl.u32 %v7322_v53, 16  ;;  %v3958_v29 = vadd.f32 %v3868_v47, %v3573_v11  ;;  %v346_v44 = vsel %vm345_vm10, 1, %v8319_v17  ;;  %v4127_v60 = vshll.u32 %v7322_v53, 16 }
 0x228   : > { %v323_v4 = vmul.u32 18, %v322_v7  ;;  %v3485_v41 = vpop.f32.mrf.mxu1  ;;  %vm1293_vm11 = vcmp.lt.s32.totalorder %v7287_v24, 0  ;;  %v348_v63 = vadd.s32 %v346_v44, %v344_v6  ;;  %v363_v22 = vmul.u32 58254, %v359_v59 }
 0x229   : > { %v7333_v50 = vmul.u32 14564, %v360_v18  ;;  %v4351_v5 = vadd.f32 %v7115_v57, %v3958_v29  ;;  %v1365_v9 = vadd.s32 18, %v7287_v24  ;;  %v362_v27 = vmul.u32 14564, %v359_v59  ;;  %v7340_v30 = vpop.f32.mrf.mxu3  ;;  %vm7357_vm15 = vmand %vm1293_vm11, %vm1257_vm9 }
 0x22a   : > { %v7338_v11 = vsub.s32 %v7135_v38, %v323_v4  ;;  %v349_v7 = vadd.s32 %v348_v63, %v338_v62  ;;  %v4126_v33 = vrot.slane %v4124_v19, 2  ;;  %v4129_v47 = vrot.slane %v4127_v60, 3 }
 0x22b   : > { %v4523_v48 = vpop.f32.mrf.mxu0  ;;  %v366_v21 = vshll.u32 %v363_v22, 16  ;;  %v4611_v25 = vadd.f32 %v4521_v39, %v4351_v5  ;;  %v3574_v6 = vadd.f32 %v3485_v41, %v6517_v1  ;;  %v8334_v44 = vrot.slane %v7199_v58, 3 }
 0x22c   : > { %v8335_v57 = vrot.slane %v7095_v55, 3  ;;  %v365_v43 = vmul.u32 58254, %v360_v18  ;;  %vm1258_vm12 = vcmp.ne.s32.totalorder %v7338_v11, 0  ;;  %vm1294_vm13 = vcmp.lt.s32.totalorder %v7338_v11, 0 }
 0x22d   : > { %v350_v38 = vadd.s32 %v349_v7, %v340_v42  ;;  %v368_v59 = vshll.u32 %v7333_v50, 16  ;;  %v4647_v62 = vmax.f32 %v4611_v25, 0.0  ;;  %v367_v19 = vshrl.u32 %v363_v22, 16  ;;  %vm7373_vm0 = vmand %vm1294_vm13, %vm1258_vm12 }
 0x22e   : > { %v7348_v29 = vsel %vm4408_vm5, %v8335_v57, %v8334_v44  ;;  %vm370_vm14 = vc.u32 %v362_v27, %v366_v21  ;;  %v372_v39 = vadd.s32 %v366_v21, %v362_v27  ;;  %v3870_v1 = vpop.f32.mrf.mxu2  ;;  %v7362_v5 = vadd.s32 18, %v7338_v11 }
 0x22f   : > { %v351_v18 = vshrl.u32 %v350_v38, 4  ;;  %v7364_v42 = vor.u32 %v4129_v47, %v4126_v33  ;;  %v371_v25 = vsel %vm370_vm14, 1, %v8319_v17  ;;  %v4755_v21 = vsel %vm7310_vm7, %v4647_v62, 0.0  ;;  %v7379_v33 = vld [vmem:[%s6149_s26 + $0x68] sm:$0xff] }
 0x230   : > { %v3959_v4 = vadd.f32 %v3870_v1, %v3574_v6  ;;  %v373_v41 = vadd.s32 %v371_v25, %v365_v43  ;;  %vm374_vm1 = vc.u32 %v372_v39, %v368_v59  ;;  %v4791_v63 = vpack.c.bf16 %v4755_v21, %v4755_v21  ;;  %v3488_v22 = vpop.f32.mrf.mxu1 }
 0x231   : > { %v352_v27 = vmul.u32 18, %v351_v18  ;;  %v375_v7 = vsel %vm374_vm1, 1, %v8319_v17  ;;  %v3394_v34 = vrot.slane %v7379_v33, 2  ;;  %v1401_v44 = vsel %vm7357_vm15, %v1365_v9, %v7287_v24  ;;  %v7395_v62 = vpop.f32.mrf.mxu3 }
 0x232   : > { %v4352_v47 = vadd.f32 %v7184_v36, %v3959_v4  ;;  %v369_v57 = vshrl.u32 %v7333_v50, 16  ;;  %v377_v43 = vadd.s32 %v375_v7, %v373_v41  ;;  %4830 = vst [vmem:[%s7029_s24 + $0xc] sm:$0xf] %v4791_v63  ;;  %v1402_v38 = vsel %vm7373_vm0, %v7362_v5, %v7338_v11 }
 0x233   : > { %v4526_v6 = vpop.f32.mrf.mxu0  ;;  %v7393_v59 = vsub.s32 %v7222_v15, %v352_v27  ;;  %v3779_v36 = vrot.slane %v7322_v53, 2  ;;  %v7399_v39 = vadd.s32 48, %v6997_v49  ;;  %v8340_v24 = vsel %vm7252_vm6, %v7240_v0, %v7204_v28  ;;  %3527 = vmatmul.bf16.gmra.mxu1 %v7209_v37  ;;  %3912 = vmatmul.bf16.gmra.mxu2 %v7219_v61 }
 0x234   : > { %vm7406_vm2 = vcmp.lt.s32.totalorder %v8340_v24, 16  ;;  %v4612_v9 = vadd.f32 %v4523_v48, %v4352_v47  ;;  %v4131_v15 = vsel %vm4015_vm3, %v7244_v23, %v7364_v42  ;;  %v378_v11 = vadd.s32 %v377_v43, %v367_v19 }
 0x235   : > { %v3575_v1 = vadd.f32 %v3488_v22, %v6541_v13  ;;  %vm7417_vm7 = vcmp.lt.s32.totalorder %v1401_v44, 16  ;;  %v8345_v0 = vrot.slane %v7271_v20, 2  ;;  %v4432_v61 = vrot.slane %v7322_v53, 3  ;;  %4315 = vmatmul.bf16.gmra.mxu3 %v4131_v15 }
 0x236   : > { %4565 = vmatmul.bf16.gmra.mxu0 %v7261_v56  ;;  %v7433_v23 = vadd.s32 56, %v6997_v49  ;;  %v4648_v13 = vmax.f32 %v4612_v9, 0.0  ;;  %v379_v56 = vadd.s32 %v378_v11, %v369_v57  ;;  %v388_v48 = vand.u32 65535, %v7399_v39  ;;  %v3873_v55 = vpop.f32.mrf.mxu2 }
 0x237   : > { %v7426_v37 = vsel %vm3370_vm4, %v8345_v0, %v3394_v34  ;;  %v389_v19 = vshrl.u32 %v7399_v39, 16  ;;  %vm1259_vm6 = vcmp.ne.s32.totalorder %v7393_v59, 0  ;;  %vm1295_vm8 = vcmp.lt.s32.totalorder %v7393_v59, 0 }
 0x238   : > { %v8346_v20 = vrot.slane %v7199_v58, 2  ;;  %v4133_v18 = vshrl.u32 %v7430_v10, 16  ;;  %v3960_v25 = vadd.f32 %v3873_v55, %v3575_v1  ;;  %v7448_v21 = vadd.s32 18, %v7393_v59  ;;  %v3490_v41 = vpop.f32.mrf.mxu1  ;;  %vm7478_vm10 = vmand %vm1295_vm8, %vm1259_vm6 }
 0x239   : > { %v380_v4 = vshrl.u32 %v379_v56, 4  ;;  %v4136_v60 = vshll.u32 %v7430_v10, 16  ;;  %v391_v63 = vmul.u32 14564, %v388_v48  ;;  %v392_v22 = vmul.u32 58254, %v388_v48  ;;  %v7464_v15 = vpop.f32.mrf.mxu3 }
 0x23a   : > { %v7444_v5 = vsel %vm3370_vm4, %v8346_v20, %v3779_v36  ;;  %v7451_v27 = vmul.u32 14564, %v389_v19  ;;  %v417_v7 = vand.u32 65535, %v7433_v23  ;;  %v4756_v47 = vsel %vm7406_vm2, %v4648_v13, 0.0 }
 0x23b   : > { %v4353_v44 = vadd.f32 %v7234_v12, %v3960_v25  ;;  %v4528_v57 = vpop.f32.mrf.mxu0  ;;  %v381_v43 = vmul.u32 18, %v380_v4  ;;  %v8347_v24 = vrot.slane %v7199_v58, 3  ;;  %v394_v11 = vmul.u32 58254, %v389_v19  ;;  %v7525_v19 = vld [vmem:[%s6149_s26 + $0x70] sm:$0xff] }
 0x23c   : > { %v395_v1 = vshll.u32 %v392_v22, 16  ;;  %v397_v0 = vshll.u32 %v7451_v27, 16  ;;  %v4135_v56 = vrot.slane %v4133_v18, 2  ;;  %v4138_v12 = vrot.slane %v4136_v60, 3 }
 0x23d   : > { %v7462_v9 = vsel %vm4408_vm5, %v8347_v24, %v4432_v61  ;;  %v4613_v50 = vadd.f32 %v4526_v6, %v4353_v44  ;;  %v7468_v13 = vsub.s32 %v7267_v45, %v381_v43  ;;  %v418_v48 = vshrl.u32 %v7433_v23, 16 }
 0x23e   : > { %v3576_v55 = vadd.f32 %v3490_v41, %v6559_v40  ;;  %vm399_vm9 = vc.u32 %v391_v63, %v395_v1  ;;  %v401_v58 = vadd.s32 %v395_v1, %v391_v63  ;;  %v7472_v20 = vmul.u32 58254, %v417_v7  ;;  %v3875_v6 = vpop.f32.mrf.mxu2 }
 0x23f   : > { %v4649_v25 = vmax.f32 %v4613_v50, 0.0  ;;  %vm1260_vm11 = vcmp.ne.s32.totalorder %v7468_v13, 0  ;;  %vm1296_vm12 = vcmp.lt.s32.totalorder %v7468_v13, 0  ;;  %v7485_v45 = vadd.s32 18, %v7468_v13 }
 0x240   : > { %vm7487_vm13 = vcmp.lt.s32.totalorder %v1402_v38, 16  ;;  %vm7491_vm14 = vmand %vm1296_vm12, %vm1260_vm11  ;;  %v400_v4 = vsel %vm399_vm9, 1, %v8319_v17  ;;  %vm403_vm15 = vc.u32 %v401_v58, %v397_v0  ;;  %v7496_v60 = vor.u32 %v4138_v12, %v4135_v56  ;;  %v3493_v1 = vpop.f32.mrf.mxu1 }
 0x241   : > { %v7498_v41 = vmul.u32 14564, %v418_v48  ;;  %v4757_v63 = vsel %vm7417_vm7, %v4649_v25, 0.0  ;;  %v3961_v38 = vadd.f32 %v3875_v6, %v3576_v55  ;;  %v396_v44 = vshrl.u32 %v392_v22, 16 }
 0x242   : > { %v402_v43 = vadd.s32 %v400_v4, %v394_v11  ;;  %v5795_v24 = vpack.c.bf16 %v4757_v63, %v4756_v47  ;;  %v1403_v50 = vsel %vm7478_vm10, %v7448_v21, %v7393_v59  ;;  %v404_v0 = vsel %vm403_vm15, 1, %v8319_v17  ;;  %v7514_v11 = vpop.f32.mrf.mxu3 }
 0x243   : > { %v420_v56 = vmul.u32 14564, %v417_v7  ;;  %v4354_v12 = vadd.f32 %v7289_v16, %v3961_v38  ;;  %v4531_v58 = vpop.f32.mrf.mxu0  ;;  %v1404_v28 = vsel %vm7491_vm14, %v7485_v45, %v7468_v13  ;;  %v398_v22 = vshrl.u32 %v7451_v27, 16  ;;  %3532 = vmatmul.bf16.gmra.mxu1 %v7301_v14  ;;  %3917 = vmatmul.bf16.gmra.mxu2 %v7319_v51  ;;  %v7540_v38 = vld [vmem:[%s6149_s26 + $0x80] sm:$0xff] }
 0x244   : > { %v406_v47 = vadd.s32 %v404_v0, %v402_v43  ;;  %5880 = vst [vmem:[%s7029_s24 + $0x10] sm:$0xff] %v5795_v24   ;;  %v4140_v59 = vsel %vm4015_vm3, %v7364_v42, %v7496_v60  ;;  %v423_v21 = vmul.u32 58254, %v418_v48  ;;  %v424_v16 = vshll.u32 %v7472_v20, 16 }
 0x245   : > { %v426_v7 = vshll.u32 %v7498_v41, 16  ;;  %v4614_v55 = vadd.f32 %v4528_v57, %v4354_v12  ;;  %v3577_v25 = vadd.f32 %v3493_v1, %v6574_v8  ;;  %v3396_v6 = vrot.slane %v7525_v19, 2  ;;  %4320 = vmatmul.bf16.gmra.mxu3 %v4140_v59 }
 0x246   : > { %v407_v27 = vadd.s32 %v406_v47, %v396_v44  ;;  %4570 = vmatmul.bf16.gmra.mxu0 %v7348_v29  ;;  %vm7529_vm0 = vcmp.lt.s32.totalorder %v1403_v50, 16  ;;  %vm428_vm1 = vc.u32 %v420_v56, %v424_v16  ;;  %v430_v57 = vadd.s32 %v424_v16, %v420_v56  ;;  %v3878_v29 = vpop.f32.mrf.mxu2 }
 0x247   : > { %v3781_v8 = vrot.slane %v7430_v10, 2  ;;  %v7535_v48 = vadd.s32 64, %v6997_v49  ;;  %v4650_v14 = vmax.f32 %v4614_v55, 0.0  ;;  %v425_v4 = vshrl.u32 %v7472_v20, 16 }
 0x248   : > { %v408_v51 = vadd.s32 %v407_v27, %v398_v22  ;;  %v429_v63 = vsel %vm428_vm1, 1, %v8319_v17  ;;  %v427_v44 = vshrl.u32 %v7498_v41, 16  ;;  %vm432_vm2 = vc.u32 %v430_v57, %v426_v7  ;;  %v3495_v56 = vpop.f32.mrf.mxu1 }
 0x249   : > { %v431_v43 = vadd.s32 %v429_v63, %v423_v21  ;;  %v4434_v24 = vrot.slane %v7430_v10, 3  ;;  %v3962_v1 = vadd.f32 %v3878_v29, %v3577_v25  ;;  %v433_v0 = vsel %vm432_vm2, 1, %v8319_v17 }
 0x24a   : > { %v409_v50 = vshrl.u32 %v408_v51, 4  ;;  %v7550_v20 = vsel %vm3370_vm4, %v3394_v34, %v3396_v6  ;;  %v7557_v41 = vsel %vm3370_vm4, %v3779_v36, %v3781_v8  ;;  %v446_v22 = vand.u32 65535, %v7535_v48  ;;  %v7565_v55 = vpop.f32.mrf.mxu3 }
 0x24b   : > { %v435_v12 = vadd.s32 %v433_v0, %v431_v43  ;;  %v447_v47 = vshrl.u32 %v7535_v48, 16  ;;  %v4758_v59 = vsel %vm7487_vm13, %v4650_v14, 0.0  ;;  %v4355_v33 = vadd.f32 %v7340_v30, %v3962_v1  ;;  %v4533_v34 = vpop.f32.mrf.mxu0 }
 0x24c   : > { %v410_v21 = vmul.u32 18, %v409_v50  ;;  %v4142_v16 = vshrl.u32 %v7540_v38, 16  ;;  %v449_v25 = vmul.u32 14564, %v446_v22  ;;  %v450_v27 = vmul.u32 58254, %v446_v22 }
 0x24d   : > { %v436_v7 = vadd.s32 %v435_v12, %v425_v4  ;;  %v7567_v36 = vmul.u32 14564, %v447_v47  ;;  %v4615_v57 = vadd.f32 %v4531_v58, %v4355_v33  ;;  %v3578_v51 = vadd.f32 %v3495_v56, %v6589_v46 }
 0x24e   : > { %v411_v63 = vsub.s32 %v7399_v39, %v410_v21  ;;  %v4145_v40 = vshll.u32 %v7540_v38, 16  ;;  %v452_v30 = vmul.u32 58254, %v447_v47  ;;  %v453_v29 = vshll.u32 %v450_v27, 16  ;;  %v3880_v39 = vpop.f32.mrf.mxu2 }
 0x24f   : > { %v437_v14 = vadd.s32 %v436_v7, %v427_v44  ;;  %v455_v43 = vshll.u32 %v7567_v36, 16  ;;  %v4651_v1 = vmax.f32 %v4615_v57, 0.0  ;;  %vm7578_vm8 = vcmp.lt.s32.totalorder %v1404_v28, 16 }
 0x250   : > { %vm1261_vm7 = vcmp.ne.s32.totalorder %v411_v63, 0  ;;  %vm1297_vm6 = vcmp.lt.s32.totalorder %v411_v63, 0  ;;  %v1369_v4 = vadd.s32 18, %v411_v63  ;;  %vm457_vm10 = vc.u32 %v449_v25, %v453_v29  ;;  %v3498_v28 = vpop.f32.mrf.mxu1 }
 0x251   : > { %vm7582_vm9 = vmand %vm1297_vm6, %vm1261_vm7  ;;  %v438_v44 = vshrl.u32 %v437_v14, 4  ;;  %v459_v50 = vadd.s32 %v453_v29, %v449_v25  ;;  %v4144_v0 = vrot.slane %v4142_v16, 2  ;;  %v4759_v18 = vsel %vm7529_vm0, %v4651_v1, 0.0  ;;  %v8360_v25 = vld [vmem:[#allocation8_spill] sm:$0xff] }
 0x252   : > { %v3963_v56 = vadd.f32 %v3880_v39, %v3578_v51  ;;  %v454_v12 = vshrl.u32 %v450_v27, 16  ;;  %v458_v13 = vsel %vm457_vm10, 1, %v8319_v17  ;;  %v5800_v45 = vpack.c.bf16 %v4759_v18, %v4758_v59  ;;  %v7597_v51 = vpop.f32.mrf.mxu3 }
 0x253   : > { %v439_v22 = vmul.u32 18, %v438_v44  ;;  %v456_v47 = vshrl.u32 %v7567_v36, 16  ;;  %v460_v33 = vadd.s32 %v458_v13, %v452_v30  ;;  %v4536_v7 = vpop.f32.mrf.mxu0  ;;  %v1405_v16 = vsel %vm7582_vm9, %v1369_v4, %v411_v63  ;;  %3537 = vmatmul.bf16.gmra.mxu1 %v7426_v37  ;;  %3922 = vmatmul.bf16.gmra.mxu2 %v7444_v5 }
 0x254   : > { %v4356_v21 = vadd.f32 %v7395_v62, %v3963_v56  ;;  %vm461_vm11 = vc.u32 %v459_v50, %v455_v43  ;;  %v4147_v42 = vrot.slane %v4145_v40, 3  ;;  %5881 = vst [vmem:[%s7029_s24 + $0x18] sm:$0xff] %v5800_v45   ;;  %v3579_v27 = vadd.f32 %v3498_v28, %v8360_v25  ;;  %v7607_v40 = vld [vmem:[%s6149_s26 + $0x78] sm:$0xff] }
 0x255   : > { %v440_v57 = vsub.s32 %v7433_v23, %v439_v22  ;;  %v462_v59 = vsel %vm461_vm11, 1, %v8319_v17  ;;  %v7600_v36 = vadd.s32 72, %v6997_v49  ;;  %v3398_v30 = vrot.slane %v7607_v40, 2 }
 0x256   : > { %v4616_v62 = vadd.f32 %v4533_v34, %v4356_v21  ;;  %v464_v63 = vadd.s32 %v462_v59, %v460_v33  ;;  %v7604_v14 = vor.u32 %v4147_v42, %v4144_v0  ;;  %4575 = vmatmul.bf16.gmra.mxu0 %v7462_v9  ;;  %vm7620_vm15 = vcmp.lt.s32.totalorder %v1405_v16, 16  ;;  %v3883_v9 = vpop.f32.mrf.mxu2  ;;  %v8365_v21 = vld [vmem:[#allocation9_spill] sm:$0xff]  ;;  %v8373_v34 = vld [vmem:[#allocation11_spill] sm:$0xff] }
 0x257   : > { %vm1262_vm12 = vcmp.ne.s32.totalorder %v440_v57, 0  ;;  %vm1298_vm13 = vcmp.lt.s32.totalorder %v440_v57, 0  ;;  %v1370_v23 = vadd.s32 18, %v440_v57  ;;  %v475_v29 = vand.u32 65535, %v7600_v36 }
 0x258   : > { %v4652_v43 = vmax.f32 %v4616_v62, 0.0  ;;  %vm7612_vm14 = vmand %vm1298_vm13, %vm1262_vm12  ;;  %v465_v37 = vadd.s32 %v464_v63, %v454_v12  ;;  %v4149_v5 = vsel %vm4015_vm3, %v7496_v60, %v7604_v14  ;;  %v476_v1 = vshrl.u32 %v7600_v36, 16  ;;  %v3500_v56 = vpop.f32.mrf.mxu1 }
 0x259   : > { %v7629_v39 = vsel %vm4408_vm5, %v4432_v61, %v4434_v24  ;;  %v478_v58 = vmul.u32 14564, %v475_v29  ;;  %v479_v44 = vmul.u32 58254, %v475_v29  ;;  %v3964_v50 = vadd.f32 %v3883_v9, %v3579_v27  ;;  %4325 = vmatmul.bf16.gmra.mxu3 %v4149_v5 }
 0x25a   : > { %v1406_v60 = vsel %vm7612_vm14, %v1370_v23, %v440_v57  ;;  %v466_v0 = vadd.s32 %v465_v37, %v456_v47  ;;  %v3783_v18 = vrot.slane %v7540_v38, 2  ;;  %v480_v12 = vmul.u32 14564, %v476_v1  ;;  %v7645_v27 = vpop.f32.mrf.mxu3  ;;  %v7648_v57 = vld [vmem:[%s6149_s26 + $0x88] sm:$0xff] }
 0x25b   : > { %v481_v13 = vmul.u32 58254, %v476_v1  ;;  %v482_v45 = vshll.u32 %v479_v44, 16  ;;  %v7639_v53 = vsel %vm3370_vm4, %v3396_v6, %v3398_v30  ;;  %v4760_v61 = vsel %vm7578_vm8, %v4652_v43, 0.0  ;;  %v4538_v22 = vpop.f32.mrf.mxu0 }
 0x25c   : > { %v4357_v28 = vadd.f32 %v7464_v15, %v3964_v50  ;;  %v467_v47 = vshrl.u32 %v466_v0, 4  ;;  %v483_v33 = vshrl.u32 %v479_v44, 16  ;;  %v3580_v16 = vadd.f32 %v3500_v56, %v8365_v21 }
 0x25d   : > { %v484_v42 = vshll.u32 %v480_v12, 16  ;;  %vm486_vm0 = vc.u32 %v478_v58, %v482_v45  ;;  %v488_v25 = vadd.s32 %v482_v45, %v478_v58  ;;  %v7656_v15 = vsel %vm3370_vm4, %v3781_v8, %v3783_v18 }
 0x25e   : > { %v4617_v19 = vadd.f32 %v4536_v7, %v4357_v28  ;;  %v468_v6 = vmul.u32 18, %v467_v47  ;;  %v487_v59 = vsel %vm486_vm0, 1, %v8319_v17  ;;  %v4436_v62 = vrot.slane %v7540_v38, 3  ;;  %v3885_v37 = vpop.f32.mrf.mxu2 }
 0x25f   : > { %v489_v46 = vadd.s32 %v487_v59, %v481_v13  ;;  %vm490_vm1 = vc.u32 %v488_v25, %v484_v42  ;;  %v7660_v63 = vadd.s32 80, %v6997_v49  ;;  %v485_v29 = vshrl.u32 %v480_v12, 16  ;;  %v8370_v25 = vld [vmem:[#allocation10_spill] sm:$0xff] }
 0x260   : > { %v4653_v23 = vmax.f32 %v4617_v19, 0.0  ;;  %v469_v7 = vsub.s32 %v7535_v48, %v468_v6  ;;  %v491_v43 = vsel %vm490_vm1, 1, %v8319_v17  ;;  %vm7664_vm2 = vcmp.lt.s32.totalorder %v1406_v60, 16  ;;  %v3503_v50 = vpop.f32.mrf.mxu1 }
 0x261   : > { %v493_v8 = vadd.s32 %v491_v43, %v489_v46  ;;  %v504_v5 = vand.u32 65535, %v7660_v63  ;;  %v505_v1 = vshrl.u32 %v7660_v63, 16  ;;  %v4151_v9 = vshrl.u32 %v7648_v57, 16 }
 0x262   : > { %v4761_v58 = vsel %vm7620_vm15, %v4653_v23, 0.0  ;;  %v3965_v48 = vadd.f32 %v3885_v37, %v3580_v16  ;;  %vm1263_vm7 = vcmp.ne.s32.totalorder %v469_v7, 0  ;;  %vm1299_vm6 = vcmp.lt.s32.totalorder %v469_v7, 0  ;;  %v7688_v16 = vpop.f32.mrf.mxu3 }
 0x263   : > { %v5805_v44 = vpack.c.bf16 %v4761_v58, %v4760_v61  ;;  %vm7673_vm8 = vmand %vm1299_vm6, %vm1263_vm7  ;;  %v1371_v0 = vadd.s32 18, %v469_v7  ;;  %v494_v56 = vadd.s32 %v493_v8, %v483_v33  ;;  %v7682_v12 = vsel %vm4408_vm5, %v4434_v24, %v4436_v62  ;;  %v4541_v13 = vpop.f32.mrf.mxu0  ;;  %3542 = vmatmul.bf16.gmra.mxu1 %v7550_v20  ;;  %3927 = vmatmul.bf16.gmra.mxu2 %v7557_v41 }
 0x264   : > { %v4358_v4 = vadd.f32 %v7514_v11, %v3965_v48  ;;  %v507_v45 = vmul.u32 14564, %v504_v5  ;;  %v508_v28 = vmul.u32 58254, %v504_v5  ;;  %v509_v61 = vmul.u32 14564, %v505_v1 }
 0x265   : > { %5882 = vst [vmem:[%s7029_s24 + $0x20] sm:$0xff] %v5805_v44   ;;  %v1407_v47 = vsel %vm7673_vm8, %v1371_v0, %v469_v7  ;;  %v495_v21 = vadd.s32 %v494_v56, %v485_v29  ;;  %v4153_v33 = vrot.slane %v4151_v9, 2  ;;  %v4154_v42 = vshll.u32 %v7648_v57, 16  ;;  %v7706_v9 = vld [vmem:[%s6149_s26 + $0x80] sm:$0xff] }
 0x266   : > { %v4618_v10 = vadd.f32 %v4538_v22, %v4358_v4  ;;  %v3581_v24 = vadd.f32 %v3503_v50, %v8370_v25  ;;  %v510_v11 = vmul.u32 58254, %v505_v1  ;;  %v511_v19 = vshll.u32 %v508_v28, 16  ;;  %4580 = vmatmul.bf16.gmra.mxu0 %v7629_v39  ;;  %v3888_v41 = vpop.f32.mrf.mxu2 }
 0x267   : > { %vm7695_vm9 = vcmp.lt.s32.totalorder %v1407_v47, 16  ;;  %v496_v59 = vshrl.u32 %v495_v21, 4  ;;  %v512_v46 = vshrl.u32 %v508_v28, 16  ;;  %v513_v23 = vshll.u32 %v509_v61, 16 }
 0x268   : > { %v4156_v7 = vrot.slane %v4154_v42, 3  ;;  %v4654_v22 = vmax.f32 %v4618_v10, 0.0  ;;  %vm515_vm10 = vc.u32 %v507_v45, %v511_v19  ;;  %v517_v29 = vadd.s32 %v511_v19, %v507_v45  ;;  %v3505_v48 = vpop.f32.mrf.mxu1 }
 0x269   : > { %v7700_v20 = vadd.s32 88, %v6997_v49  ;;  %v497_v43 = vmul.u32 18, %v496_v59  ;;  %v514_v37 = vshrl.u32 %v509_v61, 16  ;;  %v516_v39 = vsel %vm515_vm10, 1, %v8319_v17 }
 0x26a   : > { %v7703_v8 = vor.u32 %v4156_v7, %v4153_v33  ;;  %v3966_v5 = vadd.f32 %v3888_v41, %v3581_v24  ;;  %v518_v1 = vadd.s32 %v516_v39, %v510_v11  ;;  %vm519_vm11 = vc.u32 %v517_v29, %v513_v23  ;;  %v7719_v21 = vpop.f32.mrf.mxu3 }
 0x26b   : > { %v3400_v58 = vrot.slane %v7706_v9, 2  ;;  %v498_v44 = vsub.s32 %v7600_v36, %v497_v43  ;;  %v520_v50 = vsel %vm519_vm11, 1, %v8319_v17  ;;  %v533_v0 = vand.u32 65535, %v7700_v20  ;;  %v4543_v45 = vpop.f32.mrf.mxu0 }
 0x26c   : > { %v4158_v60 = vsel %vm4015_vm3, %v7604_v14, %v7703_v8  ;;  %v4762_v56 = vsel %vm7664_vm2, %v4654_v22, 0.0  ;;  %v4359_v4 = vadd.f32 %v7565_v55, %v3966_v5  ;;  %v522_v28 = vadd.s32 %v520_v50, %v518_v1 }
 0x26d   : > { %4330 = vmatmul.bf16.gmra.mxu3 %v4158_v60  ;;  %v534_v61 = vshrl.u32 %v7700_v20, 16  ;;  %vm1264_vm12 = vcmp.ne.s32.totalorder %v498_v44, 0  ;;  %vm1300_vm13 = vcmp.lt.s32.totalorder %v498_v44, 0  ;;  %v1372_v36 = vadd.s32 18, %v498_v44 }
 0x26e   : > { %v536_v47 = vmul.u32 14564, %v533_v0  ;;  %v4619_v33 = vadd.f32 %v4541_v13, %v4359_v4  ;;  %vm1336_vm14 = vmand %vm1300_vm13, %vm1264_vm12  ;;  %v523_v14 = vadd.s32 %v522_v28, %v512_v46  ;;  %v537_v42 = vmul.u32 58254, %v533_v0  ;;  %v3890_v7 = vpop.f32.mrf.mxu2 }
 0x26f   : > { %v7721_v10 = vmul.u32 14564, %v534_v61  ;;  %v3582_v25 = vadd.f32 %v3505_v48, %v8373_v34  ;;  %v1408_v55 = vsel %vm1336_vm14, %v1372_v36, %v498_v44  ;;  %v539_v24 = vmul.u32 58254, %v534_v61 }
 0x270   : > { %v7729_v11 = vsel %vm3370_vm4, %v3398_v30, %v3400_v58  ;;  %v4655_v19 = vmax.f32 %v4619_v33, 0.0  ;;  %v524_v59 = vadd.s32 %v523_v14, %v514_v37  ;;  %v540_v13 = vshll.u32 %v537_v42, 16  ;;  %v7741_v37 = vld [vmem:[%s6149_s26 + $0x90] sm:$0xff]  ;;  %v3508_v5 = vpop.f32.mrf.mxu1 }
 0x271   : > { %v3785_v46 = vrot.slane %v7648_v57, 2  ;;  %vm7732_vm15 = vcmp.lt.s32.totalorder %v1408_v55, 16  ;;  %v541_v22 = vshrl.u32 %v537_v42, 16  ;;  %v542_v29 = vshll.u32 %v7721_v10, 16 }
 0x272   : > { %v543_v41 = vshrl.u32 %v7721_v10, 16  ;;  %v4763_v40 = vsel %vm7695_vm9, %v4655_v19, 0.0  ;;  %v3967_v30 = vadd.f32 %v3890_v7, %v3582_v25  ;;  %v525_v43 = vshrl.u32 %v524_v59, 4  ;;  %v7769_v33 = vpop.f32.mrf.mxu3 }
 0x273   : > { %vm544_vm0 = vc.u32 %v536_v47, %v540_v13  ;;  %v5810_v39 = vpack.c.bf16 %v4763_v40, %v4762_v56  ;;  %v546_v48 = vadd.s32 %v540_v13, %v536_v47  ;;  %v4438_v44 = vrot.slane %v7648_v57, 3  ;;  %v4546_v60 = vpop.f32.mrf.mxu0  ;;  %v8376_v56 = vld [vmem:[#allocation12_spill] sm:$0xff]  ;;  %3547 = vmatmul.bf16.gmra.mxu1 %v7639_v53  ;;  %3932 = vmatmul.bf16.gmra.mxu2 %v7656_v15 }
 0x274   : > { %v545_v1 = vsel %vm544_vm0, 1, %v8319_v17  ;;  %v4360_v50 = vadd.f32 %v7597_v51, %v3967_v30  ;;  %v526_v0 = vmul.u32 18, %v525_v43  ;;  %v7751_v6 = vsel %vm3370_vm4, %v3783_v18, %v3785_v46  ;;  %v8379_v43 = vld [vmem:[#allocation13_spill] sm:$0xff] }
 0x275   : > { %v547_v4 = vadd.s32 %v545_v1, %v539_v24  ;;  %5883 = vst [vmem:[%s7029_s24 + $0x28] sm:$0xff] %v5810_v39   ;;  %v3583_v28 = vadd.f32 %v3508_v5, %v8376_v56  ;;  %vm548_vm1 = vc.u32 %v546_v48, %v542_v29  ;;  %v7760_v51 = vsel %vm4408_vm5, %v4436_v62, %v4438_v44 }
 0x276   : > { %v7763_v61 = vadd.s32 96, %v6997_v49  ;;  %v4620_v36 = vadd.f32 %v4543_v45, %v4360_v50  ;;  %v527_v18 = vsub.s32 %v7660_v63, %v526_v0  ;;  %v549_v47 = vsel %vm548_vm1, 1, %v8319_v17  ;;  %4585 = vmatmul.bf16.gmra.mxu0 %v7682_v12  ;;  %v3893_v63 = vpop.f32.mrf.mxu2 }
 0x277   : > { %v4160_v14 = vshrl.u32 %v7741_v37, 16  ;;  %v551_v38 = vadd.s32 %v549_v47, %v547_v4  ;;  %v4163_v45 = vshll.u32 %v7741_v37, 16  ;;  %v3968_v19 = vadd.f32 %v3893_v63, %v3583_v28 }
 0x278   : > { %v562_v62 = vand.u32 65535, %v7763_v61  ;;  %v563_v42 = vshrl.u32 %v7763_v61, 16  ;;  %v4656_v53 = vmax.f32 %v4620_v36, 0.0  ;;  %vm1265_vm2 = vcmp.ne.s32.totalorder %v527_v18, 0  ;;  %v3510_v7 = vpop.f32.mrf.mxu1 }
 0x279   : > { %vm1301_vm7 = vcmp.lt.s32.totalorder %v527_v18, 0  ;;  %v1373_v15 = vadd.s32 18, %v527_v18  ;;  %v552_v10 = vadd.s32 %v551_v38, %v541_v22  ;;  %v4162_v59 = vrot.slane %v4160_v14, 2 }
 0x27a   : > { %vm1337_vm6 = vmand %vm1301_vm7, %vm1265_vm2  ;;  %v565_v34 = vmul.u32 14564, %v562_v62  ;;  %v566_v25 = vmul.u32 58254, %v562_v62  ;;  %v7776_v55 = vmul.u32 14564, %v563_v42  ;;  %v4764_v12 = vsel %vm7732_vm15, %v4656_v53, 0.0 }
 0x27b   : > { %v1409_v24 = vsel %vm1337_vm6, %v1373_v15, %v527_v18  ;;  %v553_v29 = vadd.s32 %v552_v10, %v543_v41  ;;  %v568_v40 = vmul.u32 58254, %v563_v42  ;;  %v4361_v22 = vadd.f32 %v7645_v27, %v3968_v19  ;;  %v4548_v5 = vpop.f32.mrf.mxu0  ;;  %v7792_v41 = vld [vmem:[%s6149_s26 + $0x88] sm:$0xff]  ;;  %v7800_v42 = vpop.f32.mrf.mxu3 }
 0x27c   : > { %vm7780_vm8 = vcmp.lt.s32.totalorder %v1409_v24, 16  ;;  %v569_v30 = vshll.u32 %v566_v25, 16  ;;  %v3584_v39 = vadd.f32 %v3510_v7, %v8379_v43  ;;  %v570_v1 = vshrl.u32 %v566_v25, 16 }
 0x27d   : > { %v571_v23 = vshll.u32 %v7776_v55, 16  ;;  %v554_v48 = vshrl.u32 %v553_v29, 4  ;;  %v4165_v0 = vrot.slane %v4163_v45, 3  ;;  %v4621_v4 = vadd.f32 %v4546_v60, %v4361_v22  ;;  %v8382_v22 = vld [vmem:[#allocation14_spill] sm:$0xff] }
 0x27e   : > { %vm573_vm9 = vc.u32 %v565_v34, %v569_v30  ;;  %v575_v50 = vadd.s32 %v569_v30, %v565_v34  ;;  %v7789_v28 = vadd.s32 104, %v6997_v49  ;;  %v3402_v27 = vrot.slane %v7792_v41, 2  ;;  %v3895_v53 = vpop.f32.mrf.mxu2 }
 0x27f   : > { %v574_v56 = vsel %vm573_vm9, 1, %v8319_v17  ;;  %v555_v36 = vmul.u32 18, %v554_v48  ;;  %v7795_v47 = vor.u32 %v4165_v0, %v4162_v59  ;;  %v4657_v14 = vmax.f32 %v4621_v4, 0.0 }
 0x280   : > { %v576_v18 = vadd.s32 %v574_v56, %v568_v40  ;;  %vm577_vm10 = vc.u32 %v575_v50, %v571_v23  ;;  %v591_v62 = vand.u32 65535, %v7789_v28  ;;  %v592_v60 = vshrl.u32 %v7789_v28, 16  ;;  %v3513_v7 = vpop.f32.mrf.mxu1 }
 0x281   : > { %v578_v38 = vsel %vm577_vm10, 1, %v8319_v17  ;;  %v556_v45 = vsub.s32 %v7700_v20, %v555_v36  ;;  %v572_v15 = vshrl.u32 %v7776_v55, 16  ;;  %v4167_v10 = vsel %vm4015_vm3, %v7703_v8, %v7795_v47 }
 0x282   : > { %v580_v63 = vadd.s32 %v578_v38, %v576_v18  ;;  %v4765_v34 = vsel %vm7780_vm8, %v4657_v14, 0.0  ;;  %v3969_v25 = vadd.f32 %v3895_v53, %v3584_v39  ;;  %4335 = vmatmul.bf16.gmra.mxu3 %v4167_v10  ;;  %v594_v24 = vmul.u32 14564, %v591_v62 }
 0x283   : > { %v595_v19 = vmul.u32 58254, %v591_v62  ;;  %v5815_v59 = vpack.c.bf16 %v4765_v34, %v4764_v12  ;;  %vm1266_vm11 = vcmp.ne.s32.totalorder %v556_v45, 0  ;;  %vm1302_vm12 = vcmp.lt.s32.totalorder %v556_v45, 0  ;;  %v4551_v8 = vpop.f32.mrf.mxu0  ;;  %3552 = vmatmul.bf16.gmra.mxu1 %v7729_v11  ;;  %3937 = vmatmul.bf16.gmra.mxu2 %v7751_v6 }
 0x284   : > { %v1374_v20 = vadd.s32 18, %v556_v45  ;;  %vm7809_vm13 = vmand %vm1302_vm12, %vm1266_vm11  ;;  %v4362_v29 = vadd.f32 %v7688_v16, %v3969_v25  ;;  %v581_v40 = vadd.s32 %v580_v63, %v570_v1  ;;  %v596_v13 = vmul.u32 14564, %v592_v60  ;;  %v7851_v25 = vld [vmem:[%s6149_s26 + $0x98] sm:$0xff] }
 0x285   : > { %v7819_v30 = vsel %vm3370_vm4, %v3400_v58, %v3402_v27  ;;  %5884 = vst [vmem:[%s7029_s24 + $0x30] sm:$0xff] %v5815_v59   ;;  %v3585_v43 = vadd.f32 %v3513_v7, %v8382_v22  ;;  %v597_v39 = vmul.u32 58254, %v592_v60  ;;  %v598_v23 = vshll.u32 %v595_v19, 16  ;;  %v8385_v59 = vld [vmem:[#allocation15_spill] sm:$0xff] }
 0x286   : > { %v1410_v12 = vsel %vm7809_vm13, %v1374_v20, %v556_v45  ;;  %v4622_v48 = vadd.f32 %v4548_v5, %v4362_v29  ;;  %v582_v16 = vadd.s32 %v581_v40, %v572_v15  ;;  %v599_v1 = vshrl.u32 %v595_v19, 16  ;;  %4590 = vmatmul.bf16.gmra.mxu0 %v7760_v51  ;;  %v3898_v6 = vpop.f32.mrf.mxu2  ;;  %v7844_v45 = vpop.f32.mrf.mxu3 }
 0x287   : > { %v600_v50 = vshll.u32 %v596_v13, 16  ;;  %vm7827_vm14 = vcmp.lt.s32.totalorder %v1410_v12, 16  ;;  %vm602_vm15 = vc.u32 %v594_v24, %v598_v23  ;;  %v604_v58 = vadd.s32 %v598_v23, %v594_v24 }
 0x288   : > { %v3787_v0 = vrot.slane %v7741_v37, 2  ;;  %v4658_v4 = vmax.f32 %v4622_v48, 0.0  ;;  %v583_v56 = vshrl.u32 %v582_v16, 4  ;;  %v603_v5 = vsel %vm602_vm15, 1, %v8319_v17  ;;  %v3515_v15 = vpop.f32.mrf.mxu1 }
 0x289   : > { %v4440_v11 = vrot.slane %v7741_v37, 3  ;;  %v601_v36 = vshrl.u32 %v596_v13, 16  ;;  %v605_v18 = vadd.s32 %v603_v5, %v597_v39  ;;  %vm606_vm0 = vc.u32 %v604_v58, %v600_v50 }
 0x28a   : > { %v7836_v14 = vadd.s32 112, %v6997_v49  ;;  %v584_v38 = vmul.u32 18, %v583_v56  ;;  %v3970_v51 = vadd.f32 %v3898_v6, %v3585_v43  ;;  %v607_v62 = vsel %vm606_vm0, 1, %v8319_v17 }
 0x28b   : > { %v3788_v60 = vsel %vm3370_vm4, %v3785_v46, %v3787_v0  ;;  %v4766_v53 = vsel %vm7827_vm14, %v4658_v4, 0.0  ;;  %v609_v63 = vadd.s32 %v607_v62, %v605_v18  ;;  %v3586_v20 = vadd.f32 %v3515_v15, %v8385_v59  ;;  %v4553_v46 = vpop.f32.mrf.mxu0 }
 0x28c   : > { %v620_v10 = vand.u32 65535, %v7836_v14  ;;  %v621_v34 = vshrl.u32 %v7836_v14, 16  ;;  %v585_v24 = vsub.s32 %v7763_v61, %v584_v38  ;;  %v4363_v19 = vadd.f32 %v7719_v21, %v3970_v51 }
 0x28d   : > { %v4441_v7 = vsel %vm4408_vm5, %v4438_v44, %v4440_v11  ;;  %v610_v55 = vadd.s32 %v609_v63, %v599_v1  ;;  %v4169_v39 = vshrl.u32 %v7851_v25, 16  ;;  %v4172_v15 = vshll.u32 %v7851_v25, 16 }
 0x28e   : > { %v623_v29 = vmul.u32 14564, %v620_v10  ;;  %v624_v40 = vmul.u32 58254, %v620_v10  ;;  %v625_v13 = vmul.u32 14564, %v621_v34  ;;  %vm1267_vm1 = vcmp.ne.s32.totalorder %v585_v24, 0  ;;  %v3900_v1 = vpop.f32.mrf.mxu2  ;;  %v7866_v63 = vpop.f32.mrf.mxu3 }
 0x28f   : > { %vm1303_vm2 = vcmp.lt.s32.totalorder %v585_v24, 0  ;;  %v1375_v12 = vadd.s32 18, %v585_v24  ;;  %v4623_v22 = vadd.f32 %v4551_v8, %v4363_v19  ;;  %v611_v61 = vadd.s32 %v610_v55, %v601_v36 }
 0x290   : > { %vm1339_vm7 = vmand %vm1303_vm2, %vm1267_vm1  ;;  %v626_v21 = vmul.u32 58254, %v621_v34  ;;  %v627_v43 = vshll.u32 %v624_v40, 16  ;;  %v628_v16 = vshrl.u32 %v624_v40, 16  ;;  %v629_v57 = vshll.u32 %v625_v13, 16  ;;  %v3518_v6 = vpop.f32.mrf.mxu1 }
 0x291   : > { %v1411_v23 = vsel %vm1339_vm7, %v1375_v12, %v585_v24  ;;  %v4659_v48 = vmax.f32 %v4623_v22, 0.0  ;;  %v612_v44 = vshrl.u32 %v611_v61, 4  ;;  %v3971_v58 = vadd.f32 %v3900_v1, %v3586_v20  ;;  %v7874_v24 = vld [vmem:[%s6149_s26 + $0x90] sm:$0xff] }
 0x292   : > { %vm1447_vm6 = vcmp.lt.s32.totalorder %v1411_v23, 16  ;;  %vm631_vm8 = vc.u32 %v623_v29, %v627_v43  ;;  %v633_v50 = vadd.s32 %v627_v43, %v623_v29  ;;  %v630_v4 = vshrl.u32 %v625_v13, 16 }
 0x293   : > { %v4767_v9 = vsel %vm1447_vm6, %v4659_v48, 0.0  ;;  %v632_v8 = vsel %vm631_vm8, 1, %v8319_v17  ;;  %v613_v5 = vmul.u32 18, %v612_v44  ;;  %v4364_v18 = vadd.f32 %v7769_v33, %v3971_v58  ;;  %v4556_v38 = vpop.f32.mrf.mxu0  ;;  %3557 = vmatmul.bf16.gmra.mxu1 %v7819_v30  ;;  %3942 = vmatmul.bf16.gmra.mxu2 %v3788_v60 }
 0x294   : > { %v5820_v56 = vpack.c.bf16 %v4767_v9, %v4766_v53  ;;  %v634_v36 = vadd.s32 %v632_v8, %v626_v21  ;;  %vm635_vm9 = vc.u32 %v633_v50, %v629_v57  ;;  %v4171_v62 = vrot.slane %v4169_v39, 2 }
 0x295   : > { %v636_v51 = vsel %vm635_vm9, 1, %v8319_v17  ;;  %v614_v10 = vsub.s32 %v7789_v28, %v613_v5  ;;  %v7871_v53 = vadd.s32 120, %v6997_v49  ;;  %v3404_v19 = vrot.slane %v7874_v24, 2 }
 0x296   : > { %5885 = vst [vmem:[%s7029_s24 + $0x38] sm:$0xff] %v5820_v56   ;;  %v638_v34 = vadd.s32 %v636_v51, %v634_v36  ;;  %v4624_v33 = vadd.f32 %v4553_v46, %v4364_v18  ;;  %v3587_v59 = vadd.f32 %v3518_v6, %v6774_v26  ;;  %v4174_v20 = vrot.slane %v4172_v15, 3  ;;  %4595 = vmatmul.bf16.gmra.mxu0 %v4441_v7  ;;  %v3903_v30 = vpop.f32.mrf.mxu2 }
 0x297   : > { %v3789_v55 = vrot.slane %v7851_v25, 2  ;;  %vm1268_vm10 = vcmp.ne.s32.totalorder %v614_v10, 0  ;;  %vm1304_vm11 = vcmp.lt.s32.totalorder %v614_v10, 0  ;;  %v1376_v28 = vadd.s32 18, %v614_v10 }
 0x298   : > { %v639_v29 = vadd.s32 %v638_v34, %v628_v16  ;;  %vm1340_vm12 = vmand %vm1304_vm11, %vm1268_vm10  ;;  %v4660_v40 = vmax.f32 %v4624_v33, 0.0  ;;  %v7880_v13 = vor.u32 %v4174_v20, %v4171_v62  ;;  %v649_v12 = vand.u32 65535, %v7871_v53  ;;  %v3520_v23 = vpop.f32.mrf.mxu1 }
 0x299   : > { %v650_v46 = vshrl.u32 %v7871_v53, 16  ;;  %v1412_v26 = vsel %vm1340_vm12, %v1376_v28, %v614_v10  ;;  %v3405_v60 = vsel %vm3370_vm4, %v3402_v27, %v3404_v19  ;;  %v4442_v7 = vrot.slane %v7851_v25, 3 }
 0x29a   : > { %v640_v22 = vadd.s32 %v639_v29, %v630_v4  ;;  %vm1448_vm13 = vcmp.lt.s32.totalorder %v1412_v26, 16  ;;  %v3972_v61 = vadd.f32 %v3903_v30, %v3587_v59  ;;  %v4176_v21 = vsel %vm4015_vm3, %v7795_v47, %v7880_v13  ;;  %v3994_v47 = vld [vmem:[%s6149_s26 + $0xa0] sm:$0x7] }
 0x29b   : > { %v3790_v43 = vsel %vm3370_vm4, %v3787_v0, %v3789_v55  ;;  %4340 = vmatmul.bf16.gmra.mxu3 %v4176_v21  ;;  %v652_v41 = vmul.u32 14564, %v649_v12  ;;  %v653_v27 = vmul.u32 58254, %v649_v12  ;;  %v654_v48 = vmul.u32 14564, %v650_v46  ;;  %v4558_v1 = vpop.f32.mrf.mxu0 }
 0x29c   : > { %v641_v39 = vshrl.u32 %v640_v22, 4  ;;  %v4768_v16 = vsel %vm1448_vm13, %v4660_v40, 0.0  ;;  %v4365_v57 = vadd.f32 %v7800_v42, %v3972_v61  ;;  %v3588_v44 = vadd.f32 %v3520_v23, %v6791_v3  ;;  %v7909_v42 = vpop.f32.mrf.mxu3 }
 0x29d   : > { %v655_v50 = vmul.u32 58254, %v650_v46  ;;  %v656_v58 = vshll.u32 %v653_v27, 16  ;;  %v657_v4 = vshrl.u32 %v653_v27, 16  ;;  %v4443_v0 = vsel %vm4408_vm5, %v4440_v11, %v4442_v7 }
 0x29e   : > { %v642_v9 = vmul.u32 18, %v641_v39  ;;  %v4625_v8 = vadd.f32 %v4556_v38, %v4365_v57  ;;  %v658_v56 = vshll.u32 %v654_v48, 16  ;;  %v659_v5 = vshrl.u32 %v654_v48, 16  ;;  %v3905_v10 = vpop.f32.mrf.mxu2 }
 0x29f   : > { %v7907_v6 = vadd.s32 128, %v6997_v49  ;;  %vm660_vm14 = vc.u32 %v652_v41, %v656_v58  ;;  %v662_v36 = vadd.s32 %v656_v58, %v652_v41  ;;  %v4013_v18 = vunpack.c.l.b16 %v3994_v47 }
 0x2a0   : > { %v643_v3 = vsub.s32 %v7836_v14, %v642_v9  ;;  %v4661_v51 = vmax.f32 %v4625_v8, 0.0  ;;  %v661_v62 = vsel %vm660_vm14, 1, %v8319_v17  ;;  %v3973_v34 = vadd.f32 %v3905_v10, %v3588_v44  ;;  %v3523_v28 = vpop.f32.mrf.mxu1 }
 0x2a1   : > { %v678_v37 = vand.u32 65535, %v7907_v6  ;;  %v679_v11 = vshrl.u32 %v7907_v6, 16  ;;  %v663_v15 = vadd.s32 %v661_v62, %v655_v50  ;;  %vm664_vm2 = vc.u32 %v662_v36, %v658_v56 }
 0x2a2   : > { %vm1269_vm15 = vcmp.ne.s32.totalorder %v643_v3, 0  ;;  %vm1305_vm0 = vcmp.lt.s32.totalorder %v643_v3, 0  ;;  %v1377_v38 = vadd.s32 18, %v643_v3  ;;  %v7916_v14 = vadd.s32 136, %v6997_v49 }
 0x2a3   : > { %vm1341_vm1 = vmand %vm1305_vm0, %vm1269_vm15  ;;  %v682_v33 = vmul.u32 58254, %v678_v37  ;;  %v665_v20 = vsel %vm664_vm2, 1, %v8319_v17  ;;  %v681_v29 = vmul.u32 14564, %v678_v37  ;;  %v683_v40 = vmul.u32 14564, %v679_v11  ;;  %v4561_v26 = vpop.f32.mrf.mxu0  ;;  %3562 = vmatmul.bf16.gmra.mxu1 %v3405_v60  ;;  %3947 = vmatmul.bf16.gmra.mxu2 %v3790_v43 }
 0x2a4   : > { %v1413_v59 = vsel %vm1341_vm1, %v1377_v38, %v643_v3  ;;  %v667_v12 = vadd.s32 %v665_v20, %v663_v15  ;;  %v4366_v46 = vadd.f32 %v7844_v45, %v3973_v34  ;;  %v684_v22 = vmul.u32 58254, %v679_v11  ;;  %v7929_v9 = vpop.f32.mrf.mxu3 }
 0x2a5   : > { %vm1449_vm7 = vcmp.lt.s32.totalorder %v1413_v59, 16  ;;  %v3589_v61 = vadd.f32 %v3523_v28, %v6807_v31  ;;  %v685_v21 = vshll.u32 %v682_v33, 16  ;;  %v687_v39 = vshll.u32 %v683_v40, 16 }
 0x2a6   : > { %v4769_v30 = vsel %vm1449_vm7, %v4661_v51, 0.0  ;;  %v668_v41 = vadd.s32 %v667_v12, %v657_v4  ;;  %v7921_v27 = vadd.f32 %v4558_v1, %v4366_v46  ;;  %v686_v48 = vshrl.u32 %v682_v33, 16  ;;  %4600 = vmatmul.bf16.gmra.mxu0 %v4443_v0  ;;  %v3908_v60 = vpop.f32.mrf.mxu2 }
 0x2a7   : > { %v5825_v23 = vpack.c.bf16 %v4769_v30, %v4768_v16  ;;  %vm689_vm6 = vc.u32 %v681_v29, %v685_v21  ;;  %v691_v57 = vadd.s32 %v685_v21, %v681_v29  ;;  %v7923_v44 = vpack.c.b16 %v4013_v18, %v4013_v18 }
 0x2a8   : > { %v707_v45 = vand.u32 65535, %v7916_v14  ;;  %v669_v50 = vadd.s32 %v668_v41, %v659_v5  ;;  %v688_v47 = vshrl.u32 %v683_v40, 16  ;;  %v690_v31 = vsel %vm689_vm6, 1, %v8319_v17  ;;  %v3525_v3 = vpop.f32.mrf.mxu1 }
 0x2a9   : > { %5886 = vst [vmem:[%s7029_s24 + $0x40] sm:$0xff] %v5825_v23   ;;  %v708_v16 = vshrl.u32 %v7916_v14, 16  ;;  %v692_v1 = vadd.s32 %v690_v31, %v684_v22  ;;  %vm693_vm8 = vc.u32 %v691_v57, %v687_v39  ;;  %v4178_v43 = vshrl.u32 %v7923_v44, 16 }
 0x2aa   : > { %v4181_v58 = vshll.u32 %v7923_v44, 16  ;;  %v670_v4 = vshrl.u32 %v669_v50, 4  ;;  %v694_v0 = vsel %vm693_vm8, 1, %v8319_v17  ;;  %v3974_v8 = vadd.f32 %v3908_v60, %v3589_v61 }
 0x2ab   : > { %v710_v56 = vmul.u32 14564, %v707_v45  ;;  %v696_v5 = vadd.s32 %v694_v0, %v692_v1  ;;  %v4180_v36 = vrot.slane %v4178_v43, 2  ;;  %v711_v51 = vmul.u32 58254, %v707_v45  ;;  %v4563_v11 = vpop.f32.mrf.mxu0 }
 0x2ac   : > { %v4183_v18 = vrot.slane %v4181_v58, 3  ;;  %v671_v62 = vmul.u32 18, %v670_v4  ;;  %v4367_v37 = vadd.f32 %v7866_v63, %v3974_v8  ;;  %v712_v38 = vmul.u32 14564, %v708_v16  ;;  %v3645_v63 = vld [vmem:[%s6149_s26 + $0xa0] sm:$0x3]  ;;  %s5923_s26 = smul.u32 168, %s6093_s16 }
 0x2ad   : > { %v4662_v15 = vmax.f32 %v7921_v27, 0.0  ;;  %v697_v10 = vadd.s32 %v696_v5, %v686_v48  ;;  %v714_v33 = vshll.u32 %v711_v51, 16  ;;  %v3590_v28 = vadd.f32 %v3525_v3, %v6820_v2  ;;  %v7945_v27 = vpop.f32.mrf.mxu3  ;;  %s4882_s16 = sshll.u32 %s7029_s24, 4  ;;  %s4883_s16 = int_to_ptr.vmem [resolvable:$true] %s4882_s16 }
 0x2ae   : > { %v4184_v34 = vor.u32 %v4183_v18, %v4180_v36  ;;  %v672_v59 = vsub.s32 %v7871_v53, %v671_v62  ;;  %v7937_v20 = vadd.f32 %v4561_v26, %v4367_v37  ;;  %v713_v29 = vmul.u32 58254, %v708_v16  ;;  %v3910_v21 = vpop.f32.mrf.mxu2  ;;  %s4881_s28 = scalar_lea.hbm %s8262_s3, %s5923_s26 }
 0x2af   : > { %v698_v40 = vadd.s32 %v697_v10, %v688_v47  ;;  %v716_v46 = vshll.u32 %v712_v38, 16  ;;  %vm718_vm9 = vc.u32 %v710_v56, %v714_v33  ;;  %v715_v30 = vshrl.u32 %v711_v51, 16  ;;  %s4884_s29 = sshll.u32 %s4881_s28, 4  ;;  %s4885_s29 = int_to_ptr.hbm [resolvable:$true] %s4884_s29 }
 0x2b0   : > { %v4185_v12 = vsel %vm4015_vm3, %v7880_v13, %v4184_v34  ;;  %vm1270_vm10 = vcmp.ne.s32.totalorder %v672_v59, 0  ;;  %vm1306_vm11 = vcmp.lt.s32.totalorder %v672_v59, 0  ;;  %v1378_v22 = vadd.s32 18, %v672_v59  ;;  %v3528_v57 = vpop.f32.mrf.mxu1  ;;  %s5999_s4 = sshra.s32 %s4885_s29, 4  ;;  %s6000_s4 = int_to_ptr.hbm [resolvable:$true] %s5999_s4 }
 0x2b1   : > { %4345 = vmatmul.bf16.gmra.mxu3 %v4185_v12  ;;  %vm1342_vm12 = vmand %vm1306_vm11, %vm1270_vm10  ;;  %v699_v61 = vshrl.u32 %v698_v40, 4  ;;  %v719_v53 = vsel %vm718_vm9, 1, %v8319_v17  ;;  %v720_v26 = vadd.s32 %v714_v33, %v710_v56  ;;  %v3406_v2 = vrot.slane %v6787_v35, 2  ;;  %s6001_s5 = scalar_lea.hbm %s6000_s4, 168  ;;  %p6006_p0 = scmp.lt.s32.totalorder %s6000_s4, %s8262_s3 }
 0x2b2   : > { %v1414_v39 = vsel %vm1342_vm12, %v1378_v22, %v672_v59  ;;  %v721_v23 = vadd.s32 %v719_v53, %v713_v29  ;;  %v3975_v41 = vadd.f32 %v3910_v21, %v3590_v28  ;;  %v3736_v13 = vunpack.c.l.b16 %v3645_v63  ;;  %p6002_p11 = scmp.ne.s32.totalorder %s6000_s4, %s6001_s5  ;;  %p6007_p1 = scmp.lt.s32.totalorder %s6005_s8, %s6001_s5 }
 0x2b3   : > { %vm1450_vm3 = vcmp.lt.s32.totalorder %v1414_v39, 16  ;;  %v700_v48 = vmul.u32 18, %v699_v61  ;;  %vm722_vm13 = vc.u32 %v720_v26, %v716_v46  ;;  %v3407_v45 = vsel %vm3370_vm4, %v3404_v19, %v3406_v2  ;;  %v4566_v16 = vpop.f32.mrf.mxu0 }
 0x2b4   : > { %v4663_v50 = vmax.f32 %v7937_v20, 0.0  ;;  %v717_v47 = vshrl.u32 %v712_v38, 16  ;;  %v723_v31 = vsel %vm722_vm13, 1, %v8319_v17  ;;  %v4368_v35 = vadd.f32 %v7909_v42, %v3975_v41  ;;  %3567 = vmatmul.bf16.gmra.mxu1 %v3407_v45  ;;  %p6003_p12 = pnand %p6002_p11, %p6110_p5  ;;  %p6008_p2 = por %p6007_p1, %p6006_p0 }
 0x2b5   : > { %v701_v1 = vsub.s32 %v7907_v6, %v700_v48  ;;  %v725_v60 = vadd.s32 %v723_v31, %v721_v23  ;;  %v3755_v43 = vpack.c.b16 %v3736_v13, %v3736_v13  ;;  %v4444_v58 = vrot.slane %v7923_v44, 3  ;;  %v7976_v40 = vpop.f32.mrf.mxu3 }
 0x2b6   : > { %v4770_v4 = vsel %vm1450_vm3, %v4662_v15, 0.0  ;;  %v3591_v0 = vadd.f32 %v3528_v57, %v6838_v52  ;;  %v7957_v24 = vadd.s32 144, %v6997_v49  ;;  %v7960_v19 = vadd.s32 152, %v6997_v49  ;;  %v3913_v18 = vpop.f32.mrf.mxu2  ;;  %p6004_p13 = pneg %p6003_p12 }
 0x2b7   : > { %vm1271_vm14 = vcmp.ne.s32.totalorder %v701_v1, 0  ;;  %vm1307_vm15 = vcmp.lt.s32.totalorder %v701_v1, 0  ;;  %v1379_v42 = vadd.s32 18, %v701_v1  ;;  %v726_v8 = vadd.s32 %v725_v60, %v715_v30 }
 0x2b8   : > { %vm1343_vm0 = vmand %vm1307_vm15, %vm1271_vm14  ;;  %v7962_v6 = vadd.f32 %v4563_v11, %v4368_v35  ;;  %v3791_v56 = vrot.slane %v3755_v43, 2  ;;  %v4445_v44 = vsel %vm4408_vm5, %v4442_v7, %v4444_v58  ;;  %v736_v52 = vand.u32 65535, %v7957_v24  ;;  %v3530_v10 = vpop.f32.mrf.mxu1  ;;  %p6009_p3 = pnand %p6008_p2, %p6004_p13 }
 0x2b9   : > { %v1415_v5 = vsel %vm1343_vm0, %v1379_v42, %v701_v1  ;;  %v727_v3 = vadd.s32 %v726_v8, %v717_v47  ;;  %4605 = vmatmul.bf16.gmra.mxu0 %v4445_v44  ;;  %v737_v36 = vshrl.u32 %v7957_v24, 16  ;;  %v7970_v51 = vadd.s32 160, %v6997_v49 }
 0x2ba   : > { %vm1451_vm1 = vcmp.lt.s32.totalorder %v1415_v5, 16  ;;  %v3792_v62 = vsel %vm3370_vm4, %v3789_v55, %v3791_v56  ;;  %v739_v37 = vmul.u32 14564, %v736_v52  ;;  %v740_v11 = vmul.u32 58254, %v736_v52 }
 0x2bb   : > { %v4771_v38 = vsel %vm1451_vm1, %v4663_v50, 0.0  ;;  %v728_v7 = vshrl.u32 %v727_v3, 4  ;;  %3952 = vmatmul.bf16.gmra.mxu2 %v3792_v62  ;;  %v741_v15 = vmul.u32 14564, %v737_v36  ;;  %v765_v34 = vand.u32 65535, %v7960_v19  ;;  %v4568_v29 = vpop.f32.mrf.mxu0 }
 0x2bc   : > { %v5830_v33 = vpack.c.bf16 %v4771_v38, %v4770_v4  ;;  %v742_v59 = vmul.u32 58254, %v737_v36  ;;  %v743_v20 = vshll.u32 %v740_v11, 16  ;;  %v3976_v28 = vadd.f32 %v3913_v18, %v3591_v0 }
 0x2bd   : > { %v729_v25 = vmul.u32 18, %v728_v7  ;;  %v4664_v55 = vmax.f32 %v7962_v6, 0.0  ;;  %v744_v12 = vshrl.u32 %v740_v11, 16  ;;  %v745_v46 = vshll.u32 %v741_v15, 16  ;;  %v7995_v44 = vpop.f32.mrf.mxu3 }
 0x2be   : > { %5887 = vst [vmem:[%s7029_s24 + $0x48] sm:$0xff] %v5830_v33   ;;  %vm747_vm4 = vc.u32 %v739_v37, %v743_v20  ;;  %v749_v63 = vadd.s32 %v743_v20, %v739_v37  ;;  %v4369_v22 = vadd.f32 %v7929_v9, %v3976_v28  ;;  %v766_v30 = vshrl.u32 %v7960_v19, 16  ;;  %v3915_v48 = vpop.f32.mrf.mxu2 }
 0x2bf   : > { %v730_v61 = vsub.s32 %v7916_v14, %v729_v25  ;;  %v748_v53 = vsel %vm747_vm4, 1, %v8319_v17  ;;  %v768_v26 = vmul.u32 14564, %v765_v34  ;;  %v769_v21 = vmul.u32 58254, %v765_v34 }
 0x2c0   : > { %v750_v2 = vadd.s32 %v748_v53, %v742_v59  ;;  %vm751_vm5 = vc.u32 %v749_v63, %v745_v46  ;;  %v7984_v39 = vadd.f32 %v4566_v16, %v4369_v22  ;;  %v770_v23 = vmul.u32 14564, %v766_v30  ;;  %v3533_v16 = vpop.f32.mrf.mxu1 }
 0x2c1   : > { %vm1272_vm2 = vcmp.ne.s32.totalorder %v730_v61, 0  ;;  %vm1308_vm7 = vcmp.lt.s32.totalorder %v730_v61, 0  ;;  %v1380_v41 = vadd.s32 18, %v730_v61  ;;  %v752_v13 = vsel %vm751_vm5, 1, %v8319_v17 }
 0x2c2   : > { %vm1344_vm6 = vmand %vm1308_vm7, %vm1272_vm2  ;;  %v746_v9 = vshrl.u32 %v741_v15, 16  ;;  %v754_v57 = vadd.s32 %v752_v13, %v750_v2  ;;  %v771_v45 = vmul.u32 58254, %v766_v30  ;;  %v772_v14 = vshll.u32 %v769_v21, 16 }
 0x2c3   : > { %v1416_v50 = vsel %vm1344_vm6, %v1380_v41, %v730_v61  ;;  %v4665_v47 = vmax.f32 %v7984_v39, 0.0  ;;  %v3592_v31 = vadd.f32 %v3530_v10, %v6851_v32  ;;  %v774_v35 = vshll.u32 %v770_v23, 16  ;;  %v4571_v58 = vpop.f32.mrf.mxu0 }
 0x2c4   : > { %v755_v1 = vadd.s32 %v754_v57, %v744_v12  ;;  %v773_v60 = vshrl.u32 %v769_v21, 16  ;;  %vm776_vm8 = vc.u32 %v768_v26, %v772_v14  ;;  %v778_v43 = vadd.s32 %v772_v14, %v768_v26 }
 0x2c5   : > { %vm7989_vm9 = vcmp.lt.s32.totalorder %v1416_v50, 16  ;;  %v775_v0 = vshrl.u32 %v770_v23, 16  ;;  %v777_v42 = vsel %vm776_vm8, 1, %v8319_v17  ;;  %v3977_v8 = vadd.f32 %v3915_v48, %v3592_v31 }
 0x2c6   : > { %v756_v6 = vadd.s32 %v755_v1, %v746_v9  ;;  %v779_v56 = vadd.s32 %v777_v42, %v771_v45  ;;  %vm780_vm10 = vc.u32 %v778_v43, %v774_v35  ;;  %v794_v32 = vand.u32 65535, %v7970_v51  ;;  %v3918_v34 = vpop.f32.mrf.mxu2  ;;  %v8388_v1 = vld [vmem:[#allocation16_spill] sm:$0xff] }
 0x2c7   : > { %v781_v52 = vsel %vm780_vm10, 1, %v8319_v17  ;;  %v4370_v5 = vadd.f32 %v7945_v27, %v3977_v8  ;;  %v795_v3 = vshrl.u32 %v7970_v51, 16  ;;  %v8001_v36 = vadd.s32 168, %v6997_v49 }
 0x2c8   : > { %v757_v18 = vshrl.u32 %v756_v6, 4  ;;  %v783_v62 = vadd.s32 %v781_v52, %v779_v56  ;;  %v797_v37 = vmul.u32 14564, %v794_v32  ;;  %v798_v11 = vmul.u32 58254, %v794_v32  ;;  %v3535_v46 = vpop.f32.mrf.mxu1 }
 0x2c9   : > { %v4772_v38 = vsel %vm7989_vm9, %v4664_v55, 0.0  ;;  %v8005_v7 = vadd.f32 %v4568_v29, %v4370_v5  ;;  %v3593_v15 = vadd.f32 %v3533_v16, %v6864_v54  ;;  %v799_v10 = vmul.u32 14564, %v795_v3 }
 0x2ca   : > { %v758_v33 = vmul.u32 18, %v757_v18  ;;  %v784_v27 = vadd.s32 %v783_v62, %v773_v60  ;;  %v800_v59 = vmul.u32 58254, %v795_v3  ;;  %v801_v20 = vshll.u32 %v798_v11, 16 }
 0x2cb   : > { %v802_v28 = vshrl.u32 %v798_v11, 16  ;;  %v803_v25 = vshll.u32 %v799_v10, 16  ;;  %v3978_v12 = vadd.f32 %v3918_v34, %v3593_v15  ;;  %v823_v63 = vand.u32 65535, %v8001_v36  ;;  %v8014_v2 = vpop.f32.mrf.mxu0 }
 0x2cc   : > { %v759_v22 = vsub.s32 %v7957_v24, %v758_v33  ;;  %v785_v30 = vadd.s32 %v784_v27, %v775_v0  ;;  %vm805_vm11 = vc.u32 %v797_v37, %v801_v20  ;;  %v807_v29 = vadd.s32 %v801_v20, %v797_v37 }
 0x2cd   : > { %v4666_v55 = vmax.f32 %v8005_v7, 0.0  ;;  %v806_v54 = vsel %vm805_vm11, 1, %v8319_v17  ;;  %v4371_v61 = vadd.f32 %v7976_v40, %v3978_v12  ;;  %v824_v53 = vshrl.u32 %v8001_v36, 16  ;;  %v4316_v40 = vpop.f32.mrf.mxu3 }
 0x2ce   : > { %vm1273_vm12 = vcmp.ne.s32.totalorder %v759_v22, 0  ;;  %vm1309_vm3 = vcmp.lt.s32.totalorder %v759_v22, 0  ;;  %v1381_v26 = vadd.s32 18, %v759_v22  ;;  %v786_v21 = vshrl.u32 %v785_v30, 4  ;;  %v3920_v31 = vpop.f32.mrf.mxu2 }
 0x2cf   : > { %vm1345_vm13 = vmand %vm1309_vm3, %vm1273_vm12  ;;  %v804_v23 = vshrl.u32 %v799_v10, 16  ;;  %v808_v24 = vadd.s32 %v806_v54, %v800_v59  ;;  %vm809_vm14 = vc.u32 %v807_v29, %v803_v25  ;;  %v8016_v41 = vadd.f32 %v4571_v58, %v4371_v61 }
 0x2d0   : > { %v1417_v13 = vsel %vm1345_vm13, %v1381_v26, %v759_v22  ;;  %v787_v48 = vmul.u32 18, %v786_v21  ;;  %v810_v9 = vsel %vm809_vm14, 1, %v8319_v17  ;;  %v827_v57 = vmul.u32 58254, %v823_v63  ;;  %v3538_v8 = vpop.f32.mrf.mxu1 }
 0x2d1   : > { %vm1453_vm15 = vcmp.lt.s32.totalorder %v1417_v13, 16  ;;  %v812_v45 = vadd.s32 %v810_v9, %v808_v24  ;;  %v826_v14 = vmul.u32 14564, %v823_v63  ;;  %v828_v50 = vmul.u32 14564, %v824_v53 }
 0x2d2   : > { %v4773_v35 = vsel %vm1453_vm15, %v4665_v47, 0.0  ;;  %v788_v16 = vsub.s32 %v7960_v19, %v787_v48  ;;  %v3594_v60 = vadd.f32 %v3535_v46, %v8388_v1  ;;  %v830_v43 = vshll.u32 %v827_v57, 16 }
 0x2d3   : > { %v5835_v58 = vpack.c.bf16 %v4773_v35, %v4772_v38  ;;  %v813_v4 = vadd.s32 %v812_v45, %v802_v28  ;;  %v829_v0 = vmul.u32 58254, %v824_v53  ;;  %v832_v42 = vshll.u32 %v828_v50, 16  ;;  %v8389_v38 = vld [vmem:[#allocation17_spill] sm:$0xff]  ;;  %v4576_v15 = vpop.f32.mrf.mxu0 }
 0x2d4   : > { %vm1274_vm0 = vcmp.ne.s32.totalorder %v788_v16, 0  ;;  %vm1310_vm1 = vcmp.lt.s32.totalorder %v788_v16, 0  ;;  %v1382_v6 = vadd.s32 18, %v788_v16  ;;  %v4667_v56 = vmax.f32 %v8016_v41, 0.0 }
 0x2d5   : > { %5888 = vst [vmem:[%s7029_s24 + $0x50] sm:$0xff] %v5835_v58   ;;  %vm1346_vm4 = vmand %vm1310_vm1, %vm1274_vm0  ;;  %v814_v32 = vadd.s32 %v813_v4, %v804_v23  ;;  %vm834_vm5 = vc.u32 %v826_v14, %v830_v43  ;;  %v836_v39 = vadd.s32 %v830_v43, %v826_v14  ;;  %v3979_v47 = vadd.f32 %v3920_v31, %v3594_v60  ;;  %v4318_v63 = vpop.f32.mrf.mxu3  ;;  %v8390_v31 = vld [vmem:[#allocation18_spill] sm:$0xff] }
 0x2d6   : > { %v1418_v19 = vsel %vm1346_vm4, %v1382_v6, %v788_v16  ;;  %v831_v52 = vshrl.u32 %v827_v57, 16  ;;  %v835_v5 = vsel %vm834_vm5, 1, %v8319_v17  ;;  %v8027_v3 = vadd.s32 176, %v6997_v49  ;;  %v3923_v20 = vpop.f32.mrf.mxu2 }
 0x2d7   : > { %vm1454_vm2 = vcmp.lt.s32.totalorder %v1418_v19, 16  ;;  %v815_v18 = vshrl.u32 %v814_v32, 4  ;;  %v837_v62 = vadd.s32 %v835_v5, %v829_v0  ;;  %vm838_vm7 = vc.u32 %v836_v39, %v832_v42 }
 0x2d8   : > { %v839_v37 = vsel %vm838_vm7, 1, %v8319_v17  ;;  %v4372_v11 = vadd.f32 %v7995_v44, %v3979_v47  ;;  %v3595_v7 = vadd.f32 %v3538_v8, %v8389_v38  ;;  %v852_v10 = vand.u32 65535, %v8027_v3  ;;  %v3540_v29 = vpop.f32.mrf.mxu1 }
 0x2d9   : > { %v816_v34 = vmul.u32 18, %v815_v18  ;;  %v833_v33 = vshrl.u32 %v828_v50, 16  ;;  %v841_v27 = vadd.s32 %v839_v37, %v837_v62  ;;  %v853_v59 = vshrl.u32 %v8027_v3, 16 }
 0x2da   : > { %v4774_v28 = vsel %vm1454_vm2, %v4666_v55, 0.0  ;;  %v855_v25 = vmul.u32 14564, %v852_v10  ;;  %v856_v12 = vmul.u32 58254, %v852_v10  ;;  %v3980_v46 = vadd.f32 %v3923_v20, %v3595_v7  ;;  %v8391_v20 = vld [vmem:[#allocation19_spill] sm:$0xff] }
 0x2db   : > { %v817_v22 = vsub.s32 %v7970_v51, %v816_v34  ;;  %v842_v30 = vadd.s32 %v841_v27, %v831_v52  ;;  %v857_v44 = vmul.u32 14564, %v853_v59  ;;  %v8036_v54 = vadd.s32 184, %v6997_v49  ;;  %v4578_v43 = vpop.f32.mrf.mxu0 }
 0x2dc   : > { %v8039_v61 = vadd.f32 %v8014_v2, %v4372_v11  ;;  %v858_v53 = vmul.u32 58254, %v853_v59  ;;  %v859_v26 = vshll.u32 %v856_v12, 16  ;;  %v4373_v21 = vadd.f32 %v4316_v40, %v3980_v46 }
 0x2dd   : > { %vm1275_vm6 = vcmp.ne.s32.totalorder %v817_v22, 0  ;;  %vm1311_vm8 = vcmp.lt.s32.totalorder %v817_v22, 0  ;;  %v1383_v55 = vadd.s32 18, %v817_v22  ;;  %v843_v23 = vadd.s32 %v842_v30, %v833_v33  ;;  %v4321_v52 = vpop.f32.mrf.mxu3 }
 0x2de   : > { %vm1347_vm9 = vmand %vm1311_vm8, %vm1275_vm6  ;;  %v860_v24 = vshrl.u32 %v856_v12, 16  ;;  %v861_v41 = vshll.u32 %v857_v44, 16  ;;  %vm863_vm10 = vc.u32 %v855_v25, %v859_v26  ;;  %v865_v51 = vadd.s32 %v859_v26, %v855_v25  ;;  %v3925_v16 = vpop.f32.mrf.mxu2 }
 0x2df   : > { %v1419_v13 = vsel %vm1347_vm9, %v1383_v55, %v817_v22  ;;  %v844_v48 = vshrl.u32 %v843_v23, 4  ;;  %v864_v9 = vsel %vm863_vm10, 1, %v8319_v17  ;;  %v8042_v57 = vadd.f32 %v4576_v15, %v4373_v21 }
 0x2e0   : > { %vm1455_vm11 = vcmp.lt.s32.totalorder %v1419_v13, 16  ;;  %v862_v2 = vshrl.u32 %v857_v44, 16  ;;  %v866_v45 = vadd.s32 %v864_v9, %v858_v53  ;;  %vm867_vm12 = vc.u32 %v865_v51, %v861_v41 }
 0x2e1   : > { %v4775_v40 = vsel %vm1455_vm11, %v4667_v56, 0.0  ;;  %v845_v14 = vmul.u32 18, %v844_v48  ;;  %v868_v50 = vsel %vm867_vm12, 1, %v8319_v17  ;;  %v3596_v35 = vadd.f32 %v3540_v29, %v8390_v31  ;;  %v3543_v56 = vpop.f32.mrf.mxu1 }
 0x2e2   : > { %v5840_v1 = vpack.c.bf16 %v4775_v40, %v4774_v28  ;;  %v870_v60 = vadd.s32 %v868_v50, %v866_v45  ;;  %v881_v58 = vand.u32 65535, %v8036_v54  ;;  %v882_v4 = vshrl.u32 %v8036_v54, 16  ;;  %v8392_v50 = vld [vmem:[#allocation20_spill] sm:$0xff] }
 0x2e3   : > { %v846_v0 = vsub.s32 %v8001_v36, %v845_v14  ;;  %v4668_v42 = vmax.f32 %v8039_v61, 0.0  ;;  %v4669_v8 = vmax.f32 %v8042_v57, 0.0  ;;  %v3981_v6 = vadd.f32 %v3925_v16, %v3596_v35  ;;  %v4581_v23 = vpop.f32.mrf.mxu0 }
 0x2e4   : > { %5889 = vst [vmem:[%s7029_s24 + $0x58] sm:$0xff] %v5840_v1   ;;  %v871_v32 = vadd.s32 %v870_v60, %v860_v24  ;;  %v884_v39 = vmul.u32 14564, %v881_v58  ;;  %v885_v47 = vmul.u32 58254, %v881_v58  ;;  %v886_v19 = vmul.u32 14564, %v882_v4 }
 0x2e5   : > { %vm1276_vm3 = vcmp.ne.s32.totalorder %v846_v0, 0  ;;  %vm1312_vm13 = vcmp.lt.s32.totalorder %v846_v0, 0  ;;  %v1384_v5 = vadd.s32 18, %v846_v0  ;;  %v8053_v18 = vadd.s32 192, %v6997_v49  ;;  %v4323_v45 = vpop.f32.mrf.mxu3 }
 0x2e6   : > { %vm1348_vm14 = vmand %vm1312_vm13, %vm1276_vm3  ;;  %v872_v36 = vadd.s32 %v871_v32, %v862_v2  ;;  %v887_v62 = vmul.u32 58254, %v882_v4  ;;  %v888_v37 = vshll.u32 %v885_v47, 16  ;;  %v890_v11 = vshll.u32 %v886_v19, 16  ;;  %v3928_v12 = vpop.f32.mrf.mxu2 }
 0x2e7   : > { %v1420_v38 = vsel %vm1348_vm14, %v1384_v5, %v846_v0  ;;  %v889_v7 = vshrl.u32 %v885_v47, 16  ;;  %v4374_v15 = vadd.f32 %v4318_v63, %v3981_v6  ;;  %v8056_v10 = vadd.s32 200, %v6997_v49 }
 0x2e8   : > { %vm1456_vm15 = vcmp.lt.s32.totalorder %v1420_v38, 16  ;;  %v873_v34 = vshrl.u32 %v872_v36, 4  ;;  %vm892_vm0 = vc.u32 %v884_v39, %v888_v37  ;;  %v894_v33 = vadd.s32 %v888_v37, %v884_v39 }
 0x2e9   : > { %v891_v27 = vshrl.u32 %v886_v19, 16  ;;  %v893_v59 = vsel %vm892_vm0, 1, %v8319_v17  ;;  %v3597_v28 = vadd.f32 %v3543_v56, %v8391_v20  ;;  %v910_v25 = vand.u32 65535, %v8053_v18  ;;  %v3545_v53 = vpop.f32.mrf.mxu1 }
 0x2ea   : > { %v874_v46 = vmul.u32 18, %v873_v34  ;;  %v895_v22 = vadd.s32 %v893_v59, %v887_v62  ;;  %vm896_vm1 = vc.u32 %v894_v33, %v890_v11  ;;  %v911_v63 = vshrl.u32 %v8053_v18, 16 }
 0x2eb   : > { %v4776_v30 = vsel %vm1456_vm15, %v4668_v42, 0.0  ;;  %v897_v44 = vsel %vm896_vm1, 1, %v8319_v17  ;;  %v913_v29 = vmul.u32 14564, %v910_v25  ;;  %v914_v61 = vmul.u32 58254, %v910_v25  ;;  %v4583_v38 = vpop.f32.mrf.mxu0 }
 0x2ec   : > { %v875_v26 = vsub.s32 %v8027_v3, %v874_v46  ;;  %v899_v21 = vadd.s32 %v897_v44, %v895_v22  ;;  %v8064_v55 = vadd.f32 %v4578_v43, %v4374_v15  ;;  %v915_v24 = vmul.u32 14564, %v911_v63 }
 0x2ed   : > { %v916_v41 = vmul.u32 58254, %v911_v63  ;;  %v917_v51 = vshll.u32 %v914_v61, 16  ;;  %v918_v13 = vshrl.u32 %v914_v61, 16  ;;  %v3982_v48 = vadd.f32 %v3928_v12, %v3597_v28  ;;  %v4326_v28 = vpop.f32.mrf.mxu3 }
 0x2ee   : > { %vm1277_vm4 = vcmp.ne.s32.totalorder %v875_v26, 0  ;;  %vm1313_vm5 = vcmp.lt.s32.totalorder %v875_v26, 0  ;;  %v1385_v9 = vadd.s32 18, %v875_v26  ;;  %v900_v2 = vadd.s32 %v899_v21, %v889_v7  ;;  %v3930_v58 = vpop.f32.mrf.mxu2 }
 0x2ef   : > { %vm1349_vm2 = vmand %vm1313_vm5, %vm1277_vm4  ;;  %v919_v40 = vshll.u32 %v915_v24, 16  ;;  %vm921_vm7 = vc.u32 %v913_v29, %v917_v51  ;;  %v923_v14 = vadd.s32 %v917_v51, %v913_v29  ;;  %v3598_v3 = vadd.f32 %v3545_v53, %v8392_v50 }
 0x2f0   : > { %v1421_v31 = vsel %vm1349_vm2, %v1385_v9, %v875_v26  ;;  %v901_v35 = vadd.s32 %v900_v2, %v891_v27  ;;  %v922_v16 = vsel %vm921_vm7, 1, %v8319_v17  ;;  %v4375_v1 = vadd.f32 %v4321_v52, %v3982_v48 }
 0x2f1   : > { %vm1457_vm6 = vcmp.lt.s32.totalorder %v1421_v31, 16  ;;  %v924_v60 = vadd.s32 %v922_v16, %v916_v41  ;;  %vm925_vm8 = vc.u32 %v923_v14, %v919_v40  ;;  %v939_v43 = vand.u32 65535, %v8056_v10  ;;  %v3548_v19 = vpop.f32.mrf.mxu1 }
 0x2f2   : > { %v4777_v4 = vsel %vm1457_vm6, %v4669_v8, 0.0  ;;  %v902_v0 = vshrl.u32 %v901_v35, 4  ;;  %v920_v42 = vshrl.u32 %v915_v24, 16  ;;  %v926_v6 = vsel %vm925_vm8, 1, %v8319_v17 }
 0x2f3   : > { %v5845_v56 = vpack.c.bf16 %v4777_v4, %v4776_v30  ;;  %v928_v32 = vadd.s32 %v926_v6, %v924_v60  ;;  %v8072_v39 = vadd.f32 %v4581_v23, %v4375_v1  ;;  %v940_v47 = vshrl.u32 %v8056_v10, 16  ;;  %v4586_v31 = vpop.f32.mrf.mxu0 }
 0x2f4   : > { %v903_v52 = vmul.u32 18, %v902_v0  ;;  %v942_v5 = vmul.u32 14564, %v939_v43  ;;  %v943_v36 = vmul.u32 58254, %v939_v43  ;;  %v3983_v11 = vadd.f32 %v3930_v58, %v3598_v3 }
 0x2f5   : > { %5890 = vst [vmem:[%s7029_s24 + $0x60] sm:$0xff] %v5845_v56   ;;  %v929_v62 = vadd.s32 %v928_v32, %v918_v13  ;;  %v944_v37 = vmul.u32 14564, %v940_v47  ;;  %v4670_v8 = vmax.f32 %v8064_v55, 0.0  ;;  %v945_v7 = vmul.u32 58254, %v940_v47  ;;  %v8393_v55 = vld [vmem:[#allocation21_spill] sm:$0xff] }
 0x2f6   : > { %v904_v57 = vsub.s32 %v8036_v54, %v903_v52  ;;  %v946_v15 = vshll.u32 %v943_v36, 16  ;;  %v4671_v33 = vmax.f32 %v8072_v39, 0.0  ;;  %v8080_v59 = vadd.s32 208, %v6997_v49  ;;  %v3933_v22 = vpop.f32.mrf.mxu2 }
 0x2f7   : > { %v930_v34 = vadd.s32 %v929_v62, %v920_v42  ;;  %v948_v27 = vshll.u32 %v944_v37, 16  ;;  %v4376_v46 = vadd.f32 %v4323_v45, %v3983_v11  ;;  %v947_v53 = vshrl.u32 %v943_v36, 16  ;;  %v4328_v42 = vpop.f32.mrf.mxu3 }
 0x2f8   : > { %vm1278_vm9 = vcmp.ne.s32.totalorder %v904_v57, 0  ;;  %vm1314_vm10 = vcmp.lt.s32.totalorder %v904_v57, 0  ;;  %v1386_v20 = vadd.s32 18, %v904_v57  ;;  %vm950_vm11 = vc.u32 %v942_v5, %v946_v15 }
 0x2f9   : > { %vm1350_vm12 = vmand %vm1314_vm10, %vm1278_vm9  ;;  %v931_v25 = vshrl.u32 %v930_v34, 4  ;;  %v951_v54 = vsel %vm950_vm11, 1, %v8319_v17  ;;  %v952_v12 = vadd.s32 %v946_v15, %v942_v5  ;;  %v968_v44 = vand.u32 65535, %v8080_v59  ;;  %v3550_v26 = vpop.f32.mrf.mxu1 }
 0x2fa   : > { %v1422_v63 = vsel %vm1350_vm12, %v1386_v20, %v904_v57  ;;  %v953_v30 = vadd.s32 %v951_v54, %v945_v7  ;;  %v969_v29 = vshrl.u32 %v8080_v59, 16  ;;  %v3599_v23 = vadd.f32 %v3548_v19, %v8393_v55 }
 0x2fb   : > { %vm1458_vm3 = vcmp.lt.s32.totalorder %v1422_v63, 16  ;;  %v932_v61 = vmul.u32 18, %v931_v25  ;;  %vm954_vm13 = vc.u32 %v952_v12, %v948_v27  ;;  %v971_v24 = vmul.u32 14564, %v968_v44 }
 0x2fc   : > { %v955_v21 = vsel %vm954_vm13, 1, %v8319_v17  ;;  %v972_v41 = vmul.u32 58254, %v968_v44  ;;  %v949_v13 = vshrl.u32 %v944_v37, 16  ;;  %v973_v9 = vmul.u32 14564, %v969_v29  ;;  %v4588_v44 = vpop.f32.mrf.mxu0 }
 0x2fd   : > { %v933_v51 = vsub.s32 %v8053_v18, %v932_v61  ;;  %v957_v48 = vadd.s32 %v955_v21, %v953_v30  ;;  %v4778_v2 = vsel %vm1458_vm3, %v4670_v8, 0.0  ;;  %v8088_v45 = vadd.f32 %v4583_v38, %v4376_v46 }
 0x2fe   : > { %v974_v40 = vmul.u32 58254, %v969_v29  ;;  %v975_v14 = vshll.u32 %v972_v41, 16  ;;  %v976_v35 = vshrl.u32 %v972_v41, 16  ;;  %v977_v16 = vshll.u32 %v973_v9, 16  ;;  %v3935_v4 = vpop.f32.mrf.mxu2 }
 0x2ff   : > { %vm1279_vm14 = vcmp.ne.s32.totalorder %v933_v51, 0  ;;  %vm1315_vm15 = vcmp.lt.s32.totalorder %v933_v51, 0  ;;  %v1387_v50 = vadd.s32 18, %v933_v51  ;;  %v958_v3 = vadd.s32 %v957_v48, %v947_v53 }
 0x300   : > { %vm1351_vm0 = vmand %vm1315_vm15, %vm1279_vm14  ;;  %vm979_vm1 = vc.u32 %v971_v24, %v975_v14  ;;  %v981_v1 = vadd.s32 %v975_v14, %v971_v24  ;;  %v3984_v58 = vadd.f32 %v3933_v22, %v3599_v23  ;;  %v8092_v6 = vadd.s32 216, %v6997_v49 }
 0x301   : > { %v1423_v60 = vsel %vm1351_vm0, %v1387_v50, %v933_v51  ;;  %v959_v18 = vadd.s32 %v958_v3, %v949_v13  ;;  %v980_v43 = vsel %vm979_vm1, 1, %v8319_v17  ;;  %v978_v39 = vshrl.u32 %v973_v9, 16  ;;  %v3553_v19 = vpop.f32.mrf.mxu1  ;;  %v4331_v51 = vpop.f32.mrf.mxu3 }
 0x302   : > { %vm1459_vm4 = vcmp.lt.s32.totalorder %v1423_v60, 16  ;;  %v982_v0 = vadd.s32 %v980_v43, %v974_v40  ;;  %vm983_vm5 = vc.u32 %v981_v1, %v977_v16  ;;  %v997_v36 = vand.u32 65535, %v8092_v6 }
 0x303   : > { %v4779_v56 = vsel %vm1459_vm4, %v4671_v33, 0.0  ;;  %v960_v32 = vshrl.u32 %v959_v18, 4  ;;  %v984_v47 = vsel %vm983_vm5, 1, %v8319_v17  ;;  %v998_v62 = vshrl.u32 %v8092_v6, 16  ;;  %v8394_v33 = vld [vmem:[#allocation22_spill] sm:$0xff] }
 0x304   : > { %v5850_v52 = vpack.c.bf16 %v4779_v56, %v4778_v2  ;;  %v986_v5 = vadd.s32 %v984_v47, %v982_v0  ;;  %v4377_v11 = vadd.f32 %v4326_v28, %v3984_v58  ;;  %v1000_v8 = vmul.u32 14564, %v997_v36  ;;  %v8397_v2 = vld [vmem:[#allocation23_spill] sm:$0xff] }
 0x305   : > { %v961_v37 = vmul.u32 18, %v960_v32  ;;  %v1001_v38 = vmul.u32 58254, %v997_v36  ;;  %v1002_v7 = vmul.u32 14564, %v998_v62  ;;  %v4672_v34 = vmax.f32 %v8088_v45, 0.0  ;;  %v4591_v36 = vpop.f32.mrf.mxu0 }
 0x306   : > { %5891 = vst [vmem:[%s7029_s24 + $0x68] sm:$0xff] %v5850_v52   ;;  %v987_v57 = vadd.s32 %v986_v5, %v976_v35  ;;  %v3600_v27 = vadd.f32 %v3550_v26, %v8394_v33  ;;  %v8102_v20 = vadd.s32 224, %v6997_v49  ;;  %v1003_v54 = vmul.u32 58254, %v998_v62  ;;  %v3938_v63 = vpop.f32.mrf.mxu2 }
 0x307   : > { %v962_v15 = vsub.s32 %v8056_v10, %v961_v37  ;;  %v1004_v12 = vshll.u32 %v1001_v38, 16  ;;  %v1006_v46 = vshll.u32 %v1002_v7, 16  ;;  %v4637_v22 = vadd.f32 %v4586_v31, %v4377_v11 }
 0x308   : > { %v988_v25 = vadd.s32 %v987_v57, %v978_v39  ;;  %v3985_v61 = vadd.f32 %v3935_v4, %v3600_v27  ;;  %v1005_v53 = vshrl.u32 %v1001_v38, 16  ;;  %v1026_v21 = vand.u32 65535, %v8102_v20 }
 0x309   : > { %vm1280_vm2 = vcmp.ne.s32.totalorder %v962_v15, 0  ;;  %vm1316_vm7 = vcmp.lt.s32.totalorder %v962_v15, 0  ;;  %v1388_v28 = vadd.s32 18, %v962_v15  ;;  %vm1008_vm8 = vc.u32 %v1000_v8, %v1004_v12  ;;  %v3555_v40 = vpop.f32.mrf.mxu1 }
 0x30a   : > { %vm8104_vm6 = vmand %vm1316_vm7, %vm1280_vm2  ;;  %v989_v10 = vshrl.u32 %v988_v25, 4  ;;  %v1010_v29 = vadd.s32 %v1004_v12, %v1000_v8  ;;  %v1009_v26 = vsel %vm1008_vm8, 1, %v8319_v17  ;;  %v1027_v55 = vshrl.u32 %v8102_v20, 16 }
 0x30b   : > { %v1424_v23 = vsel %vm8104_vm6, %v1388_v28, %v962_v15  ;;  %v1011_v41 = vadd.s32 %v1009_v26, %v1003_v54  ;;  %v4673_v13 = vmax.f32 %v4637_v22, 0.0  ;;  %v1007_v48 = vshrl.u32 %v1002_v7, 16  ;;  %v4333_v15 = vpop.f32.mrf.mxu3 }
 0x30c   : > { %v990_v24 = vmul.u32 18, %v989_v10  ;;  %vm1012_vm9 = vc.u32 %v1010_v29, %v1006_v46  ;;  %v3601_v45 = vadd.f32 %v3553_v19, %v8397_v2  ;;  %v1030_v3 = vmul.u32 58254, %v1026_v21  ;;  %v8398_v29 = vld [vmem:[#allocation24_spill] sm:$0xff] }
 0x30d   : > { %v1013_v9 = vsel %vm1012_vm9, 1, %v8319_v17  ;;  %v1031_v31 = vmul.u32 14564, %v1027_v55  ;;  %vm1460_vm10 = vcmp.lt.s32.totalorder %v1424_v23, 16  ;;  %v4378_v35 = vadd.f32 %v4328_v42, %v3985_v61 }
 0x30e   : > { %v991_v14 = vsub.s32 %v8080_v59, %v990_v24  ;;  %v1015_v50 = vadd.s32 %v1013_v9, %v1011_v41  ;;  %v1029_v16 = vmul.u32 14564, %v1026_v21  ;;  %v8117_v1 = vadd.s32 232, %v6997_v49  ;;  %v3940_v56 = vpop.f32.mrf.mxu2 }
 0x30f   : > { %v1032_v43 = vmul.u32 58254, %v1027_v55  ;;  %v1033_v58 = vshll.u32 %v1030_v3, 16  ;;  %v1035_v4 = vshll.u32 %v1031_v31, 16  ;;  %v3986_v0 = vadd.f32 %v3938_v63, %v3601_v45 }
 0x310   : > { %vm1281_vm11 = vcmp.ne.s32.totalorder %v991_v14, 0  ;;  %vm1317_vm12 = vcmp.lt.s32.totalorder %v991_v14, 0  ;;  %v1389_v60 = vadd.s32 18, %v991_v14  ;;  %v1016_v18 = vadd.s32 %v1015_v50, %v1005_v53  ;;  %v8401_v50 = vld [vmem:[#allocation25_spill] sm:$0xff] }
 0x311   : > { %vm1353_vm3 = vmand %vm1317_vm12, %vm1281_vm11  ;;  %v4780_v59 = vsel %vm1460_vm10, %v4672_v34, 0.0  ;;  %v1055_v47 = vand.u32 65535, %v8117_v1  ;;  %vm1037_vm14 = vc.u32 %v1029_v16, %v1033_v58  ;;  %v1039_v42 = vadd.s32 %v1033_v58, %v1029_v16  ;;  %v3558_v46 = vpop.f32.mrf.mxu1 }
 0x312   : > { %v1425_v32 = vsel %vm1353_vm3, %v1389_v60, %v991_v14  ;;  %v1017_v39 = vadd.s32 %v1016_v18, %v1007_v48  ;;  %v1056_v19 = vshrl.u32 %v8117_v1, 16  ;;  %v1034_v62 = vshrl.u32 %v1030_v3, 16 }
 0x313   : > { %vm1461_vm13 = vcmp.lt.s32.totalorder %v1425_v32, 16  ;;  %v1038_v37 = vsel %vm1037_vm14, 1, %v8319_v17  ;;  %vm1041_vm15 = vc.u32 %v1039_v42, %v1035_v4  ;;  %v4379_v8 = vadd.f32 %v4331_v51, %v3986_v0  ;;  %v4336_v58 = vpop.f32.mrf.mxu3 }
 0x314   : > { %v4781_v52 = vsel %vm1461_vm13, %v4673_v13, 0.0  ;;  %v1018_v5 = vshrl.u32 %v1017_v39, 4  ;;  %v1040_v57 = vadd.s32 %v1038_v37, %v1032_v43  ;;  %v1042_v7 = vsel %vm1041_vm15, 1, %v8319_v17 }
 0x315   : > { %v5855_v11 = vpack.c.bf16 %v4781_v52, %v4780_v59  ;;  %v1058_v34 = vmul.u32 14564, %v1055_v47  ;;  %v1059_v33 = vmul.u32 58254, %v1055_v47  ;;  %v4638_v27 = vadd.f32 %v4588_v44, %v4378_v35 }
 0x316   : > { %v1019_v38 = vmul.u32 18, %v1018_v5  ;;  %v1036_v25 = vshrl.u32 %v1031_v31, 16  ;;  %v1044_v54 = vadd.s32 %v1042_v7, %v1040_v57  ;;  %v1060_v12 = vmul.u32 14564, %v1056_v19  ;;  %v3943_v21 = vpop.f32.mrf.mxu2 }
 0x317   : > { %5892 = vst [vmem:[%s7029_s24 + $0x70] sm:$0xff] %v5855_v11   ;;  %v1061_v22 = vmul.u32 58254, %v1056_v19  ;;  %v1062_v63 = vshll.u32 %v1059_v33, 16  ;;  %v8125_v10 = vadd.f32 %v4591_v36, %v4379_v8  ;;  %v3602_v61 = vadd.f32 %v3555_v40, %v8398_v29  ;;  %v4593_v40 = vpop.f32.mrf.mxu0 }
 0x318   : > { %v1020_v28 = vsub.s32 %v8092_v6, %v1019_v38  ;;  %v1045_v30 = vadd.s32 %v1044_v54, %v1034_v62  ;;  %v1064_v53 = vshll.u32 %v1060_v12, 16  ;;  %v4674_v55 = vmax.f32 %v4638_v27, 0.0 }
 0x319   : > { %vm1066_vm4 = vc.u32 %v1058_v34, %v1062_v63  ;;  %v1068_v24 = vadd.s32 %v1062_v63, %v1058_v34  ;;  %v3987_v13 = vadd.f32 %v3940_v56, %v3602_v61  ;;  %v8136_v48 = vadd.s32 240, %v6997_v49  ;;  %v3560_v47 = vpop.f32.mrf.mxu1 }
 0x31a   : > { %vm1282_vm0 = vcmp.ne.s32.totalorder %v1020_v28, 0  ;;  %vm1318_vm1 = vcmp.lt.s32.totalorder %v1020_v28, 0  ;;  %v1390_v26 = vadd.s32 18, %v1020_v28  ;;  %v1046_v23 = vadd.s32 %v1045_v30, %v1036_v25 }
 0x31b   : > { %vm8128_vm5 = vmand %vm1318_vm1, %vm1282_vm0  ;;  %v1067_v6 = vsel %vm1066_vm4, 1, %v8319_v17  ;;  %v4675_v2 = vmax.f32 %v8125_v10, 0.0  ;;  %v1063_v45 = vshrl.u32 %v1059_v33, 16  ;;  %vm1070_vm2 = vc.u32 %v1068_v24, %v1064_v53 }
 0x31c   : > { %v1426_v41 = vsel %vm8128_vm5, %v1390_v26, %v1020_v28  ;;  %v1069_v51 = vadd.s32 %v1067_v6, %v1061_v22  ;;  %v1047_v9 = vshrl.u32 %v1046_v23, 4  ;;  %v1071_v14 = vsel %vm1070_vm2, 1, %v8319_v17 }
 0x31d   : > { %v3603_v3 = vadd.f32 %v3558_v46, %v8401_v50  ;;  %v1084_v31 = vand.u32 65535, %v8136_v48  ;;  %v1085_v35 = vshrl.u32 %v8136_v48, 16  ;;  %vm1462_vm7 = vcmp.lt.s32.totalorder %v1426_v41, 16 }
 0x31e   : > { %v1048_v16 = vmul.u32 18, %v1047_v9  ;;  %v1065_v60 = vshrl.u32 %v1060_v12, 16  ;;  %v1073_v18 = vadd.s32 %v1071_v14, %v1069_v51  ;;  %v4380_v43 = vadd.f32 %v4333_v15, %v3987_v13  ;;  %v3945_v8 = vpop.f32.mrf.mxu2  ;;  %v8404_v13 = vld [vmem:[#allocation5_spill] sm:$0xff] }
 0x31f   : > { %v1087_v4 = vmul.u32 14564, %v1084_v31  ;;  %v1088_v0 = vmul.u32 58254, %v1084_v31  ;;  %v1089_v56 = vmul.u32 14564, %v1085_v35  ;;  %v3988_v39 = vadd.f32 %v3943_v21, %v3603_v3  ;;  %v4596_v22 = vpop.f32.mrf.mxu0 }
 0x320   : > { %v1049_v59 = vsub.s32 %v8102_v20, %v1048_v16  ;;  %v1074_v32 = vadd.s32 %v1073_v18, %v1063_v45  ;;  %v8145_v42 = vadd.s32 248, %v6997_v49  ;;  %v4782_v19 = vsel %vm1462_vm7, %v4674_v55, 0.0  ;;  %v4338_v55 = vpop.f32.mrf.mxu3 }
 0x321   : > { %v1090_v52 = vmul.u32 58254, %v1085_v35  ;;  %v1091_v5 = vshll.u32 %v1088_v0, 16  ;;  %v1093_v36 = vshll.u32 %v1089_v56, 16  ;;  %v1092_v11 = vshrl.u32 %v1088_v0, 16  ;;  %v3563_v24 = vpop.f32.mrf.mxu1  ;;  %v8405_v35 = vld [vmem:[#allocation7_spill] sm:$0xff] }
 0x322   : > { %vm1283_vm6 = vcmp.ne.s32.totalorder %v1049_v59, 0  ;;  %vm1319_vm8 = vcmp.lt.s32.totalorder %v1049_v59, 0  ;;  %v1391_v62 = vadd.s32 18, %v1049_v59  ;;  %v1075_v37 = vadd.s32 %v1074_v32, %v1065_v60 }
 0x323   : > { %vm1355_vm9 = vmand %vm1319_vm8, %vm1283_vm6  ;;  %vm1095_vm10 = vc.u32 %v1087_v4, %v1091_v5  ;;  %v1097_v57 = vadd.s32 %v1091_v5, %v1087_v4  ;;  %v1113_v20 = vand.u32 65535, %v8145_v42  ;;  %v1114_v34 = vshrl.u32 %v8145_v42, 16 }
 0x324   : > { %v1427_v38 = vsel %vm1355_vm9, %v1391_v62, %v1049_v59  ;;  %v1076_v7 = vshrl.u32 %v1075_v37, 4  ;;  %v1096_v15 = vsel %vm1095_vm10, 1, %v8319_v17  ;;  %v1094_v63 = vshrl.u32 %v1089_v56, 16 }
 0x325   : > { %vm1463_vm11 = vcmp.lt.s32.totalorder %v1427_v38, 16  ;;  %v1098_v33 = vadd.s32 %v1096_v15, %v1090_v52  ;;  %vm1099_vm12 = vc.u32 %v1097_v57, %v1093_v36  ;;  %v1116_v27 = vmul.u32 14564, %v1113_v20 }
 0x326   : > { %v4783_v25 = vsel %vm1463_vm11, %v4675_v2, 0.0  ;;  %v1077_v54 = vmul.u32 18, %v1076_v7  ;;  %v1100_v12 = vsel %vm1099_vm12, 1, %v8319_v17  ;;  %v1117_v46 = vmul.u32 58254, %v1113_v20  ;;  %v3948_v60 = vpop.f32.mrf.mxu2 }
 0x327   : > { %v5860_v28 = vpack.c.bf16 %v4783_v25, %v4782_v19  ;;  %v1102_v30 = vadd.s32 %v1100_v12, %v1098_v33  ;;  %v1118_v10 = vmul.u32 14564, %v1114_v34  ;;  %v4381_v61 = vadd.f32 %v4336_v58, %v3988_v39  ;;  %v4598_v62 = vpop.f32.mrf.mxu0 }
 0x328   : > { %v1078_v29 = vsub.s32 %v8117_v1, %v1077_v54  ;;  %v1119_v53 = vmul.u32 58254, %v1114_v34  ;;  %v1120_v26 = vshll.u32 %v1117_v46, 16  ;;  %v4640_v21 = vadd.f32 %v4593_v40, %v4380_v43  ;;  %v4341_v15 = vpop.f32.mrf.mxu3 }
 0x329   : > { %5893 = vst [vmem:[%s7029_s24 + $0x78] sm:$0xff] %v5860_v28   ;;  %v1103_v44 = vadd.s32 %v1102_v30, %v1092_v11  ;;  %v1122_v23 = vshll.u32 %v1118_v10, 16  ;;  %v3604_v1 = vadd.f32 %v3560_v47, %v8404_v13  ;;  %v4641_v45 = vadd.f32 %v4596_v22, %v4381_v61 }
 0x32a   : > { %vm1284_vm3 = vcmp.ne.s32.totalorder %v1078_v29, 0  ;;  %vm1320_vm13 = vcmp.lt.s32.totalorder %v1078_v29, 0  ;;  %v1392_v6 = vadd.s32 18, %v1078_v29  ;;  %vm1124_vm14 = vc.u32 %v1116_v27, %v1120_v26 }
 0x32b   : > { %vm8153_vm15 = vmand %vm1320_vm13, %vm1284_vm3  ;;  %v1104_v51 = vadd.s32 %v1103_v44, %v1094_v63  ;;  %v1125_v9 = vsel %vm1124_vm14, 1, %v8319_v17  ;;  %v1126_v2 = vadd.s32 %v1120_v26, %v1116_v27  ;;  %v1121_v40 = vshrl.u32 %v1117_v46, 16 }
 0x32c   : > { %v1127_v14 = vadd.s32 %v1125_v9, %v1119_v53  ;;  %v8160_v50 = vadd.s32 256, %v6997_v49  ;;  %v3989_v31 = vadd.f32 %v3945_v8, %v3604_v1  ;;  %v3605_v16 = vadd.f32 %v3563_v24, %v8405_v35 }
 0x32d   : > { %v1105_v3 = vshrl.u32 %v1104_v51, 4  ;;  %vm1128_vm0 = vc.u32 %v1126_v2, %v1122_v23  ;;  %v1428_v18 = vsel %vm8153_vm15, %v1392_v6, %v1078_v29  ;;  %v4676_v0 = vmax.f32 %v4640_v21, 0.0 }
 0x32e   : > { %v1129_v43 = vsel %vm1128_vm0, 1, %v8319_v17  ;;  %v1142_v58 = vand.u32 65535, %v8160_v50  ;;  %v1143_v4 = vshrl.u32 %v8160_v50, 16  ;;  %v1123_v59 = vshrl.u32 %v1118_v10, 16  ;;  %v3565_v10 = vpop.f32.mrf.mxu1  ;;  %v3950_v24 = vpop.f32.mrf.mxu2 }
 0x32f   : > { %v1106_v56 = vmul.u32 18, %v1105_v3  ;;  %v1131_v32 = vadd.s32 %v1129_v43, %v1127_v14  ;;  %v3990_v52 = vadd.f32 %v3948_v60, %v3605_v16  ;;  %vm1464_vm1 = vcmp.lt.s32.totalorder %v1428_v18, 16  ;;  %v4601_v9 = vpop.f32.mrf.mxu0  ;;  %v8409_v3 = vld [vmem:[#allocation6_spill] sm:$0xff] }
 0x330   : > { %v1145_v39 = vmul.u32 14564, %v1142_v58  ;;  %v1146_v47 = vmul.u32 58254, %v1142_v58  ;;  %v1147_v19 = vmul.u32 14564, %v1143_v4  ;;  %v4677_v36 = vmax.f32 %v4641_v45, 0.0 }
 0x331   : > { %v1107_v5 = vsub.s32 %v8136_v48, %v1106_v56  ;;  %v1132_v37 = vadd.s32 %v1131_v32, %v1121_v40  ;;  %v4382_v11 = vadd.f32 %v4338_v55, %v3989_v31  ;;  %v1148_v57 = vmul.u32 58254, %v1143_v4 }
 0x332   : > { %v1149_v20 = vshll.u32 %v1146_v47, 16  ;;  %v1151_v8 = vshll.u32 %v1147_v19, 16  ;;  %v4784_v34 = vsel %vm1464_vm1, %v4676_v0, 0.0  ;;  %v4383_v27 = vadd.f32 %v4341_v15, %v3990_v52  ;;  %v4343_v52 = vpop.f32.mrf.mxu3 }
 0x333   : > { %vm1285_vm4 = vcmp.ne.s32.totalorder %v1107_v5, 0  ;;  %vm1321_vm5 = vcmp.lt.s32.totalorder %v1107_v5, 0  ;;  %v1393_v38 = vadd.s32 18, %v1107_v5  ;;  %v1133_v7 = vadd.s32 %v1132_v37, %v1123_v59 }
 0x334   : > { %vm1357_vm2 = vmand %vm1321_vm5, %vm1285_vm4  ;;  %vm1153_vm7 = vc.u32 %v1145_v39, %v1149_v20  ;;  %v1155_v33 = vadd.s32 %v1149_v20, %v1145_v39  ;;  %v8171_v12 = vadd.s32 264, %v6997_v49  ;;  %v1150_v46 = vshrl.u32 %v1146_v47, 16 }
 0x335   : > { %v1429_v25 = vsel %vm1357_vm2, %v1393_v38, %v1107_v5  ;;  %v1134_v54 = vshrl.u32 %v1133_v7, 4  ;;  %v1154_v48 = vsel %vm1153_vm7, 1, %v8319_v17  ;;  %v1152_v53 = vshrl.u32 %v1147_v19, 16  ;;  %v8413_v38 = vld [vmem:[#allocation27_spill] sm:$0xff] }
 0x336   : > { %vm1465_vm6 = vcmp.lt.s32.totalorder %v1429_v25, 16  ;;  %v1156_v28 = vadd.s32 %v1154_v48, %v1148_v57  ;;  %vm1157_vm8 = vc.u32 %v1155_v33, %v1151_v8  ;;  %v1171_v29 = vand.u32 65535, %v8171_v12  ;;  %v8412_v8 = vld [vmem:[#allocation28_spill] sm:$0xff] }
 0x337   : > { %v4785_v22 = vsel %vm1465_vm6, %v4677_v36, 0.0  ;;  %v1135_v63 = vmul.u32 18, %v1134_v54  ;;  %v1158_v30 = vsel %vm1157_vm8, 1, %v8319_v17  ;;  %v1172_v21 = vshrl.u32 %v8171_v12, 16 }
 0x338   : > { %v5865_v61 = vpack.c.bf16 %v4785_v22, %v4784_v34  ;;  %v1160_v26 = vadd.s32 %v1158_v30, %v1156_v28  ;;  %v4642_v55 = vadd.f32 %v4598_v62, %v4382_v11  ;;  %v1174_v23 = vmul.u32 14564, %v1171_v29  ;;  %v3568_v62 = vpop.f32.mrf.mxu1  ;;  %v4603_v28 = vpop.f32.mrf.mxu0 }
 0x339   : > { %v1136_v44 = vsub.s32 %v8145_v42, %v1135_v63  ;;  %v1175_v6 = vmul.u32 58254, %v1171_v29  ;;  %v1176_v51 = vmul.u32 14564, %v1172_v21  ;;  %v1177_v13 = vmul.u32 58254, %v1172_v21  ;;  %v8408_v42 = vld [vmem:[#allocation26_spill] sm:$0xff] }
 0x33a   : > { %5894 = vst [vmem:[%s7029_s24 + $0x80] sm:$0xff] %v5865_v61   ;;  %v1161_v41 = vadd.s32 %v1160_v26, %v1150_v46  ;;  %v4643_v14 = vadd.f32 %v4601_v9, %v4383_v27  ;;  %v3346_v31 = vadd.f32 %v8409_v3, %v8408_v42  ;;  %v4678_v16 = vmax.f32 %v4642_v55, 0.0  ;;  %v4346_v45 = vpop.f32.mrf.mxu3 }
 0x33b   : > { %vm1286_vm9 = vcmp.ne.s32.totalorder %v1136_v44, 0  ;;  %vm1322_vm10 = vcmp.lt.s32.totalorder %v1136_v44, 0  ;;  %v1394_v1 = vadd.s32 18, %v1136_v44  ;;  %v1178_v2 = vshll.u32 %v1175_v6, 16 }
 0x33c   : > { %vm8178_vm11 = vmand %vm1322_vm10, %vm1286_vm9  ;;  %v1162_v40 = vadd.s32 %v1161_v41, %v1152_v53  ;;  %v1180_v35 = vshll.u32 %v1176_v51, 16  ;;  %v3606_v43 = vadd.f32 %v3565_v10, %v3346_v31  ;;  %v1179_v58 = vshrl.u32 %v1175_v6, 16 }
 0x33d   : > { %vm1182_vm12 = vc.u32 %v1174_v23, %v1178_v2  ;;  %v1184_v60 = vadd.s32 %v1178_v2, %v1174_v23  ;;  %v1430_v0 = vsel %vm8178_vm11, %v1394_v1, %v1136_v44  ;;  %v8188_v59 = vadd.s32 272, %v6997_v49 }
 0x33e   : > { %v1163_v18 = vshrl.u32 %v1162_v40, 4  ;;  %v1183_v4 = vsel %vm1182_vm12, 1, %v8319_v17  ;;  %v4679_v39 = vmax.f32 %v4643_v14, 0.0  ;;  %v3991_v19 = vadd.f32 %v3950_v24, %v3606_v43  ;;  %v3953_v54 = vpop.f32.mrf.mxu2  ;;  %v8414_v43 = vld [vmem:[#allocation30_spill] sm:$0xff] }
 0x33f   : > { %v1185_v56 = vadd.s32 %v1183_v4, %v1177_v13  ;;  %vm1186_vm3 = vc.u32 %v1184_v60, %v1180_v35  ;;  %v1181_v5 = vshrl.u32 %v1176_v51, 16  ;;  %v1200_v37 = vand.u32 65535, %v8188_v59 }
 0x340   : > { %v1164_v32 = vmul.u32 18, %v1163_v18  ;;  %v1187_v47 = vsel %vm1186_vm3, 1, %v8319_v17  ;;  %v1201_v11 = vshrl.u32 %v8188_v59, 16  ;;  %vm8193_vm13 = vcmp.lt.s32.totalorder %v1430_v0, 16  ;;  %v3570_v60 = vpop.f32.mrf.mxu1 }
 0x341   : > { %v1189_v36 = vadd.s32 %v1187_v47, %v1185_v56  ;;  %v3347_v7 = vadd.f32 %v8413_v38, %v8412_v8  ;;  %v8201_v15 = vadd.s32 280, %v6997_v49  ;;  %v1203_v33 = vmul.u32 14564, %v1200_v37  ;;  %v4606_v56 = vpop.f32.mrf.mxu0 }
 0x342   : > { %v1165_v20 = vsub.s32 %v8160_v50, %v1164_v32  ;;  %v1204_v27 = vmul.u32 58254, %v1200_v37  ;;  %v1205_v25 = vmul.u32 14564, %v1201_v11  ;;  %v1206_v63 = vmul.u32 58254, %v1201_v11 }
 0x343   : > { %v1190_v34 = vadd.s32 %v1189_v36, %v1179_v58  ;;  %v3607_v46 = vadd.f32 %v3568_v62, %v3347_v7  ;;  %v4786_v10 = vsel %vm8193_vm13, %v4678_v16, 0.0  ;;  %v1229_v61 = vand.u32 65535, %v8201_v15  ;;  %v8415_v58 = vld [vmem:[#allocation29_spill] sm:$0xff] }
 0x344   : > { %vm1287_vm14 = vcmp.ne.s32.totalorder %v1165_v20, 0  ;;  %vm1323_vm15 = vcmp.lt.s32.totalorder %v1165_v20, 0  ;;  %v1395_v48 = vadd.s32 18, %v1165_v20  ;;  %v1207_v50 = vshll.u32 %v1204_v27, 16 }
 0x345   : > { %vm1359_vm0 = vmand %vm1323_vm15, %vm1287_vm14  ;;  %v1191_v22 = vadd.s32 %v1190_v34, %v1181_v5  ;;  %v1209_v30 = vshll.u32 %v1205_v25, 16  ;;  %v3992_v29 = vadd.f32 %v3953_v54, %v3607_v46  ;;  %v1208_v44 = vshrl.u32 %v1204_v27, 16 }
 0x346   : > { %v1431_v49 = vsel %vm1359_vm0, %v1395_v48, %v1165_v20  ;;  %vm1211_vm4 = vc.u32 %v1203_v33, %v1207_v50  ;;  %v1213_v26 = vadd.s32 %v1207_v50, %v1203_v33  ;;  %v1230_v23 = vshrl.u32 %v8201_v15, 16 }
 0x347   : > { %vm1467_vm1 = vcmp.lt.s32.totalorder %v1431_v49, 16  ;;  %v1192_v53 = vshrl.u32 %v1191_v22, 4  ;;  %v1212_v55 = vsel %vm1211_vm4, 1, %v8319_v17  ;;  %v1232_v13 = vmul.u32 14564, %v1229_v61 }
 0x348   : > { %v4787_v21 = vsel %vm1467_vm1, %v4679_v39, 0.0  ;;  %v1214_v41 = vadd.s32 %v1212_v55, %v1206_v63  ;;  %vm1215_vm5 = vc.u32 %v1213_v26, %v1209_v30  ;;  %v1233_v1 = vmul.u32 58254, %v1229_v61  ;;  %v3955_v39 = vpop.f32.mrf.mxu2 }
 0x349   : > { %v5870_v6 = vpack.c.bf16 %v4787_v21, %v4786_v10  ;;  %v1193_v24 = vmul.u32 18, %v1192_v53  ;;  %v1216_v51 = vsel %vm1215_vm5, 1, %v8319_v17  ;;  %v1234_v9 = vmul.u32 14564, %v1230_v23  ;;  %v4608_v50 = vpop.f32.mrf.mxu0 }
 0x34a   : > { %v1210_v40 = vshrl.u32 %v1205_v25, 16  ;;  %v1218_v14 = vadd.s32 %v1216_v51, %v1214_v41  ;;  %v1235_v42 = vmul.u32 58254, %v1230_v23  ;;  %v1236_v3 = vshll.u32 %v1233_v1, 16  ;;  %v4348_v25 = vpop.f32.mrf.mxu3 }
 0x34b   : > { %5895 = vst [vmem:[%s7029_s24 + $0x88] sm:$0xff] %v5870_v6   ;;  %v1194_v2 = vsub.s32 %v8171_v12, %v1193_v24  ;;  %v1238_v31 = vshll.u32 %v1234_v9, 16  ;;  %v4384_v35 = vadd.f32 %v4343_v52, %v3991_v19  ;;  %v4385_v18 = vadd.f32 %v4346_v45, %v3992_v29 }
 0x34c   : > { %v1219_v16 = vadd.s32 %v1218_v14, %v1208_v44  ;;  %v3348_v4 = vadd.f32 %v8415_v58, %v8414_v43  ;;  %vm1240_vm2 = vc.u32 %v1232_v13, %v1236_v3  ;;  %v1242_v0 = vadd.s32 %v1236_v3, %v1232_v13 }
 0x34d   : > { %vm1288_vm7 = vcmp.ne.s32.totalorder %v1194_v2, 0  ;;  %vm1324_vm6 = vcmp.lt.s32.totalorder %v1194_v2, 0  ;;  %v1241_v12 = vsel %vm1240_vm2, 1, %v8319_v17  ;;  %v1237_v5 = vshrl.u32 %v1233_v1, 16 }
 0x34e   : > { %v1220_v32 = vadd.s32 %v1219_v16, %v1210_v40  ;;  %v3608_v47 = vadd.f32 %v3570_v60, %v3348_v4  ;;  %v1243_v36 = vadd.s32 %v1241_v12, %v1235_v42  ;;  %vm1244_vm8 = vc.u32 %v1242_v0, %v1238_v31  ;;  %vm8215_vm9 = vmand %vm1324_vm6, %vm1288_vm7 }
 0x34f   : > { %v1396_v19 = vadd.s32 18, %v1194_v2  ;;  %v1245_v62 = vsel %vm1244_vm8, 1, %v8319_v17  ;;  %v4644_v11 = vadd.f32 %v4603_v28, %v4384_v35  ;;  %v1239_v57 = vshrl.u32 %v1234_v9, 16 }
 0x350   : > { %v1221_v52 = vshrl.u32 %v1220_v32, 4  ;;  %v1247_v20 = vadd.s32 %v1245_v62, %v1243_v36  ;;  %v3993_v8 = vadd.f32 %v3955_v39, %v3608_v47  ;;  %v4645_v7 = vadd.f32 %v4606_v56, %v4385_v18 }
 0x351   : > { %v1432_v33 = vsel %vm8215_vm9, %v1396_v19, %v1194_v2  ;;  %v4680_v54 = vmax.f32 %v4644_v11, 0.0 }
 0x352   : > { %v1222_v38 = vmul.u32 18, %v1221_v52  ;;  %v1248_v34 = vadd.s32 %v1247_v20, %v1237_v5  ;;  %v4386_v48 = vadd.f32 %v4348_v25, %v3993_v8  ;;  %v4681_v28 = vmax.f32 %v4645_v7, 0.0 }
 0x353   : > { %vm1468_vm12 = vcmp.lt.s32.totalorder %v1432_v33, 16 }
 0x354   : > { %v1223_v27 = vsub.s32 %v8188_v59, %v1222_v38  ;;  %v1249_v17 = vadd.s32 %v1248_v34, %v1239_v57  ;;  %v4646_v10 = vadd.f32 %v4608_v50, %v4386_v48  ;;  %v4788_v59 = vsel %vm1468_vm12, %v4680_v54, 0.0 }
 0x356   : > { %vm1289_vm10 = vcmp.ne.s32.totalorder %v1223_v27, 0  ;;  %vm1325_vm11 = vcmp.lt.s32.totalorder %v1223_v27, 0  ;;  %v1397_v46 = vadd.s32 18, %v1223_v27  ;;  %v1250_v22 = vshrl.u32 %v1249_v17, 4 }
 0x357   : > { %vm1361_vm3 = vmand %vm1325_vm11, %vm1289_vm10  ;;  %v4682_v26 = vmax.f32 %v4646_v10, 0.0 }
 0x358   : > { %v1433_v63 = vsel %vm1361_vm3, %v1397_v46, %v1223_v27  ;;  %v1251_v30 = vmul.u32 18, %v1250_v22 }
 0x359   : > { %vm1469_vm13 = vcmp.lt.s32.totalorder %v1433_v63, 16 }
 0x35a   : > { %v4789_v49 = vsel %vm1469_vm13, %v4681_v28, 0.0  ;;  %v1252_v61 = vsub.s32 %v8201_v15, %v1251_v30 }
 0x35b   : > { %v5875_v29 = vpack.c.bf16 %v4789_v49, %v4788_v59 }
 0x35c   : > { %vm1290_vm14 = vcmp.ne.s32.totalorder %v1252_v61, 0  ;;  %vm1326_vm15 = vcmp.lt.s32.totalorder %v1252_v61, 0  ;;  %v1398_v53 = vadd.s32 18, %v1252_v61 }
 0x35d   : > { %5896 = vst [vmem:[%s7029_s24 + $0x90] sm:$0xff] %v5875_v29   ;;  %vm1362_vm0 = vmand %vm1326_vm15, %vm1290_vm14 }
 0x35e   : > { %v1434_v21 = vsel %vm1362_vm0, %v1398_v53, %v1252_v61 }
 0x35f   : > { %vm1470_vm1 = vcmp.lt.s32.totalorder %v1434_v21, 16 }
 0x360   : > { %v4790_v44 = vsel %vm1470_vm1, %v4682_v26, 0.0 }
 0x361   : > { %v4826_v15 = vpack.c.bf16 %v4790_v44, %v4790_v44 }
 0x363   : > { %4865 = vst [vmem:[%s7029_s24 + $0x98] sm:$0xf] %v4826_v15 }
 0x364   : > { %6012 = shalt.err (!%p6009_p3)
}
 0x365   : > { %s6050_s11 = smov 64   ;;  %s6051_s17 = smov 4  }
 0x366   : > { %5924 = dma.vmem_to_hbm [thread:$0]  (%p6110_p5), %s4883_s16, 2688, %s4885_s29, %s4870_s30, %s6050_s11, %s6050_s11, %s6051_s17  }
 0x367 PF: > { %p5930_p4 = scmp.ge.s32.totalorder %s6047_s15, 2  ;;  %s4899_s19 = sand.u32 1, %s6035_s12  }
 0x368   : > { %s4900_s20 = scalar_lea.sflag [#allocation3], %s4899_s19 }
 0x369   : > { %p5927_p7 = pnand %p5930_p4, %p6114_p6 }
 0x36b   : > { %p5928_p8 = pneg %p5927_p7 }
 0x36d   : > { %6030 = dma.done.wait (%p5928_p8), %s4900_s20, 2688  }
 0x36e   : > { %6032 = vsyncadd (%p5928_p8), %s4900_s20, 4294964608  ;;  %p13_p9 = scmp.ge.s32.totalorder %s6097_s18, 4   ;;  %s8418_s12 = smov %s6039_s13 }
 0x36f   : > { %s8419_s13 = smov %s6043_s14  ;;  %s8420_s14 = smov %s6108_s21 }
 0x370   : > { %s8421_s15 = smov %s6097_s18  ;;  %15 = sbr.rel (!%p13_p9) target bundleno = 3 (0x3), region = 75 }
 0x375   :  { %4906 = vsyncpa [#allocation3], 1 }
 0x376   :  { %4908 = vsyncpa [#allocation3 + $0x1], 1 }

</bundles_post_ra>
